<compile_context>
chip_gen: v5e
topology: v5e:2x2
jax: 0.10.0
libtpu: 0.0.40
codegen_flags: <defaults>
</compile_context>

<pallas_src>
import functools

import numpy as np
import jax
import jax.numpy as jnp
from jax import lax
from jax.experimental import pallas as pl
from jax.experimental.pallas import tpu as pltpu

PAD_TAG, START_TAG, END_TAG = 0, 1, 2
NEG = -10000.0


def init_transitions(tag_size, pad_tag=PAD_TAG, start_tag=START_TAG, end_tag=END_TAG):
    # Deterministic 'zeros' init, exactly as CRFLayer.__init__ does it.
    t = jnp.zeros((tag_size, tag_size), jnp.float32)
    t = t.at[:, start_tag].set(NEG)
    t = t.at[end_tag, :].set(NEG)
    t = t.at[:, pad_tag].set(NEG)
    t = t.at[pad_tag, :].set(NEG)
    return t


def _viterbi_fused_kernel(leng_ref, trans_ref, feats_ref,      # inputs
                          tag_seq_ref, score_ref,              # outputs
                          bp_ref,                              # VMEM scratch
                          *, start_tag, end_tag, unroll):
    Bt, T, K = feats_ref.shape

    # ---- constants hoisted out of the time loop (computed once per tile) ---
    trans = trans_ref[...]                                       # (K, K) f32
    lm1 = leng_ref[...] - 1                                      # (Bt, 1) i32
    col = lax.broadcasted_iota(jnp.int32, (1, K), 1)             # lane iota
    pen_row = jnp.where(
        lax.broadcasted_iota(jnp.int32, (1, 1, K), 2) == end_tag, 0.0, NEG
    ).astype(jnp.float32)                                        # (1, 1, K)
    from_idx = lax.broadcasted_iota(jnp.int32, (1, K, K), 1)     # "from" index
    tcol = lax.broadcasted_iota(jnp.int32, (1, T), 1)            # time iota

    init_prev = jnp.broadcast_to(
        jnp.where(col == start_tag, 0.0, NEG), (Bt, K)).astype(jnp.float32)

    # ------------------ Viterbi DP recursion over time ----------------------
    def dp_body(t, carry):
        prev, fin = carry                                        # (Bt,K) f32
        obs = feats_ref[:, pl.ds(t, 1), :]                       # (Bt,1,K)
        is_end = lm1 == t                                        # (Bt,1) bool
        end_pen = jnp.where(is_end[:, :, None], pen_row, 0.0)    # (Bt,1,K)
        # scores[b, from, to] = trans[from,to] + obs[b,to] (+END forcing) + prev[b,from]
        scores = trans[None, :, :] + obs + end_pen + prev[:, :, None]  # (Bt,K,K)
        new_out = jnp.max(scores, axis=1)                        # (Bt,K)
        bp = jnp.min(jnp.where(scores == new_out[:, None, :], from_idx, K), axis=1)
        bp_ref[t] = bp.astype(jnp.int32)                         # stays in VMEM
        # Snapshot viterbi scores at each sequence's last token (no argmax here).
        fin = jnp.where(is_end, new_out, fin)
        return new_out, fin

    _, fin = lax.fori_loop(
        1, T, dp_body,
        (init_prev, jnp.zeros((Bt, K), jnp.float32)),
        unroll=unroll)

    # Final per-sequence score / tag: a single argmax after the loop.
    m_max = jnp.max(fin, axis=1, keepdims=True)                  # (Bt,1)
    ftag = jnp.min(jnp.where(fin == m_max, col, K),
                   axis=1, keepdims=True).astype(jnp.int32)      # (Bt,1)

    # ------------------ backtracking (in-kernel, vectorized) ----------------
    def bt_body(i, carry):
        cur, tags = carry                                        # (Bt,1) i32, (Bt,T) i32
        t = T - 1 - i
        bp_t1 = bp_ref[jnp.minimum(t + 1, T - 1)]                # (Bt,K)
        # one-hot gather along lanes: from_bp[b] = bp_t1[b, cur[b]]
        from_bp = jnp.sum(jnp.where(col == cur, bp_t1, 0), axis=1, keepdims=True)
        is_last = lm1 == t
        in_seq = t < lm1
        cur_new = jnp.where(is_last, ftag,
                            jnp.where(in_seq, from_bp, jnp.zeros_like(from_bp)))
        tags = jnp.where(tcol == t, cur_new, tags)
        return cur_new, tags

    _, tags = lax.fori_loop(
        0, T, bt_body,
        (jnp.zeros((Bt, 1), jnp.int32), jnp.zeros((Bt, T), jnp.int32)),
        unroll=unroll)

    tag_seq_ref[...] = tags
    score_ref[...] = m_max


def crf_viterbi_decode(feats, leng, transitions, *,
                       start_tag=START_TAG, end_tag=END_TAG, batch_tile=None):
    """Equivalent of CRFLayer.forward: returns (tag_seq (B,T) int32, tag_scores (B,) f32).

    Assumes leng sorted descending, min(leng) >= 2, max(leng) == T (same
    preconditions the PyTorch packed-sequence implementation needs)."""
    B, T, K = feats.shape
    if batch_tile is None:
        # Multiple of 8 keeps the (Bt,1)/(Bt,T) blocks sublane-aligned and vreg
        # pressure low; multiple tiles let v7x's two TCs split the batch.
        batch_tile = 8 if (B % 8 == 0) else B
    assert B % batch_tile == 0
    nb = B // batch_tile

    feats32 = feats.astype(jnp.float32)                 # kept (B,T,K): no transpose
    leng2 = leng.reshape(B, 1).astype(jnp.int32)
    unroll = bool(T <= 16)

    kernel = functools.partial(_viterbi_fused_kernel, start_tag=start_tag,
                               end_tag=end_tag, unroll=unroll)
    tag_seq, score = pl.pallas_call(
        kernel,
        out_shape=(
            jax.ShapeDtypeStruct((B, T), jnp.int32),    # decoded tags (zero padded)
            jax.ShapeDtypeStruct((B, 1), jnp.float32),  # viterbi score per sequence
        ),
        grid_spec=pltpu.PrefetchScalarGridSpec(
            num_scalar_prefetch=0,
            grid=(nb,),
            in_specs=[
                pl.BlockSpec((batch_tile, 1), lambda b: (b, 0)),        # leng
                pl.BlockSpec((K, K), lambda b: (0, 0)),                 # transitions
                pl.BlockSpec((batch_tile, T, K), lambda b: (b, 0, 0)),  # feats (B,T,K)
            ],
            out_specs=[
                pl.BlockSpec((batch_tile, T), lambda b: (b, 0)),
                pl.BlockSpec((batch_tile, 1), lambda b: (b, 0)),
            ],
            scratch_shapes=[
                pltpu.VMEM((T, batch_tile, K), jnp.int32),   # backpointers (VMEM only)
            ],
        ),
        compiler_params=pltpu.CompilerParams(
            dimension_semantics=("parallel",),
            vmem_limit_bytes=32 * 1024 * 1024,
        ),
    )(leng2, transitions.astype(jnp.float32), feats32)
    return tag_seq, score[:, 0]


# ---------------- pure-numpy reference (same semantics as the torch module) --
def _viterbi_ref(feats, leng, trans):
    feats = np.asarray(feats, np.float32)
    trans = np.asarray(trans, np.float32)
    leng = np.asarray(leng)
    B, T, K = feats.shape
    out = np.full((B, K), NEG, np.float32)
    out[:, START_TAG] = 0.0
    out_hist = np.zeros((T, B, K), np.float32)
    bp_hist = np.zeros((T, B, K), np.int64)
    out_hist[0] = out
    pen_to = np.where(np.arange(K) == END_TAG, 0.0, NEG).astype(np.float32)
    for t in range(1, T):
        local = trans[None, :, :] + feats[:, t, :][:, None, :]
        is_end = (leng - 1 == t).astype(np.float32)
        local = local + is_end[:, None, None] * pen_to[None, None, :]
        scores = local + out[:, :, None]
        out = scores.max(axis=1)
        bp_hist[t] = scores.argmax(axis=1)
        out_hist[t] = out
    tag_seq = np.zeros((B, T), np.int64)
    tag_scores = np.zeros((B,), np.float32)
    for b in range(B):
        e = int(leng[b]) - 1
        cur = int(out_hist[e, b].argmax())
        tag_scores[b] = out_hist[e, b].max()
        tag_seq[b, e] = cur
        for t in range(e - 1, -1, -1):
            cur = int(bp_hist[t + 1, b, cur])
            tag_seq[b, t] = cur
    return tag_seq, tag_scores


if __name__ == "__main__":
    tag_size = 8       # tagset_size=6 (+ START/END) in the original convention
    B, T, K = 8, 8, tag_size

    key = jax.random.PRNGKey(0)
    feats = jax.random.normal(key, (B, T, K), dtype=jnp.float32)
    # lengths must be sorted descending, all >= 2, max == T (pack_padded contract)
    leng = jnp.array([8, 8, 7, 6, 5, 4, 3, 2], dtype=jnp.int32)
    transitions = init_transitions(tag_size)

    run = jax.jit(functools.partial(crf_viterbi_decode, transitions=transitions))
    tag_seq, tag_scores = run(feats, leng)
    tag_seq = jax.block_until_ready(tag_seq)
    tag_scores = jax.block_until_ready(tag_scores)

    ref_seq, ref_scores = _viterbi_ref(feats, leng, transitions)
    np.testing.assert_array_equal(np.asarray(tag_seq), ref_seq.astype(np.int32))
    np.testing.assert_allclose(np.asarray(tag_scores), ref_scores, rtol=1e-5, atol=1e-4)

    print("KERNEL_OK")
</pallas_src>

<mosaic_0001>
module attributes {stable_mosaic.version = 11 : i64} {
  func.func @_viterbi_fused_kernel(%arg0: i32, %arg1: memref<8x1xi32, #tpu.memory_space<vmem>>, %arg2: memref<8x8xf32, #tpu.memory_space<vmem>>, %arg3: memref<8x8x8xf32, #tpu.memory_space<vmem>>, %arg4: memref<8x8xi32, #tpu.memory_space<vmem>>, %arg5: memref<8x1xf32, #tpu.memory_space<vmem>>, %arg6: memref<8x8x8xi32, #tpu.memory_space<vmem>>) attributes {dimension_semantics = [#tpu.dimension_semantics<parallel>], iteration_bounds = array<i64: 1>, scalar_prefetch = 0 : i64, scratch_operands = 1 : i64, tpu.core_type = #tpu.core_type<tc>, window_params = [{transform_indices = @transform_0, window_bounds = array<i64: 8, 1>}, {pipeline_mode = #tpu.pipeline_mode<synchronous>, transform_indices = @transform_1, window_bounds = array<i64: 8, 8>}, {transform_indices = @transform_2, window_bounds = array<i64: 8, 8, 8>}, {transform_indices = @transform_3, window_bounds = array<i64: 8, 8>}, {transform_indices = @transform_4, window_bounds = array<i64: 8, 1>}]} {
    %c0 = arith.constant 0 : index
    %c0_0 = arith.constant 0 : index
    %0 = vector.load %arg2[%c0, %c0_0] : memref<8x8xf32, #tpu.memory_space<vmem>>, vector<8x8xf32>
    %c0_1 = arith.constant 0 : index
    %c0_2 = arith.constant 0 : index
    %1 = vector.load %arg1[%c0_1, %c0_2] : memref<8x1xi32, #tpu.memory_space<vmem>>, vector<8x1xi32>
    %c1_i32 = arith.constant 1 : i32
    %2 = vector.broadcast %c1_i32 : i32 to vector<8x1xi32>
    %3 = arith.subi %1, %2 : vector<8x1xi32>
    %4 = tpu.iota {dimensions = array<i32: 1>} : vector<1x8xi32>
    %5 = tpu.iota {dimensions = array<i32: 2>} : vector<1x1x8xi32>
    %c2_i32 = arith.constant 2 : i32
    %6 = vector.broadcast %c2_i32 : i32 to vector<1x1x8xi32>
    %7 = arith.cmpi eq, %5, %6 : vector<1x1x8xi32>
    %cst = arith.constant 0.000000e+00 : f32
    %cst_3 = arith.constant -1.000000e+04 : f32
    %8 = vector.broadcast %cst : f32 to vector<1x1x8xf32>
    %9 = vector.broadcast %cst_3 : f32 to vector<1x1x8xf32>
    %10 = arith.select %7, %8, %9 : vector<1x1x8xi1>, vector<1x1x8xf32>
    %11 = tpu.iota {dimensions = array<i32: 1>} : vector<1x8x8xi32>
    %12 = tpu.iota {dimensions = array<i32: 1>} : vector<1x8xi32>
    %c1_i32_4 = arith.constant 1 : i32
    %13 = vector.broadcast %c1_i32_4 : i32 to vector<1x8xi32>
    %14 = arith.cmpi eq, %4, %13 : vector<1x8xi32>
    %cst_5 = arith.constant 0.000000e+00 : f32
    %cst_6 = arith.constant -1.000000e+04 : f32
    %15 = vector.broadcast %cst_5 : f32 to vector<1x8xf32>
    %16 = vector.broadcast %cst_6 : f32 to vector<1x8xf32>
    %17 = arith.select %14, %15, %16 : vector<1x8xi1>, vector<1x8xf32>
    %18 = vector.shape_cast %17 : vector<1x8xf32> to vector<1x8xf32>
    %19 = vector.broadcast %18 : vector<1x8xf32> to vector<8x8xf32>
    %cst_7 = arith.constant 0.000000e+00 : f32
    %20 = vector.broadcast %cst_7 : f32 to vector<8x8xf32>
    %c1_i32_8 = arith.constant 1 : i32
    %c0_9 = arith.constant 0 : index
    %21 = arith.index_cast %c1_i32_8 : i32 to index
    %c0_10 = arith.constant 0 : index
    %22 = vector.load %arg3[%c0_9, %21, %c0_10] : memref<8x8x8xf32, #tpu.memory_space<vmem>>, vector<8x1x8xf32>
    %23 = vector.broadcast %c1_i32_8 : i32 to vector<8x1xi32>
    %24 = arith.cmpi eq, %3, %23 : vector<8x1xi32>
    %25 = vector.shape_cast %24 : vector<8x1xi1> to vector<8x1x1xi1>
    %cst_11 = arith.constant 0.000000e+00 : f32
    %26 = vector.shape_cast %25 : vector<8x1x1xi1> to vector<8x1x1xi1>
    %27 = vector.broadcast %26 : vector<8x1x1xi1> to vector<8x1x8xi1>
    %28 = vector.shape_cast %10 : vector<1x1x8xf32> to vector<1x1x8xf32>
    %29 = vector.broadcast %28 : vector<1x1x8xf32> to vector<8x1x8xf32>
    %30 = vector.broadcast %cst_11 : f32 to vector<8x1x8xf32>
    %31 = arith.select %27, %29, %30 : vector<8x1x8xi1>, vector<8x1x8xf32>
    %32 = vector.shape_cast %0 : vector<8x8xf32> to vector<1x8x8xf32>
    %33 = vector.broadcast %32 : vector<1x8x8xf32> to vector<8x8x8xf32>
    %34 = vector.broadcast %22 : vector<8x1x8xf32> to vector<8x8x8xf32>
    %35 = arith.addf %33, %34 : vector<8x8x8xf32>
    %36 = vector.broadcast %31 : vector<8x1x8xf32> to vector<8x8x8xf32>
    %37 = arith.addf %35, %36 : vector<8x8x8xf32>
    %38 = vector.shape_cast %19 : vector<8x8xf32> to vector<8x8x1xf32>
    %39 = vector.broadcast %38 : vector<8x8x1xf32> to vector<8x8x8xf32>
    %40 = arith.addf %37, %39 : vector<8x8x8xf32>
    %cst_12 = arith.constant dense<0xFF800000> : vector<8x8xf32>
    %41 = vector.multi_reduction <maximumf>, %40, %cst_12 [1] : vector<8x8x8xf32> to vector<8x8xf32>
    %42 = vector.shape_cast %41 : vector<8x8xf32> to vector<8x1x8xf32>
    %43 = vector.broadcast %42 : vector<8x1x8xf32> to vector<8x8x8xf32>
    %44 = arith.cmpf oeq, %40, %43 : vector<8x8x8xf32>
    %c8_i32 = arith.constant 8 : i32
    %45 = vector.shape_cast %11 : vector<1x8x8xi32> to vector<1x8x8xi32>
    %46 = vector.broadcast %45 : vector<1x8x8xi32> to vector<8x8x8xi32>
    %47 = vector.broadcast %c8_i32 : i32 to vector<8x8x8xi32>
    %48 = arith.select %44, %46, %47 : vector<8x8x8xi1>, vector<8x8x8xi32>
    %cst_13 = arith.constant dense<2147483647> : vector<8x8xi32>
    %49 = vector.multi_reduction <minsi>, %48, %cst_13 [1] : vector<8x8x8xi32> to vector<8x8xi32>
    %50 = arith.index_cast %c1_i32_8 : i32 to index
    %c0_14 = arith.constant 0 : index
    %c0_15 = arith.constant 0 : index
    %51 = vector.load %arg6[%50, %c0_14, %c0_15] : memref<8x8x8xi32, #tpu.memory_space<vmem>>, vector<1x8x8xi32>
    %52 = vector.shape_cast %51 : vector<1x8x8xi32> to vector<8x8xi32>
    %53 = vector.shape_cast %49 : vector<8x8xi32> to vector<1x8x8xi32>
    tpu.vector_store %arg6[%50, %c0_14, %c0_15], %53 {strides = array<i32>} : memref<8x8x8xi32, #tpu.memory_space<vmem>>, vector<1x8x8xi32>,
    %54 = vector.shape_cast %24 : vector<8x1xi1> to vector<8x1xi1>
    %55 = vector.broadcast %54 : vector<8x1xi1> to vector<8x8xi1>
    %56 = arith.select %55, %41, %20 : vector<8x8xi1>, vector<8x8xf32>
    %c2_i32_16 = arith.constant 2 : i32
    %c0_17 = arith.constant 0 : index
    %57 = arith.index_cast %c2_i32_16 : i32 to index
    %c0_18 = arith.constant 0 : index
    %58 = vector.load %arg3[%c0_17, %57, %c0_18] : memref<8x8x8xf32, #tpu.memory_space<vmem>>, vector<8x1x8xf32>
    %59 = vector.broadcast %c2_i32_16 : i32 to vector<8x1xi32>
    %60 = arith.cmpi eq, %3, %59 : vector<8x1xi32>
    %61 = vector.shape_cast %60 : vector<8x1xi1> to vector<8x1x1xi1>
    %cst_19 = arith.constant 0.000000e+00 : f32
    %62 = vector.shape_cast %61 : vector<8x1x1xi1> to vector<8x1x1xi1>
    %63 = vector.broadcast %62 : vector<8x1x1xi1> to vector<8x1x8xi1>
    %64 = vector.shape_cast %10 : vector<1x1x8xf32> to vector<1x1x8xf32>
    %65 = vector.broadcast %64 : vector<1x1x8xf32> to vector<8x1x8xf32>
    %66 = vector.broadcast %cst_19 : f32 to vector<8x1x8xf32>
    %67 = arith.select %63, %65, %66 : vector<8x1x8xi1>, vector<8x1x8xf32>
    %68 = vector.shape_cast %0 : vector<8x8xf32> to vector<1x8x8xf32>
    %69 = vector.broadcast %68 : vector<1x8x8xf32> to vector<8x8x8xf32>
    %70 = vector.broadcast %58 : vector<8x1x8xf32> to vector<8x8x8xf32>
    %71 = arith.addf %69, %70 : vector<8x8x8xf32>
    %72 = vector.broadcast %67 : vector<8x1x8xf32> to vector<8x8x8xf32>
    %73 = arith.addf %71, %72 : vector<8x8x8xf32>
    %74 = vector.shape_cast %41 : vector<8x8xf32> to vector<8x8x1xf32>
    %75 = vector.broadcast %74 : vector<8x8x1xf32> to vector<8x8x8xf32>
    %76 = arith.addf %73, %75 : vector<8x8x8xf32>
    %cst_20 = arith.constant dense<0xFF800000> : vector<8x8xf32>
    %77 = vector.multi_reduction <maximumf>, %76, %cst_20 [1] : vector<8x8x8xf32> to vector<8x8xf32>
    %78 = vector.shape_cast %77 : vector<8x8xf32> to vector<8x1x8xf32>
    %79 = vector.broadcast %78 : vector<8x1x8xf32> to vector<8x8x8xf32>
    %80 = arith.cmpf oeq, %76, %79 : vector<8x8x8xf32>
    %c8_i32_21 = arith.constant 8 : i32
    %81 = vector.shape_cast %11 : vector<1x8x8xi32> to vector<1x8x8xi32>
    %82 = vector.broadcast %81 : vector<1x8x8xi32> to vector<8x8x8xi32>
    %83 = vector.broadcast %c8_i32_21 : i32 to vector<8x8x8xi32>
    %84 = arith.select %80, %82, %83 : vector<8x8x8xi1>, vector<8x8x8xi32>
    %cst_22 = arith.constant dense<2147483647> : vector<8x8xi32>
    %85 = vector.multi_reduction <minsi>, %84, %cst_22 [1] : vector<8x8x8xi32> to vector<8x8xi32>
    %86 = arith.index_cast %c2_i32_16 : i32 to index
    %c0_23 = arith.constant 0 : index
    %c0_24 = arith.constant 0 : index
    %87 = vector.load %arg6[%86, %c0_23, %c0_24] : memref<8x8x8xi32, #tpu.memory_space<vmem>>, vector<1x8x8xi32>
    %88 = vector.shape_cast %87 : vector<1x8x8xi32> to vector<8x8xi32>
    %89 = vector.shape_cast %85 : vector<8x8xi32> to vector<1x8x8xi32>
    tpu.vector_store %arg6[%86, %c0_23, %c0_24], %89 {strides = array<i32>} : memref<8x8x8xi32, #tpu.memory_space<vmem>>, vector<1x8x8xi32>,
    %90 = vector.shape_cast %60 : vector<8x1xi1> to vector<8x1xi1>
    %91 = vector.broadcast %90 : vector<8x1xi1> to vector<8x8xi1>
    %92 = arith.select %91, %77, %56 : vector<8x8xi1>, vector<8x8xf32>
    %c3_i32 = arith.constant 3 : i32
    %c0_25 = arith.constant 0 : index
    %93 = arith.index_cast %c3_i32 : i32 to index
    %c0_26 = arith.constant 0 : index
    %94 = vector.load %arg3[%c0_25, %93, %c0_26] : memref<8x8x8xf32, #tpu.memory_space<vmem>>, vector<8x1x8xf32>
    %95 = vector.broadcast %c3_i32 : i32 to vector<8x1xi32>
    %96 = arith.cmpi eq, %3, %95 : vector<8x1xi32>
    %97 = vector.shape_cast %96 : vector<8x1xi1> to vector<8x1x1xi1>
    %cst_27 = arith.constant 0.000000e+00 : f32
    %98 = vector.shape_cast %97 : vector<8x1x1xi1> to vector<8x1x1xi1>
    %99 = vector.broadcast %98 : vector<8x1x1xi1> to vector<8x1x8xi1>
    %100 = vector.shape_cast %10 : vector<1x1x8xf32> to vector<1x1x8xf32>
    %101 = vector.broadcast %100 : vector<1x1x8xf32> to vector<8x1x8xf32>
    %102 = vector.broadcast %cst_27 : f32 to vector<8x1x8xf32>
    %103 = arith.select %99, %101, %102 : vector<8x1x8xi1>, vector<8x1x8xf32>
    %104 = vector.shape_cast %0 : vector<8x8xf32> to vector<1x8x8xf32>
    %105 = vector.broadcast %104 : vector<1x8x8xf32> to vector<8x8x8xf32>
    %106 = vector.broadcast %94 : vector<8x1x8xf32> to vector<8x8x8xf32>
    %107 = arith.addf %105, %106 : vector<8x8x8xf32>
    %108 = vector.broadcast %103 : vector<8x1x8xf32> to vector<8x8x8xf32>
    %109 = arith.addf %107, %108 : vector<8x8x8xf32>
    %110 = vector.shape_cast %77 : vector<8x8xf32> to vector<8x8x1xf32>
    %111 = vector.broadcast %110 : vector<8x8x1xf32> to vector<8x8x8xf32>
    %112 = arith.addf %109, %111 : vector<8x8x8xf32>
    %cst_28 = arith.constant dense<0xFF800000> : vector<8x8xf32>
    %113 = vector.multi_reduction <maximumf>, %112, %cst_28 [1] : vector<8x8x8xf32> to vector<8x8xf32>
    %114 = vector.shape_cast %113 : vector<8x8xf32> to vector<8x1x8xf32>
    %115 = vector.broadcast %114 : vector<8x1x8xf32> to vector<8x8x8xf32>
    %116 = arith.cmpf oeq, %112, %115 : vector<8x8x8xf32>
    %c8_i32_29 = arith.constant 8 : i32
    %117 = vector.shape_cast %11 : vector<1x8x8xi32> to vector<1x8x8xi32>
    %118 = vector.broadcast %117 : vector<1x8x8xi32> to vector<8x8x8xi32>
    %119 = vector.broadcast %c8_i32_29 : i32 to vector<8x8x8xi32>
    %120 = arith.select %116, %118, %119 : vector<8x8x8xi1>, vector<8x8x8xi32>
    %cst_30 = arith.constant dense<2147483647> : vector<8x8xi32>
    %121 = vector.multi_reduction <minsi>, %120, %cst_30 [1] : vector<8x8x8xi32> to vector<8x8xi32>
    %122 = arith.index_cast %c3_i32 : i32 to index
    %c0_31 = arith.constant 0 : index
    %c0_32 = arith.constant 0 : index
    %123 = vector.load %arg6[%122, %c0_31, %c0_32] : memref<8x8x8xi32, #tpu.memory_space<vmem>>, vector<1x8x8xi32>
    %124 = vector.shape_cast %123 : vector<1x8x8xi32> to vector<8x8xi32>
    %125 = vector.shape_cast %121 : vector<8x8xi32> to vector<1x8x8xi32>
    tpu.vector_store %arg6[%122, %c0_31, %c0_32], %125 {strides = array<i32>} : memref<8x8x8xi32, #tpu.memory_space<vmem>>, vector<1x8x8xi32>,
    %126 = vector.shape_cast %96 : vector<8x1xi1> to vector<8x1xi1>
    %127 = vector.broadcast %126 : vector<8x1xi1> to vector<8x8xi1>
    %128 = arith.select %127, %113, %92 : vector<8x8xi1>, vector<8x8xf32>
    %c4_i32 = arith.constant 4 : i32
    %c0_33 = arith.constant 0 : index
    %129 = arith.index_cast %c4_i32 : i32 to index
    %c0_34 = arith.constant 0 : index
    %130 = vector.load %arg3[%c0_33, %129, %c0_34] : memref<8x8x8xf32, #tpu.memory_space<vmem>>, vector<8x1x8xf32>
    %131 = vector.broadcast %c4_i32 : i32 to vector<8x1xi32>
    %132 = arith.cmpi eq, %3, %131 : vector<8x1xi32>
    %133 = vector.shape_cast %132 : vector<8x1xi1> to vector<8x1x1xi1>
    %cst_35 = arith.constant 0.000000e+00 : f32
    %134 = vector.shape_cast %133 : vector<8x1x1xi1> to vector<8x1x1xi1>
    %135 = vector.broadcast %134 : vector<8x1x1xi1> to vector<8x1x8xi1>
    %136 = vector.shape_cast %10 : vector<1x1x8xf32> to vector<1x1x8xf32>
    %137 = vector.broadcast %136 : vector<1x1x8xf32> to vector<8x1x8xf32>
    %138 = vector.broadcast %cst_35 : f32 to vector<8x1x8xf32>
    %139 = arith.select %135, %137, %138 : vector<8x1x8xi1>, vector<8x1x8xf32>
    %140 = vector.shape_cast %0 : vector<8x8xf32> to vector<1x8x8xf32>
    %141 = vector.broadcast %140 : vector<1x8x8xf32> to vector<8x8x8xf32>
    %142 = vector.broadcast %130 : vector<8x1x8xf32> to vector<8x8x8xf32>
    %143 = arith.addf %141, %142 : vector<8x8x8xf32>
    %144 = vector.broadcast %139 : vector<8x1x8xf32> to vector<8x8x8xf32>
    %145 = arith.addf %143, %144 : vector<8x8x8xf32>
    %146 = vector.shape_cast %113 : vector<8x8xf32> to vector<8x8x1xf32>
    %147 = vector.broadcast %146 : vector<8x8x1xf32> to vector<8x8x8xf32>
    %148 = arith.addf %145, %147 : vector<8x8x8xf32>
    %cst_36 = arith.constant dense<0xFF800000> : vector<8x8xf32>
    %149 = vector.multi_reduction <maximumf>, %148, %cst_36 [1] : vector<8x8x8xf32> to vector<8x8xf32>
    %150 = vector.shape_cast %149 : vector<8x8xf32> to vector<8x1x8xf32>
    %151 = vector.broadcast %150 : vector<8x1x8xf32> to vector<8x8x8xf32>
    %152 = arith.cmpf oeq, %148, %151 : vector<8x8x8xf32>
    %c8_i32_37 = arith.constant 8 : i32
    %153 = vector.shape_cast %11 : vector<1x8x8xi32> to vector<1x8x8xi32>
    %154 = vector.broadcast %153 : vector<1x8x8xi32> to vector<8x8x8xi32>
    %155 = vector.broadcast %c8_i32_37 : i32 to vector<8x8x8xi32>
    %156 = arith.select %152, %154, %155 : vector<8x8x8xi1>, vector<8x8x8xi32>
    %cst_38 = arith.constant dense<2147483647> : vector<8x8xi32>
    %157 = vector.multi_reduction <minsi>, %156, %cst_38 [1] : vector<8x8x8xi32> to vector<8x8xi32>
    %158 = arith.index_cast %c4_i32 : i32 to index
    %c0_39 = arith.constant 0 : index
    %c0_40 = arith.constant 0 : index
    %159 = vector.load %arg6[%158, %c0_39, %c0_40] : memref<8x8x8xi32, #tpu.memory_space<vmem>>, vector<1x8x8xi32>
    %160 = vector.shape_cast %159 : vector<1x8x8xi32> to vector<8x8xi32>
    %161 = vector.shape_cast %157 : vector<8x8xi32> to vector<1x8x8xi32>
    tpu.vector_store %arg6[%158, %c0_39, %c0_40], %161 {strides = array<i32>} : memref<8x8x8xi32, #tpu.memory_space<vmem>>, vector<1x8x8xi32>,
    %162 = vector.shape_cast %132 : vector<8x1xi1> to vector<8x1xi1>
    %163 = vector.broadcast %162 : vector<8x1xi1> to vector<8x8xi1>
    %164 = arith.select %163, %149, %128 : vector<8x8xi1>, vector<8x8xf32>
    %c5_i32 = arith.constant 5 : i32
    %c0_41 = arith.constant 0 : index
    %165 = arith.index_cast %c5_i32 : i32 to index
    %c0_42 = arith.constant 0 : index
    %166 = vector.load %arg3[%c0_41, %165, %c0_42] : memref<8x8x8xf32, #tpu.memory_space<vmem>>, vector<8x1x8xf32>
    %167 = vector.broadcast %c5_i32 : i32 to vector<8x1xi32>
    %168 = arith.cmpi eq, %3, %167 : vector<8x1xi32>
    %169 = vector.shape_cast %168 : vector<8x1xi1> to vector<8x1x1xi1>
    %cst_43 = arith.constant 0.000000e+00 : f32
    %170 = vector.shape_cast %169 : vector<8x1x1xi1> to vector<8x1x1xi1>
    %171 = vector.broadcast %170 : vector<8x1x1xi1> to vector<8x1x8xi1>
    %172 = vector.shape_cast %10 : vector<1x1x8xf32> to vector<1x1x8xf32>
    %173 = vector.broadcast %172 : vector<1x1x8xf32> to vector<8x1x8xf32>
    %174 = vector.broadcast %cst_43 : f32 to vector<8x1x8xf32>
    %175 = arith.select %171, %173, %174 : vector<8x1x8xi1>, vector<8x1x8xf32>
    %176 = vector.shape_cast %0 : vector<8x8xf32> to vector<1x8x8xf32>
    %177 = vector.broadcast %176 : vector<1x8x8xf32> to vector<8x8x8xf32>
    %178 = vector.broadcast %166 : vector<8x1x8xf32> to vector<8x8x8xf32>
    %179 = arith.addf %177, %178 : vector<8x8x8xf32>
    %180 = vector.broadcast %175 : vector<8x1x8xf32> to vector<8x8x8xf32>
    %181 = arith.addf %179, %180 : vector<8x8x8xf32>
    %182 = vector.shape_cast %149 : vector<8x8xf32> to vector<8x8x1xf32>
    %183 = vector.broadcast %182 : vector<8x8x1xf32> to vector<8x8x8xf32>
    %184 = arith.addf %181, %183 : vector<8x8x8xf32>
    %cst_44 = arith.constant dense<0xFF800000> : vector<8x8xf32>
    %185 = vector.multi_reduction <maximumf>, %184, %cst_44 [1] : vector<8x8x8xf32> to vector<8x8xf32>
    %186 = vector.shape_cast %185 : vector<8x8xf32> to vector<8x1x8xf32>
    %187 = vector.broadcast %186 : vector<8x1x8xf32> to vector<8x8x8xf32>
    %188 = arith.cmpf oeq, %184, %187 : vector<8x8x8xf32>
    %c8_i32_45 = arith.constant 8 : i32
    %189 = vector.shape_cast %11 : vector<1x8x8xi32> to vector<1x8x8xi32>
    %190 = vector.broadcast %189 : vector<1x8x8xi32> to vector<8x8x8xi32>
    %191 = vector.broadcast %c8_i32_45 : i32 to vector<8x8x8xi32>
    %192 = arith.select %188, %190, %191 : vector<8x8x8xi1>, vector<8x8x8xi32>
    %cst_46 = arith.constant dense<2147483647> : vector<8x8xi32>
    %193 = vector.multi_reduction <minsi>, %192, %cst_46 [1] : vector<8x8x8xi32> to vector<8x8xi32>
    %194 = arith.index_cast %c5_i32 : i32 to index
    %c0_47 = arith.constant 0 : index
    %c0_48 = arith.constant 0 : index
    %195 = vector.load %arg6[%194, %c0_47, %c0_48] : memref<8x8x8xi32, #tpu.memory_space<vmem>>, vector<1x8x8xi32>
    %196 = vector.shape_cast %195 : vector<1x8x8xi32> to vector<8x8xi32>
    %197 = vector.shape_cast %193 : vector<8x8xi32> to vector<1x8x8xi32>
    tpu.vector_store %arg6[%194, %c0_47, %c0_48], %197 {strides = array<i32>} : memref<8x8x8xi32, #tpu.memory_space<vmem>>, vector<1x8x8xi32>,
    %198 = vector.shape_cast %168 : vector<8x1xi1> to vector<8x1xi1>
    %199 = vector.broadcast %198 : vector<8x1xi1> to vector<8x8xi1>
    %200 = arith.select %199, %185, %164 : vector<8x8xi1>, vector<8x8xf32>
    %c6_i32 = arith.constant 6 : i32
    %c0_49 = arith.constant 0 : index
    %201 = arith.index_cast %c6_i32 : i32 to index
    %c0_50 = arith.constant 0 : index
    %202 = vector.load %arg3[%c0_49, %201, %c0_50] : memref<8x8x8xf32, #tpu.memory_space<vmem>>, vector<8x1x8xf32>
    %203 = vector.broadcast %c6_i32 : i32 to vector<8x1xi32>
    %204 = arith.cmpi eq, %3, %203 : vector<8x1xi32>
    %205 = vector.shape_cast %204 : vector<8x1xi1> to vector<8x1x1xi1>
    %cst_51 = arith.constant 0.000000e+00 : f32
    %206 = vector.shape_cast %205 : vector<8x1x1xi1> to vector<8x1x1xi1>
    %207 = vector.broadcast %206 : vector<8x1x1xi1> to vector<8x1x8xi1>
    %208 = vector.shape_cast %10 : vector<1x1x8xf32> to vector<1x1x8xf32>
    %209 = vector.broadcast %208 : vector<1x1x8xf32> to vector<8x1x8xf32>
    %210 = vector.broadcast %cst_51 : f32 to vector<8x1x8xf32>
    %211 = arith.select %207, %209, %210 : vector<8x1x8xi1>, vector<8x1x8xf32>
    %212 = vector.shape_cast %0 : vector<8x8xf32> to vector<1x8x8xf32>
    %213 = vector.broadcast %212 : vector<1x8x8xf32> to vector<8x8x8xf32>
    %214 = vector.broadcast %202 : vector<8x1x8xf32> to vector<8x8x8xf32>
    %215 = arith.addf %213, %214 : vector<8x8x8xf32>
    %216 = vector.broadcast %211 : vector<8x1x8xf32> to vector<8x8x8xf32>
    %217 = arith.addf %215, %216 : vector<8x8x8xf32>
    %218 = vector.shape_cast %185 : vector<8x8xf32> to vector<8x8x1xf32>
    %219 = vector.broadcast %218 : vector<8x8x1xf32> to vector<8x8x8xf32>
    %220 = arith.addf %217, %219 : vector<8x8x8xf32>
    %cst_52 = arith.constant dense<0xFF800000> : vector<8x8xf32>
    %221 = vector.multi_reduction <maximumf>, %220, %cst_52 [1] : vector<8x8x8xf32> to vector<8x8xf32>
    %222 = vector.shape_cast %221 : vector<8x8xf32> to vector<8x1x8xf32>
    %223 = vector.broadcast %222 : vector<8x1x8xf32> to vector<8x8x8xf32>
    %224 = arith.cmpf oeq, %220, %223 : vector<8x8x8xf32>
    %c8_i32_53 = arith.constant 8 : i32
    %225 = vector.shape_cast %11 : vector<1x8x8xi32> to vector<1x8x8xi32>
    %226 = vector.broadcast %225 : vector<1x8x8xi32> to vector<8x8x8xi32>
    %227 = vector.broadcast %c8_i32_53 : i32 to vector<8x8x8xi32>
    %228 = arith.select %224, %226, %227 : vector<8x8x8xi1>, vector<8x8x8xi32>
    %cst_54 = arith.constant dense<2147483647> : vector<8x8xi32>
    %229 = vector.multi_reduction <minsi>, %228, %cst_54 [1] : vector<8x8x8xi32> to vector<8x8xi32>
    %230 = arith.index_cast %c6_i32 : i32 to index
    %c0_55 = arith.constant 0 : index
    %c0_56 = arith.constant 0 : index
    %231 = vector.load %arg6[%230, %c0_55, %c0_56] : memref<8x8x8xi32, #tpu.memory_space<vmem>>, vector<1x8x8xi32>
    %232 = vector.shape_cast %231 : vector<1x8x8xi32> to vector<8x8xi32>
    %233 = vector.shape_cast %229 : vector<8x8xi32> to vector<1x8x8xi32>
    tpu.vector_store %arg6[%230, %c0_55, %c0_56], %233 {strides = array<i32>} : memref<8x8x8xi32, #tpu.memory_space<vmem>>, vector<1x8x8xi32>,
    %234 = vector.shape_cast %204 : vector<8x1xi1> to vector<8x1xi1>
    %235 = vector.broadcast %234 : vector<8x1xi1> to vector<8x8xi1>
    %236 = arith.select %235, %221, %200 : vector<8x8xi1>, vector<8x8xf32>
    %c7_i32 = arith.constant 7 : i32
    %c0_57 = arith.constant 0 : index
    %237 = arith.index_cast %c7_i32 : i32 to index
    %c0_58 = arith.constant 0 : index
    %238 = vector.load %arg3[%c0_57, %237, %c0_58] : memref<8x8x8xf32, #tpu.memory_space<vmem>>, vector<8x1x8xf32>
    %239 = vector.broadcast %c7_i32 : i32 to vector<8x1xi32>
    %240 = arith.cmpi eq, %3, %239 : vector<8x1xi32>
    %241 = vector.shape_cast %240 : vector<8x1xi1> to vector<8x1x1xi1>
    %cst_59 = arith.constant 0.000000e+00 : f32
    %242 = vector.shape_cast %241 : vector<8x1x1xi1> to vector<8x1x1xi1>
    %243 = vector.broadcast %242 : vector<8x1x1xi1> to vector<8x1x8xi1>
    %244 = vector.shape_cast %10 : vector<1x1x8xf32> to vector<1x1x8xf32>
    %245 = vector.broadcast %244 : vector<1x1x8xf32> to vector<8x1x8xf32>
    %246 = vector.broadcast %cst_59 : f32 to vector<8x1x8xf32>
    %247 = arith.select %243, %245, %246 : vector<8x1x8xi1>, vector<8x1x8xf32>
    %248 = vector.shape_cast %0 : vector<8x8xf32> to vector<1x8x8xf32>
    %249 = vector.broadcast %248 : vector<1x8x8xf32> to vector<8x8x8xf32>
    %250 = vector.broadcast %238 : vector<8x1x8xf32> to vector<8x8x8xf32>
    %251 = arith.addf %249, %250 : vector<8x8x8xf32>
    %252 = vector.broadcast %247 : vector<8x1x8xf32> to vector<8x8x8xf32>
    %253 = arith.addf %251, %252 : vector<8x8x8xf32>
    %254 = vector.shape_cast %221 : vector<8x8xf32> to vector<8x8x1xf32>
    %255 = vector.broadcast %254 : vector<8x8x1xf32> to vector<8x8x8xf32>
    %256 = arith.addf %253, %255 : vector<8x8x8xf32>
    %cst_60 = arith.constant dense<0xFF800000> : vector<8x8xf32>
    %257 = vector.multi_reduction <maximumf>, %256, %cst_60 [1] : vector<8x8x8xf32> to vector<8x8xf32>
    %258 = vector.shape_cast %257 : vector<8x8xf32> to vector<8x1x8xf32>
    %259 = vector.broadcast %258 : vector<8x1x8xf32> to vector<8x8x8xf32>
    %260 = arith.cmpf oeq, %256, %259 : vector<8x8x8xf32>
    %c8_i32_61 = arith.constant 8 : i32
    %261 = vector.shape_cast %11 : vector<1x8x8xi32> to vector<1x8x8xi32>
    %262 = vector.broadcast %261 : vector<1x8x8xi32> to vector<8x8x8xi32>
    %263 = vector.broadcast %c8_i32_61 : i32 to vector<8x8x8xi32>
    %264 = arith.select %260, %262, %263 : vector<8x8x8xi1>, vector<8x8x8xi32>
    %cst_62 = arith.constant dense<2147483647> : vector<8x8xi32>
    %265 = vector.multi_reduction <minsi>, %264, %cst_62 [1] : vector<8x8x8xi32> to vector<8x8xi32>
    %266 = arith.index_cast %c7_i32 : i32 to index
    %c0_63 = arith.constant 0 : index
    %c0_64 = arith.constant 0 : index
    %267 = vector.load %arg6[%266, %c0_63, %c0_64] : memref<8x8x8xi32, #tpu.memory_space<vmem>>, vector<1x8x8xi32>
    %268 = vector.shape_cast %267 : vector<1x8x8xi32> to vector<8x8xi32>
    %269 = vector.shape_cast %265 : vector<8x8xi32> to vector<1x8x8xi32>
    tpu.vector_store %arg6[%266, %c0_63, %c0_64], %269 {strides = array<i32>} : memref<8x8x8xi32, #tpu.memory_space<vmem>>, vector<1x8x8xi32>,
    %270 = vector.shape_cast %240 : vector<8x1xi1> to vector<8x1xi1>
    %271 = vector.broadcast %270 : vector<8x1xi1> to vector<8x8xi1>
    %272 = arith.select %271, %257, %236 : vector<8x8xi1>, vector<8x8xf32>
    %c7_i32_65 = arith.constant 7 : i32
    %cst_66 = arith.constant dense<0xFF800000> : vector<8xf32>
    %273 = vector.multi_reduction <maximumf>, %272, %cst_66 [1] : vector<8x8xf32> to vector<8xf32>
    %274 = vector.shape_cast %273 : vector<8xf32> to vector<8x1xf32>
    %275 = vector.broadcast %274 : vector<8x1xf32> to vector<8x8xf32>
    %276 = arith.cmpf oeq, %272, %275 : vector<8x8xf32>
    %c8_i32_67 = arith.constant 8 : i32
    %277 = vector.shape_cast %4 : vector<1x8xi32> to vector<1x8xi32>
    %278 = vector.broadcast %277 : vector<1x8xi32> to vector<8x8xi32>
    %279 = vector.broadcast %c8_i32_67 : i32 to vector<8x8xi32>
    %280 = arith.select %276, %278, %279 : vector<8x8xi1>, vector<8x8xi32>
    %cst_68 = arith.constant dense<2147483647> : vector<8xi32>
    %281 = vector.multi_reduction <minsi>, %280, %cst_68 [1] : vector<8x8xi32> to vector<8xi32>
    %282 = vector.shape_cast %281 : vector<8xi32> to vector<8x1xi32>
    %c0_i32 = arith.constant 0 : i32
    %283 = vector.broadcast %c0_i32 : i32 to vector<8x1xi32>
    %c0_i32_69 = arith.constant 0 : i32
    %284 = vector.broadcast %c0_i32_69 : i32 to vector<8x8xi32>
    %c0_i32_70 = arith.constant 0 : i32
    %c7_i32_71 = arith.constant 7 : i32
    %285 = arith.subi %c7_i32_71, %c0_i32_70 : i32
    %c1_i32_72 = arith.constant 1 : i32
    %286 = arith.addi %285, %c1_i32_72 : i32
    %c7_i32_73 = arith.constant 7 : i32
    %287 = arith.minsi %286, %c7_i32_73 : i32
    %288 = arith.index_cast %287 : i32 to index
    %c0_74 = arith.constant 0 : index
    %c0_75 = arith.constant 0 : index
    %289 = vector.load %arg6[%288, %c0_74, %c0_75] : memref<8x8x8xi32, #tpu.memory_space<vmem>>, vector<1x8x8xi32>
    %290 = vector.shape_cast %289 : vector<1x8x8xi32> to vector<8x8xi32>
    %291 = vector.broadcast %4 : vector<1x8xi32> to vector<8x8xi32>
    %292 = vector.broadcast %283 : vector<8x1xi32> to vector<8x8xi32>
    %293 = arith.cmpi eq, %291, %292 : vector<8x8xi32>
    %c0_i32_76 = arith.constant 0 : i32
    %294 = vector.broadcast %c0_i32_76 : i32 to vector<8x8xi32>
    %295 = arith.select %293, %290, %294 : vector<8x8xi1>, vector<8x8xi32>
    %cst_77 = arith.constant dense<0> : vector<8xi32>
    %296 = vector.multi_reduction <add>, %295, %cst_77 [1] : vector<8x8xi32> to vector<8xi32>
    %297 = vector.shape_cast %296 : vector<8xi32> to vector<8x1xi32>
    %298 = vector.broadcast %285 : i32 to vector<8x1xi32>
    %299 = arith.cmpi eq, %3, %298 : vector<8x1xi32>
    %300 = vector.broadcast %285 : i32 to vector<8x1xi32>
    %301 = arith.cmpi slt, %300, %3 : vector<8x1xi32>
    %c0_i32_78 = arith.constant 0 : i32
    %302 = vector.broadcast %c0_i32_78 : i32 to vector<8x1xi32>
    %303 = arith.select %301, %297, %302 : vector<8x1xi1>, vector<8x1xi32>
    %304 = arith.select %299, %282, %303 : vector<8x1xi1>, vector<8x1xi32>
    %305 = vector.broadcast %285 : i32 to vector<1x8xi32>
    %306 = arith.cmpi eq, %12, %305 : vector<1x8xi32>
    %307 = vector.shape_cast %306 : vector<1x8xi1> to vector<1x8xi1>
    %308 = vector.broadcast %307 : vector<1x8xi1> to vector<8x8xi1>
    %309 = vector.shape_cast %304 : vector<8x1xi32> to vector<8x1xi32>
    %310 = vector.broadcast %309 : vector<8x1xi32> to vector<8x8xi32>
    %311 = arith.select %308, %310, %284 : vector<8x8xi1>, vector<8x8xi32>
    %c1_i32_79 = arith.constant 1 : i32
    %c7_i32_80 = arith.constant 7 : i32
    %312 = arith.subi %c7_i32_80, %c1_i32_79 : i32
    %c1_i32_81 = arith.constant 1 : i32
    %313 = arith.addi %312, %c1_i32_81 : i32
    %c7_i32_82 = arith.constant 7 : i32
    %314 = arith.minsi %313, %c7_i32_82 : i32
    %315 = arith.index_cast %314 : i32 to index
    %c0_83 = arith.constant 0 : index
    %c0_84 = arith.constant 0 : index
    %316 = vector.load %arg6[%315, %c0_83, %c0_84] : memref<8x8x8xi32, #tpu.memory_space<vmem>>, vector<1x8x8xi32>
    %317 = vector.shape_cast %316 : vector<1x8x8xi32> to vector<8x8xi32>
    %318 = vector.broadcast %4 : vector<1x8xi32> to vector<8x8xi32>
    %319 = vector.broadcast %304 : vector<8x1xi32> to vector<8x8xi32>
    %320 = arith.cmpi eq, %318, %319 : vector<8x8xi32>
    %c0_i32_85 = arith.constant 0 : i32
    %321 = vector.broadcast %c0_i32_85 : i32 to vector<8x8xi32>
    %322 = arith.select %320, %317, %321 : vector<8x8xi1>, vector<8x8xi32>
    %cst_86 = arith.constant dense<0> : vector<8xi32>
    %323 = vector.multi_reduction <add>, %322, %cst_86 [1] : vector<8x8xi32> to vector<8xi32>
    %324 = vector.shape_cast %323 : vector<8xi32> to vector<8x1xi32>
    %325 = vector.broadcast %312 : i32 to vector<8x1xi32>
    %326 = arith.cmpi eq, %3, %325 : vector<8x1xi32>
    %327 = vector.broadcast %312 : i32 to vector<8x1xi32>
    %328 = arith.cmpi slt, %327, %3 : vector<8x1xi32>
    %c0_i32_87 = arith.constant 0 : i32
    %329 = vector.broadcast %c0_i32_87 : i32 to vector<8x1xi32>
    %330 = arith.select %328, %324, %329 : vector<8x1xi1>, vector<8x1xi32>
    %331 = arith.select %326, %282, %330 : vector<8x1xi1>, vector<8x1xi32>
    %332 = vector.broadcast %312 : i32 to vector<1x8xi32>
    %333 = arith.cmpi eq, %12, %332 : vector<1x8xi32>
    %334 = vector.shape_cast %333 : vector<1x8xi1> to vector<1x8xi1>
    %335 = vector.broadcast %334 : vector<1x8xi1> to vector<8x8xi1>
    %336 = vector.shape_cast %331 : vector<8x1xi32> to vector<8x1xi32>
    %337 = vector.broadcast %336 : vector<8x1xi32> to vector<8x8xi32>
    %338 = arith.select %335, %337, %311 : vector<8x8xi1>, vector<8x8xi32>
    %c2_i32_88 = arith.constant 2 : i32
    %c7_i32_89 = arith.constant 7 : i32
    %339 = arith.subi %c7_i32_89, %c2_i32_88 : i32
    %c1_i32_90 = arith.constant 1 : i32
    %340 = arith.addi %339, %c1_i32_90 : i32
    %c7_i32_91 = arith.constant 7 : i32
    %341 = arith.minsi %340, %c7_i32_91 : i32
    %342 = arith.index_cast %341 : i32 to index
    %c0_92 = arith.constant 0 : index
    %c0_93 = arith.constant 0 : index
    %343 = vector.load %arg6[%342, %c0_92, %c0_93] : memref<8x8x8xi32, #tpu.memory_space<vmem>>, vector<1x8x8xi32>
    %344 = vector.shape_cast %343 : vector<1x8x8xi32> to vector<8x8xi32>
    %345 = vector.broadcast %4 : vector<1x8xi32> to vector<8x8xi32>
    %346 = vector.broadcast %331 : vector<8x1xi32> to vector<8x8xi32>
    %347 = arith.cmpi eq, %345, %346 : vector<8x8xi32>
    %c0_i32_94 = arith.constant 0 : i32
    %348 = vector.broadcast %c0_i32_94 : i32 to vector<8x8xi32>
    %349 = arith.select %347, %344, %348 : vector<8x8xi1>, vector<8x8xi32>
    %cst_95 = arith.constant dense<0> : vector<8xi32>
    %350 = vector.multi_reduction <add>, %349, %cst_95 [1] : vector<8x8xi32> to vector<8xi32>
    %351 = vector.shape_cast %350 : vector<8xi32> to vector<8x1xi32>
    %352 = vector.broadcast %339 : i32 to vector<8x1xi32>
    %353 = arith.cmpi eq, %3, %352 : vector<8x1xi32>
    %354 = vector.broadcast %339 : i32 to vector<8x1xi32>
    %355 = arith.cmpi slt, %354, %3 : vector<8x1xi32>
    %c0_i32_96 = arith.constant 0 : i32
    %356 = vector.broadcast %c0_i32_96 : i32 to vector<8x1xi32>
    %357 = arith.select %355, %351, %356 : vector<8x1xi1>, vector<8x1xi32>
    %358 = arith.select %353, %282, %357 : vector<8x1xi1>, vector<8x1xi32>
    %359 = vector.broadcast %339 : i32 to vector<1x8xi32>
    %360 = arith.cmpi eq, %12, %359 : vector<1x8xi32>
    %361 = vector.shape_cast %360 : vector<1x8xi1> to vector<1x8xi1>
    %362 = vector.broadcast %361 : vector<1x8xi1> to vector<8x8xi1>
    %363 = vector.shape_cast %358 : vector<8x1xi32> to vector<8x1xi32>
    %364 = vector.broadcast %363 : vector<8x1xi32> to vector<8x8xi32>
    %365 = arith.select %362, %364, %338 : vector<8x8xi1>, vector<8x8xi32>
    %c3_i32_97 = arith.constant 3 : i32
    %c7_i32_98 = arith.constant 7 : i32
    %366 = arith.subi %c7_i32_98, %c3_i32_97 : i32
    %c1_i32_99 = arith.constant 1 : i32
    %367 = arith.addi %366, %c1_i32_99 : i32
    %c7_i32_100 = arith.constant 7 : i32
    %368 = arith.minsi %367, %c7_i32_100 : i32
    %369 = arith.index_cast %368 : i32 to index
    %c0_101 = arith.constant 0 : index
    %c0_102 = arith.constant 0 : index
    %370 = vector.load %arg6[%369, %c0_101, %c0_102] : memref<8x8x8xi32, #tpu.memory_space<vmem>>, vector<1x8x8xi32>
    %371 = vector.shape_cast %370 : vector<1x8x8xi32> to vector<8x8xi32>
    %372 = vector.broadcast %4 : vector<1x8xi32> to vector<8x8xi32>
    %373 = vector.broadcast %358 : vector<8x1xi32> to vector<8x8xi32>
    %374 = arith.cmpi eq, %372, %373 : vector<8x8xi32>
    %c0_i32_103 = arith.constant 0 : i32
    %375 = vector.broadcast %c0_i32_103 : i32 to vector<8x8xi32>
    %376 = arith.select %374, %371, %375 : vector<8x8xi1>, vector<8x8xi32>
    %cst_104 = arith.constant dense<0> : vector<8xi32>
    %377 = vector.multi_reduction <add>, %376, %cst_104 [1] : vector<8x8xi32> to vector<8xi32>
    %378 = vector.shape_cast %377 : vector<8xi32> to vector<8x1xi32>
    %379 = vector.broadcast %366 : i32 to vector<8x1xi32>
    %380 = arith.cmpi eq, %3, %379 : vector<8x1xi32>
    %381 = vector.broadcast %366 : i32 to vector<8x1xi32>
    %382 = arith.cmpi slt, %381, %3 : vector<8x1xi32>
    %c0_i32_105 = arith.constant 0 : i32
    %383 = vector.broadcast %c0_i32_105 : i32 to vector<8x1xi32>
    %384 = arith.select %382, %378, %383 : vector<8x1xi1>, vector<8x1xi32>
    %385 = arith.select %380, %282, %384 : vector<8x1xi1>, vector<8x1xi32>
    %386 = vector.broadcast %366 : i32 to vector<1x8xi32>
    %387 = arith.cmpi eq, %12, %386 : vector<1x8xi32>
    %388 = vector.shape_cast %387 : vector<1x8xi1> to vector<1x8xi1>
    %389 = vector.broadcast %388 : vector<1x8xi1> to vector<8x8xi1>
    %390 = vector.shape_cast %385 : vector<8x1xi32> to vector<8x1xi32>
    %391 = vector.broadcast %390 : vector<8x1xi32> to vector<8x8xi32>
    %392 = arith.select %389, %391, %365 : vector<8x8xi1>, vector<8x8xi32>
    %c4_i32_106 = arith.constant 4 : i32
    %c7_i32_107 = arith.constant 7 : i32
    %393 = arith.subi %c7_i32_107, %c4_i32_106 : i32
    %c1_i32_108 = arith.constant 1 : i32
    %394 = arith.addi %393, %c1_i32_108 : i32
    %c7_i32_109 = arith.constant 7 : i32
    %395 = arith.minsi %394, %c7_i32_109 : i32
    %396 = arith.index_cast %395 : i32 to index
    %c0_110 = arith.constant 0 : index
    %c0_111 = arith.constant 0 : index
    %397 = vector.load %arg6[%396, %c0_110, %c0_111] : memref<8x8x8xi32, #tpu.memory_space<vmem>>, vector<1x8x8xi32>
    %398 = vector.shape_cast %397 : vector<1x8x8xi32> to vector<8x8xi32>
    %399 = vector.broadcast %4 : vector<1x8xi32> to vector<8x8xi32>
    %400 = vector.broadcast %385 : vector<8x1xi32> to vector<8x8xi32>
    %401 = arith.cmpi eq, %399, %400 : vector<8x8xi32>
    %c0_i32_112 = arith.constant 0 : i32
    %402 = vector.broadcast %c0_i32_112 : i32 to vector<8x8xi32>
    %403 = arith.select %401, %398, %402 : vector<8x8xi1>, vector<8x8xi32>
    %cst_113 = arith.constant dense<0> : vector<8xi32>
    %404 = vector.multi_reduction <add>, %403, %cst_113 [1] : vector<8x8xi32> to vector<8xi32>
    %405 = vector.shape_cast %404 : vector<8xi32> to vector<8x1xi32>
    %406 = vector.broadcast %393 : i32 to vector<8x1xi32>
    %407 = arith.cmpi eq, %3, %406 : vector<8x1xi32>
    %408 = vector.broadcast %393 : i32 to vector<8x1xi32>
    %409 = arith.cmpi slt, %408, %3 : vector<8x1xi32>
    %c0_i32_114 = arith.constant 0 : i32
    %410 = vector.broadcast %c0_i32_114 : i32 to vector<8x1xi32>
    %411 = arith.select %409, %405, %410 : vector<8x1xi1>, vector<8x1xi32>
    %412 = arith.select %407, %282, %411 : vector<8x1xi1>, vector<8x1xi32>
    %413 = vector.broadcast %393 : i32 to vector<1x8xi32>
    %414 = arith.cmpi eq, %12, %413 : vector<1x8xi32>
    %415 = vector.shape_cast %414 : vector<1x8xi1> to vector<1x8xi1>
    %416 = vector.broadcast %415 : vector<1x8xi1> to vector<8x8xi1>
    %417 = vector.shape_cast %412 : vector<8x1xi32> to vector<8x1xi32>
    %418 = vector.broadcast %417 : vector<8x1xi32> to vector<8x8xi32>
    %419 = arith.select %416, %418, %392 : vector<8x8xi1>, vector<8x8xi32>
    %c5_i32_115 = arith.constant 5 : i32
    %c7_i32_116 = arith.constant 7 : i32
    %420 = arith.subi %c7_i32_116, %c5_i32_115 : i32
    %c1_i32_117 = arith.constant 1 : i32
    %421 = arith.addi %420, %c1_i32_117 : i32
    %c7_i32_118 = arith.constant 7 : i32
    %422 = arith.minsi %421, %c7_i32_118 : i32
    %423 = arith.index_cast %422 : i32 to index
    %c0_119 = arith.constant 0 : index
    %c0_120 = arith.constant 0 : index
    %424 = vector.load %arg6[%423, %c0_119, %c0_120] : memref<8x8x8xi32, #tpu.memory_space<vmem>>, vector<1x8x8xi32>
    %425 = vector.shape_cast %424 : vector<1x8x8xi32> to vector<8x8xi32>
    %426 = vector.broadcast %4 : vector<1x8xi32> to vector<8x8xi32>
    %427 = vector.broadcast %412 : vector<8x1xi32> to vector<8x8xi32>
    %428 = arith.cmpi eq, %426, %427 : vector<8x8xi32>
    %c0_i32_121 = arith.constant 0 : i32
    %429 = vector.broadcast %c0_i32_121 : i32 to vector<8x8xi32>
    %430 = arith.select %428, %425, %429 : vector<8x8xi1>, vector<8x8xi32>
    %cst_122 = arith.constant dense<0> : vector<8xi32>
    %431 = vector.multi_reduction <add>, %430, %cst_122 [1] : vector<8x8xi32> to vector<8xi32>
    %432 = vector.shape_cast %431 : vector<8xi32> to vector<8x1xi32>
    %433 = vector.broadcast %420 : i32 to vector<8x1xi32>
    %434 = arith.cmpi eq, %3, %433 : vector<8x1xi32>
    %435 = vector.broadcast %420 : i32 to vector<8x1xi32>
    %436 = arith.cmpi slt, %435, %3 : vector<8x1xi32>
    %c0_i32_123 = arith.constant 0 : i32
    %437 = vector.broadcast %c0_i32_123 : i32 to vector<8x1xi32>
    %438 = arith.select %436, %432, %437 : vector<8x1xi1>, vector<8x1xi32>
    %439 = arith.select %434, %282, %438 : vector<8x1xi1>, vector<8x1xi32>
    %440 = vector.broadcast %420 : i32 to vector<1x8xi32>
    %441 = arith.cmpi eq, %12, %440 : vector<1x8xi32>
    %442 = vector.shape_cast %441 : vector<1x8xi1> to vector<1x8xi1>
    %443 = vector.broadcast %442 : vector<1x8xi1> to vector<8x8xi1>
    %444 = vector.shape_cast %439 : vector<8x1xi32> to vector<8x1xi32>
    %445 = vector.broadcast %444 : vector<8x1xi32> to vector<8x8xi32>
    %446 = arith.select %443, %445, %419 : vector<8x8xi1>, vector<8x8xi32>
    %c6_i32_124 = arith.constant 6 : i32
    %c7_i32_125 = arith.constant 7 : i32
    %447 = arith.subi %c7_i32_125, %c6_i32_124 : i32
    %c1_i32_126 = arith.constant 1 : i32
    %448 = arith.addi %447, %c1_i32_126 : i32
    %c7_i32_127 = arith.constant 7 : i32
    %449 = arith.minsi %448, %c7_i32_127 : i32
    %450 = arith.index_cast %449 : i32 to index
    %c0_128 = arith.constant 0 : index
    %c0_129 = arith.constant 0 : index
    %451 = vector.load %arg6[%450, %c0_128, %c0_129] : memref<8x8x8xi32, #tpu.memory_space<vmem>>, vector<1x8x8xi32>
    %452 = vector.shape_cast %451 : vector<1x8x8xi32> to vector<8x8xi32>
    %453 = vector.broadcast %4 : vector<1x8xi32> to vector<8x8xi32>
    %454 = vector.broadcast %439 : vector<8x1xi32> to vector<8x8xi32>
    %455 = arith.cmpi eq, %453, %454 : vector<8x8xi32>
    %c0_i32_130 = arith.constant 0 : i32
    %456 = vector.broadcast %c0_i32_130 : i32 to vector<8x8xi32>
    %457 = arith.select %455, %452, %456 : vector<8x8xi1>, vector<8x8xi32>
    %cst_131 = arith.constant dense<0> : vector<8xi32>
    %458 = vector.multi_reduction <add>, %457, %cst_131 [1] : vector<8x8xi32> to vector<8xi32>
    %459 = vector.shape_cast %458 : vector<8xi32> to vector<8x1xi32>
    %460 = vector.broadcast %447 : i32 to vector<8x1xi32>
    %461 = arith.cmpi eq, %3, %460 : vector<8x1xi32>
    %462 = vector.broadcast %447 : i32 to vector<8x1xi32>
    %463 = arith.cmpi slt, %462, %3 : vector<8x1xi32>
    %c0_i32_132 = arith.constant 0 : i32
    %464 = vector.broadcast %c0_i32_132 : i32 to vector<8x1xi32>
    %465 = arith.select %463, %459, %464 : vector<8x1xi1>, vector<8x1xi32>
    %466 = arith.select %461, %282, %465 : vector<8x1xi1>, vector<8x1xi32>
    %467 = vector.broadcast %447 : i32 to vector<1x8xi32>
    %468 = arith.cmpi eq, %12, %467 : vector<1x8xi32>
    %469 = vector.shape_cast %468 : vector<1x8xi1> to vector<1x8xi1>
    %470 = vector.broadcast %469 : vector<1x8xi1> to vector<8x8xi1>
    %471 = vector.shape_cast %466 : vector<8x1xi32> to vector<8x1xi32>
    %472 = vector.broadcast %471 : vector<8x1xi32> to vector<8x8xi32>
    %473 = arith.select %470, %472, %446 : vector<8x8xi1>, vector<8x8xi32>
    %c7_i32_133 = arith.constant 7 : i32
    %c7_i32_134 = arith.constant 7 : i32
    %474 = arith.subi %c7_i32_134, %c7_i32_133 : i32
    %c1_i32_135 = arith.constant 1 : i32
    %475 = arith.addi %474, %c1_i32_135 : i32
    %c7_i32_136 = arith.constant 7 : i32
    %476 = arith.minsi %475, %c7_i32_136 : i32
    %477 = arith.index_cast %476 : i32 to index
    %c0_137 = arith.constant 0 : index
    %c0_138 = arith.constant 0 : index
    %478 = vector.load %arg6[%477, %c0_137, %c0_138] : memref<8x8x8xi32, #tpu.memory_space<vmem>>, vector<1x8x8xi32>
    %479 = vector.shape_cast %478 : vector<1x8x8xi32> to vector<8x8xi32>
    %480 = vector.broadcast %4 : vector<1x8xi32> to vector<8x8xi32>
    %481 = vector.broadcast %466 : vector<8x1xi32> to vector<8x8xi32>
    %482 = arith.cmpi eq, %480, %481 : vector<8x8xi32>
    %c0_i32_139 = arith.constant 0 : i32
    %483 = vector.broadcast %c0_i32_139 : i32 to vector<8x8xi32>
    %484 = arith.select %482, %479, %483 : vector<8x8xi1>, vector<8x8xi32>
    %cst_140 = arith.constant dense<0> : vector<8xi32>
    %485 = vector.multi_reduction <add>, %484, %cst_140 [1] : vector<8x8xi32> to vector<8xi32>
    %486 = vector.shape_cast %485 : vector<8xi32> to vector<8x1xi32>
    %487 = vector.broadcast %474 : i32 to vector<8x1xi32>
    %488 = arith.cmpi eq, %3, %487 : vector<8x1xi32>
    %489 = vector.broadcast %474 : i32 to vector<8x1xi32>
    %490 = arith.cmpi slt, %489, %3 : vector<8x1xi32>
    %c0_i32_141 = arith.constant 0 : i32
    %491 = vector.broadcast %c0_i32_141 : i32 to vector<8x1xi32>
    %492 = arith.select %490, %486, %491 : vector<8x1xi1>, vector<8x1xi32>
    %493 = arith.select %488, %282, %492 : vector<8x1xi1>, vector<8x1xi32>
    %494 = vector.broadcast %474 : i32 to vector<1x8xi32>
    %495 = arith.cmpi eq, %12, %494 : vector<1x8xi32>
    %496 = vector.shape_cast %495 : vector<1x8xi1> to vector<1x8xi1>
    %497 = vector.broadcast %496 : vector<1x8xi1> to vector<8x8xi1>
    %498 = vector.shape_cast %493 : vector<8x1xi32> to vector<8x1xi32>
    %499 = vector.broadcast %498 : vector<8x1xi32> to vector<8x8xi32>
    %500 = arith.select %497, %499, %473 : vector<8x8xi1>, vector<8x8xi32>
    %c8_i32_142 = arith.constant 8 : i32
    %c0_143 = arith.constant 0 : index
    %c0_144 = arith.constant 0 : index
    %501 = vector.load %arg4[%c0_143, %c0_144] : memref<8x8xi32, #tpu.memory_space<vmem>>, vector<8x8xi32>
    tpu.vector_store %arg4[%c0_143, %c0_144], %500 {strides = array<i32>} : memref<8x8xi32, #tpu.memory_space<vmem>>, vector<8x8xi32>,
    %c0_145 = arith.constant 0 : index
    %c0_146 = arith.constant 0 : index
    %502 = vector.load %arg5[%c0_145, %c0_146] : memref<8x1xf32, #tpu.memory_space<vmem>>, vector<8x1xf32>
    tpu.vector_store %arg5[%c0_145, %c0_146], %274 {strides = array<i32>} : memref<8x1xf32, #tpu.memory_space<vmem>>, vector<8x1xf32>,
    return
  }
  func.func @transform_0(%arg0: i32) -> (i32, i32) {
    %c0_i32 = arith.constant 0 : i32
    %c0_i32_0 = arith.constant 0 : i32
    return %arg0, %c0_i32 : i32, i32
  }
  func.func @transform_1(%arg0: i32) -> (i32, i32) {
    %c0_i32 = arith.constant 0 : i32
    %c0_i32_0 = arith.constant 0 : i32
    %c0_i32_1 = arith.constant 0 : i32
    return %c0_i32, %c0_i32_0 : i32, i32
  }
  func.func @transform_2(%arg0: i32) -> (i32, i32, i32) {
    %c0_i32 = arith.constant 0 : i32
    %c0_i32_0 = arith.constant 0 : i32
    %c0_i32_1 = arith.constant 0 : i32
    return %arg0, %c0_i32, %c0_i32_0 : i32, i32, i32
  }
  func.func @transform_3(%arg0: i32) -> (i32, i32) {
    %c0_i32 = arith.constant 0 : i32
    %c0_i32_0 = arith.constant 0 : i32
    return %arg0, %c0_i32 : i32, i32
  }
  func.func @transform_4(%arg0: i32) -> (i32, i32) {
    %c0_i32 = arith.constant 0 : i32
    %c0_i32_0 = arith.constant 0 : i32
    return %arg0, %c0_i32 : i32, i32
  }
}

</mosaic_0001>

<bundles_post_ra>
// kernel: crf_viterbi_decode.1
= control target key start
LH: loop header
LB: loop body
LE: loop exit
PB: predicated region body
PF: predicated region fallthrough
CT: control target
= control target key end

     0   :  { %10 = vsyncpa [#allocation4], 0  ;;  %s4119_s0 = inlined_call_operand.vmem [shape: s32[8,1], index: 0, kind: input, shape index: {}]   ;;  %s4120_s1 = inlined_call_operand.vmem [shape: f32[8,8], index: 1, kind: input, shape index: {}]   ;;  %s4121_s2 = inlined_call_operand.hbm [shape: f32[8,8,8], index: 2, kind: input, shape index: {}]   ;;  %s4122_s3 = inlined_call_operand.hbm [shape: s32[8,8], index: 3, kind: output, shape index: {0}]   ;;  %s4123_s4 = inlined_call_operand.vmem [shape: f32[8,1], index: 4, kind: output, shape index: {1}]  }
   0x1   :  { %11 = vsyncpa [#allocation5], 0  ;;  %s20_s17 = sshll.u32 %s4121_s2, 4  ;;  %s2784_s18 = smov [#allocation3]   ;;  %s21_s17 = int_to_ptr.hbm [resolvable:$true] %s20_s17 }
   0x2   :  { %s22_s19 = sshll.u32 %s2784_s18, 4  ;;  %s2785_s20 = smov 128   ;;  %s23_s19 = int_to_ptr.vmem [resolvable:$true] %s22_s19 }
   0x3   :  { %s2786_s21 = smov 8  }
   0x4   :  { %28 = dma.hbm_to_vmem [thread:$0]  %s21_s17, 1024, %s23_s19, [#allocation4], %s2785_s20, %s2785_s20, %s2786_s21  }
   0x5   :  { %2780 = dma.done.wait [#allocation4], 1024  }
   0x6   :  { %2781 = vsyncadd [#allocation4], 4294966272  ;;  %v2787_v0 = vmov 0   ;;  %v34_v1 = vld [vmem:[%s4119_s0] sm:$0xff]  ;;  %v36_v14 = vlaneseq  ;;  %v2788_v24 = vmov -10000.0   ;;  %s2611_s8 = sshll.u32 %s4122_s3, 4  ;;  %s2612_s8 = int_to_ptr.hbm [resolvable:$true] %s2611_s8 }
   0x7   :  { %2632 = vset.pattern.permute.xlu0 %v2787_v0  ;;  %2634 = vset.pattern.permute.xlu2 %v2787_v0  ;;  %v2824_v2 = vadd.s32 4294967295, %v34_v1  ;;  %v2673_v40 = vld [vmem:[#allocation3 + $0x21] ss:$0 sm:$0xff]  ;;  %v2674_v48 = vld [vmem:[#allocation3 + $0x29] ss:$0 sm:$0xff] }
   0x8   :  { %2633 = vset.pattern.permute.xlu1 %v2787_v0  ;;  %v2839_v18 = vshrl.u32 %v36_v14, 7  ;;  %v2841_v19 = vand.u32 127, %v36_v14  ;;  %v2864_v42 = vld [vmem:[%s4120_s1] sm:$0xff]  ;;  %v2676_v50 = vld [vmem:[#allocation3 + $0x11] ss:$0 sm:$0xff] }
   0x9   :  { %vm4126_vm0 = vcmp.eq.s32.totalorder %v2824_v2, 1  ;;  %vm4127_vm4 = vcmp.eq.s32.totalorder %v2824_v2, 2  ;;  %v2675_v44 = vld [vmem:[#allocation3 + $0x1] ss:$0 sm:$0xff]  ;;  %v135_v46 = vadd.f32 %v2673_v40, %v2864_v42  ;;  %v136_v55 = vadd.f32 %v2674_v48, %v2864_v42  ;;  %v2677_v63 = vld [vmem:[#allocation3 + $0x9] ss:$0 sm:$0xff] }
   0xa   :  { %v53_v3 = vsel %vm4126_vm0, 1, %v2787_v0  ;;  %v357_v15 = vsel %vm4127_vm4, 1, %v2787_v0  ;;  %vm4124_vm9 = vcmp.eq.s32.totalorder %v2841_v19, 1  ;;  %v131_v52 = vadd.f32 %v2675_v44, %v2864_v42 }
   0xb   :  { %76 = vperm.xlu0 %2632, %v53_v3   ;;  %v57_v4 = vrot.slane %v53_v3, 4  ;;  %v55_v5 = vrot.slane %v53_v3, 2  ;;  %v54_v6 = vrot.slane %v53_v3, 1  ;;  %v58_v7 = vrot.slane %v53_v3, 5 }
   0xc   :  { %v56_v8 = vrot.slane %v53_v3, 3  ;;  %v59_v12 = vrot.slane %v53_v3, 6  ;;  %v60_v13 = vrot.slane %v53_v3, 7  ;;  %v358_v20 = vrot.slane %v357_v15, 1 }
   0xd   :  { %vm64_vm1 = vcmp.ne.s32.totalorder %v57_v4, 0  ;;  %vm62_vm2 = vcmp.ne.s32.totalorder %v55_v5, 0  ;;  %vm61_vm3 = vcmp.ne.s32.totalorder %v54_v6, 0  ;;  %vm65_vm5 = vcmp.ne.s32.totalorder %v58_v7, 0 }
   0xe   :  { %v71_v9 = vsel %vm64_vm1, 1, %v2787_v0  ;;  %v69_v10 = vsel %vm62_vm2, 1, %v2787_v0  ;;  %v68_v11 = vsel %vm61_vm3, 1, %v2787_v0  ;;  %vm63_vm6 = vcmp.ne.s32.totalorder %v56_v8, 0 }
   0xf   :  { %92 = vperm.xlu2 %2634, %v71_v9   ;;  %84 = vperm.xlu1 %2633, %v69_v10   ;;  %v72_v16 = vsel %vm65_vm5, 1, %v2787_v0  ;;  %v70_v17 = vsel %vm63_vm6, 1, %v2787_v0  ;;  %vm66_vm7 = vcmp.ne.s32.totalorder %v59_v12, 0  ;;  %vm67_vm8 = vcmp.ne.s32.totalorder %v60_v13, 0  ;;  %v2678_v12 = vld [vmem:[#allocation3 + $0x19] ss:$0 sm:$0xff] }
  0x10   :  { %v73_v21 = vsel %vm66_vm7, 1, %v2787_v0  ;;  %v74_v22 = vsel %vm67_vm8, 1, %v2787_v0  ;;  %vm365_vm10 = vcmp.ne.s32.totalorder %v358_v20, 0  ;;  %v360_v23 = vrot.slane %v357_v15, 3 }
  0x11   :  { %v43_v25 = vsel %vm4124_vm9, 0.0, %v2788_v24  ;;  %v372_v26 = vsel %vm365_vm10, 1, %v2787_v0  ;;  %v361_v27 = vrot.slane %v357_v15, 4  ;;  %v363_v29 = vrot.slane %v357_v15, 6 }
  0x12   :  { %vm367_vm11 = vcmp.ne.s32.totalorder %v360_v23, 0  ;;  %v364_v31 = vrot.slane %v357_v15, 7  ;;  %v359_v34 = vrot.slane %v357_v15, 2  ;;  %v362_v36 = vrot.slane %v357_v15, 5 }
  0x13   :  { %80 = vperm.xlu0 %2632, %v68_v11   ;;  %v374_v28 = vsel %vm367_vm11, 1, %v2787_v0  ;;  %vm368_vm12 = vcmp.ne.s32.totalorder %v361_v27, 0  ;;  %vm370_vm13 = vcmp.ne.s32.totalorder %v363_v29, 0  ;;  %vm4125_vm2 = vcmp.eq.s32.totalorder %v2841_v19, 2 }
  0x14   :  { %v375_v30 = vsel %vm368_vm12, 1, %v2787_v0  ;;  %v377_v32 = vsel %vm370_vm13, 1, %v2787_v0  ;;  %vm371_vm14 = vcmp.ne.s32.totalorder %v364_v31, 0  ;;  %vm366_vm15 = vcmp.ne.s32.totalorder %v359_v34, 0  ;;  %v2680_v34 = vld [vmem:[#allocation3 + $0x39] ss:$0 sm:$0xff] }
  0x15   :  { %v378_v33 = vsel %vm371_vm14, 1, %v2787_v0  ;;  %v373_v35 = vsel %vm366_vm15, 1, %v2787_v0  ;;  %vm369_vm1 = vcmp.ne.s32.totalorder %v362_v36, 0  ;;  %v2868_v43 = vsel %vm4125_vm2, 0.0, %v2788_v24 }
  0x16   :  { %v376_v37 = vsel %vm369_vm1, 1, %v2787_v0  ;;  %vm161_vm7 = vcmask 64512   ;;  %v133_v59 = vadd.f32 %v2676_v50, %v2864_v42  ;;  %v132_v11 = vadd.f32 %v2677_v63, %v2864_v42 }
  0x17   :  { %96 = vperm.xlu2 %2634, %v72_v16   ;;  %88 = vperm.xlu1 %2633, %v70_v17   ;;  %vm314_vm15 = vcmask 1041409   ;;  %vm326_vm9 = vcmask 1047559  }
  0x1b   :  { %100 = vperm.xlu0 %2632, %v73_v21  }
  0x1f   :  { %2635 = vset.pattern.permute.xlu2 %v2839_v18  ;;  %104 = vperm.xlu1 %2633, %v74_v22   ;;  %v2679_v22 = vld [vmem:[#allocation3 + $0x31] ss:$0 sm:$0xff] }
  0x23   :  { %380 = vperm.xlu0 %2632, %v357_v15  }
  0x27   :  { %151 = vperm.xlu2 %2635, %v43_v25   ;;  %384 = vperm.xlu1 %2633, %v372_v26  }
  0x2b   :  { %392 = vperm.xlu0 %2632, %v374_v28   ;;  %v134_v28 = vadd.f32 %v2678_v12, %v2864_v42 }
  0x2f   :  { %396 = vperm.xlu1 %2633, %v375_v30   ;;  %2636 = vset.pattern.permute.xlu2 %v2787_v0 }
  0x30   :  { %388 = vperm.xlu2 %2636, %v373_v35  }
  0x33   :  { %404 = vperm.xlu0 %2632, %v377_v32  }
  0x37   :  { %408 = vperm.xlu1 %2633, %v378_v33  }
  0x38   :  { %400 = vperm.xlu2 %2636, %v376_v37   ;;  %v137_v37 = vadd.f32 %v2679_v22, %v2864_v42 }
  0x3b   :  { %2638 = vset.pattern.permute.xlu0 %v2839_v18 }
  0x3f   :  { %2639 = vset.pattern.permute.xlu1 %v2839_v18 }
  0x40   :  { %2637 = vset.pattern.permute.xlu2 %v2839_v18 }
  0x69   :  { %v93_v38 = vpop.permute.xlu2 %92 }
  0x6a   :  { %v94_v39 = vperm.slane %v93_v38, 0 }
  0x6c   :  { %vm111_vm3 = vcmp.eq.s32.totalorder %v94_v39, 1 }
  0x6d   :  { %v119_v47 = vsel %vm111_vm3, %v2868_v43, 0.0 }
  0x6e   :  { %v143_v54 = vadd.f32 %v135_v46, %v119_v47 }
  0x71   :  { %v97_v41 = vpop.permute.xlu2 %96 }
  0x72   :  { %v98_v45 = vperm.slane %v97_v41, 0 }
  0x74   :  { %vm2876_vm5 = vcmp.eq.s32.totalorder %v98_v45, 1 }
  0x75   :  { %v120_v60 = vsel %vm2876_vm5, %v2868_v43, 0.0 }
  0x76   :  { %v144_v5 = vadd.f32 %v136_v55, %v120_v60 }
  0x7d   :  { %v2872_v49 = vpop.permute.xlu0 %76 }
  0x7e   :  { %v78_v51 = vperm.slane %v2872_v49, 0 }
  0x80   :  { %vm107_vm6 = vcmp.eq.s32.totalorder %v78_v51, 1  ;;  %v138_v51 = vadd.f32 %v2680_v34, %v2864_v42 }
  0x81   :  { %v115_v56 = vsel %vm107_vm6, %v2868_v43, 0.0  ;;  %v2882_v57 = vpop.permute.xlu2 %151  ;;  %v85_v58 = vpop.permute.xlu1 %84 }
  0x82   :  { %v139_v61 = vadd.f32 %v131_v52, %v115_v56  ;;  %v86_v62 = vperm.slane %v85_v58, 0  ;;  %v2889_v1 = vadd.f32 %v2882_v57, %v143_v54  ;;  %v2901_v16 = vadd.f32 %v2882_v57, %v144_v5 }
  0x84   :  { %vm109_vm8 = vcmp.eq.s32.totalorder %v86_v62, 1  ;;  %v2892_v3 = vadd.f32 %v2882_v57, %v139_v61  ;;  %v190_v4 = vsel %vm161_vm7, %v2889_v1, -inf  ;;  %v197_v32 = vsel %vm161_vm7, %v2901_v16, -inf }
  0x85   :  { %v117_v6 = vsel %vm109_vm8, %v2868_v43, 0.0  ;;  %v81_v7 = vpop.permute.xlu0 %80  ;;  %v191_v8 = vrot.slane %v190_v4, 4  ;;  %v198_v45 = vrot.slane %v197_v32, 4 }
  0x86   :  { %v141_v9 = vadd.f32 %v133_v59, %v117_v6  ;;  %v82_v10 = vperm.slane %v81_v7, 0  ;;  %v162_v13 = vsel %vm161_vm7, %v2892_v3, -inf }
  0x87   :  { %v163_v14 = vrot.slane %v162_v13, 4  ;;  %v192_v15 = vmax.f32 %v190_v4, %v191_v8  ;;  %v199_v61 = vmax.f32 %v197_v32, %v198_v45 }
  0x88   :  { %v2904_v17 = vadd.f32 %v2882_v57, %v141_v9  ;;  %vm108_vm10 = vcmp.eq.s32.totalorder %v82_v10, 1 }
  0x89   :  { %v116_v20 = vsel %vm108_vm10, %v2868_v43, 0.0  ;;  %v89_v21 = vpop.permute.xlu1 %88  ;;  %v164_v23 = vmax.f32 %v162_v13, %v163_v14  ;;  %v193_v24 = vrot.slane %v192_v15, 2  ;;  %v200_v14 = vrot.slane %v199_v61, 2 }
  0x8a   :  { %v176_v25 = vsel %vm161_vm7, %v2904_v17, -inf  ;;  %v140_v26 = vadd.f32 %v132_v11, %v116_v20  ;;  %v90_v27 = vperm.slane %v89_v21, 0  ;;  %vm316_vm10 = vcmask 1042434  }
  0x8b   :  { %v177_v29 = vrot.slane %v176_v25, 4  ;;  %v165_v30 = vrot.slane %v164_v23, 2  ;;  %v194_v31 = vmax.f32 %v192_v15, %v193_v24  ;;  %v201_v34 = vmax.f32 %v199_v61, %v200_v14 }
  0x8c   :  { %v2913_v33 = vadd.f32 %v2882_v57, %v140_v26  ;;  %vm110_vm11 = vcmp.eq.s32.totalorder %v90_v27, 1 }
  0x8d   :  { %v118_v35 = vsel %vm110_vm11, %v2868_v43, 0.0  ;;  %v101_v36 = vpop.permute.xlu0 %100  ;;  %v166_v38 = vmax.f32 %v164_v23, %v165_v30  ;;  %v178_v39 = vmax.f32 %v176_v25, %v177_v29  ;;  %v195_v44 = vrot.slane %v194_v31, 1 }
  0x8e   :  { %v169_v40 = vsel %vm161_vm7, %v2913_v33, -inf  ;;  %v102_v41 = vperm.slane %v101_v36, 0  ;;  %v142_v47 = vadd.f32 %v134_v28, %v118_v35  ;;  %v202_v45 = vrot.slane %v201_v34, 1 }
  0x8f   :  { %v170_v46 = vrot.slane %v169_v40, 4  ;;  %v167_v48 = vrot.slane %v166_v38, 1  ;;  %v179_v50 = vrot.slane %v178_v39, 2  ;;  %v2921_v60 = vmax.f32 %v194_v31, %v195_v44 }
  0x90   :  { %vm113_vm12 = vcmp.eq.s32.totalorder %v102_v41, 1  ;;  %v2924_v62 = vadd.f32 %v2882_v57, %v142_v47 }
  0x91   :  { %v121_v52 = vsel %vm113_vm12, %v2868_v43, 0.0  ;;  %v105_v53 = vpop.permute.xlu1 %104  ;;  %v168_v54 = vmax.f32 %v166_v38, %v167_v48  ;;  %v180_v55 = vmax.f32 %v178_v39, %v179_v50  ;;  %v171_v56 = vmax.f32 %v169_v40, %v170_v46 }
  0x92   :  { %v145_v58 = vadd.f32 %v137_v37, %v121_v52  ;;  %v106_v59 = vperm.slane %v105_v53, 0  ;;  %vm222_vm1 = vcmp.eq.f32.partialorder %v2889_v1, %v2921_v60 }
  0x93   :  { %455 = vperm.xlu2 %2637, %v168_v54   ;;  %vm218_vm13 = vcmp.eq.f32.partialorder %v2892_v3, %v168_v54  ;;  %v181_v63 = vrot.slane %v180_v55, 1  ;;  %v172_v4 = vrot.slane %v171_v56, 2  ;;  %v183_v3 = vsel %vm161_vm7, %v2924_v62, -inf }
  0x94   :  { %v2928_v5 = vadd.f32 %v2882_v57, %v145_v58  ;;  %vm114_vm14 = vcmp.eq.s32.totalorder %v106_v59, 1  ;;  %v226_v6 = vsel %vm218_vm13, %v2839_v18, 8  ;;  %v230_v24 = vsel %vm222_vm1, %v2839_v18, 8 }
  0x95   :  { %v122_v7 = vsel %vm114_vm14, %v2868_v43, 0.0  ;;  %v234_v8 = vsel %vm161_vm7, %v226_v6, 2147483647  ;;  %v182_v9 = vmax.f32 %v180_v55, %v181_v63  ;;  %v173_v10 = vmax.f32 %v171_v56, %v172_v4 }
  0x96   :  { %v146_v11 = vadd.f32 %v138_v51, %v122_v7  ;;  %v235_v12 = vrot.slane %v234_v8, 4  ;;  %v204_v15 = vsel %vm161_vm7, %v2928_v5, -inf  ;;  %v184_v25 = vrot.slane %v183_v3, 4 }
  0x97   :  { %467 = vperm.xlu1 %2639, %v182_v9   ;;  %vm220_vm3 = vcmp.eq.f32.partialorder %v2904_v17, %v182_v9  ;;  %v174_v13 = vrot.slane %v173_v10, 1  ;;  %v205_v27 = vrot.slane %v204_v15, 4  ;;  %v274_v30 = vsel %vm161_vm7, %v230_v24, 2147483647 }
  0x98   :  { %v2941_v20 = vadd.f32 %v2882_v57, %v146_v11  ;;  %vm236_vm5 = vcmp.lt.s32.totalorder %v234_v8, %v235_v12  ;;  %v228_v21 = vsel %vm220_vm3, %v2839_v18, 8  ;;  %v275_v38 = vrot.slane %v274_v30, 4 }
  0x99   :  { %v237_v22 = vsel %vm236_vm5, %v234_v8, %v235_v12  ;;  %v254_v1 = vsel %vm161_vm7, %v228_v21, 2147483647  ;;  %v175_v23 = vmax.f32 %v173_v10, %v174_v13  ;;  %v206_v40 = vmax.f32 %v204_v15, %v205_v27 }
  0x9a   :  { %v238_v26 = vrot.slane %v237_v22, 2  ;;  %v255_v17 = vrot.slane %v254_v1, 4  ;;  %v211_v28 = vsel %vm161_vm7, %v2941_v20, -inf  ;;  %vm276_vm14 = vcmp.lt.s32.totalorder %v274_v30, %v275_v38 }
  0x9b   :  { %461 = vperm.xlu0 %2638, %v175_v23   ;;  %vm219_vm6 = vcmp.eq.f32.partialorder %v2913_v33, %v175_v23  ;;  %v339_v57 = vsel %vm314_vm15, %v175_v23, %v168_v54  ;;  %v212_v35 = vrot.slane %v211_v28, 4  ;;  %v185_v33 = vmax.f32 %v183_v3, %v184_v25 }
  0x9c   :  { %vm256_vm8 = vcmp.lt.s32.totalorder %v254_v1, %v255_v17  ;;  %v227_v29 = vsel %vm219_vm6, %v2839_v18, 8  ;;  %vm239_vm11 = vcmp.lt.s32.totalorder %v237_v22, %v238_v26  ;;  %v340_v39 = vsel %vm316_vm10, %v182_v9, %v339_v57 }
  0x9d   :  { %v257_v31 = vsel %vm256_vm8, %v254_v1, %v255_v17  ;;  %v244_v32 = vsel %vm161_vm7, %v227_v29, 2147483647  ;;  %v240_v41 = vsel %vm239_vm11, %v237_v22, %v238_v26  ;;  %v186_v47 = vrot.slane %v185_v33, 2 }
  0x9e   :  { %v258_v36 = vrot.slane %v257_v31, 2  ;;  %v245_v37 = vrot.slane %v244_v32, 4  ;;  %v241_v48 = vrot.slane %v240_v41, 1  ;;  %v277_v50 = vsel %vm276_vm14, %v274_v30, %v275_v38 }
  0x9f   :  { %479 = vperm.xlu1 %2639, %v2921_v60   ;;  %v207_v51 = vrot.slane %v206_v40, 2  ;;  %v213_v52 = vmax.f32 %v211_v28, %v212_v35  ;;  %v278_v53 = vrot.slane %v277_v50, 2  ;;  %v187_v54 = vmax.f32 %v185_v33, %v186_v47 }
  0xa0   :  { %vm246_vm12 = vcmp.lt.s32.totalorder %v244_v32, %v245_v37  ;;  %vm259_vm13 = vcmp.lt.s32.totalorder %v257_v31, %v258_v36  ;;  %v203_v63 = vmax.f32 %v201_v34, %v202_v45  ;;  %vm242_vm5 = vcmp.lt.s32.totalorder %v240_v41, %v241_v48 }
  0xa1   :  { %v247_v44 = vsel %vm246_vm12, %v244_v32, %v245_v37  ;;  %v2955_v55 = vsel %vm259_vm13, %v257_v31, %v258_v36  ;;  %v208_v58 = vmax.f32 %v206_v40, %v207_v51  ;;  %vm279_vm3 = vcmp.lt.s32.totalorder %v277_v50, %v278_v53 }
  0xa2   :  { %v248_v46 = vrot.slane %v247_v44, 2  ;;  %v188_v61 = vrot.slane %v187_v54, 1  ;;  %vm318_vm6 = vcmask 1043459   ;;  %v214_v6 = vrot.slane %v213_v52, 2 }
  0xa3   :  { %v209_v4 = vrot.slane %v208_v58, 1  ;;  %v261_v7 = vrot.slane %v2955_v55, 1  ;;  %v2958_v8 = vsel %vm279_vm3, %v277_v50, %v278_v53  ;;  %vm223_vm12 = vcmp.eq.f32.partialorder %v2901_v16, %v203_v63 }
  0xa4   :  { %vm249_vm1 = vcmp.lt.s32.totalorder %v247_v44, %v248_v46  ;;  %v189_v9 = vmax.f32 %v187_v54, %v188_v61  ;;  %v215_v12 = vmax.f32 %v213_v52, %v214_v6  ;;  %v243_v13 = vsel %vm242_vm5, %v240_v41, %v241_v48 }
  0xa5   :  { %v250_v56 = vsel %vm249_vm1, %v247_v44, %v248_v46  ;;  %v210_v11 = vmax.f32 %v208_v58, %v209_v4  ;;  %v281_v14 = vrot.slane %v2958_v8, 1  ;;  %vm2969_vm14 = vcmp.lt.s32.totalorder %v2955_v55, %v261_v7 }
  0xa6   :  { %v251_v59 = vrot.slane %v250_v56, 1  ;;  %vm221_vm11 = vcmp.eq.f32.partialorder %v2924_v62, %v189_v9  ;;  %473 = vperm.xlu2 %2637, %v189_v9   ;;  %v341_v3 = vsel %vm318_vm6, %v189_v9, %v340_v39  ;;  %v216_v1 = vrot.slane %v215_v12, 1 }
  0xa7   :  { %v229_v15 = vsel %vm221_vm11, %v2839_v18, 8  ;;  %vm224_vm13 = vcmp.eq.f32.partialorder %v2928_v5, %v210_v11  ;;  %491 = vperm.xlu0 %2638, %v210_v11   ;;  %vm330_vm1 = vcmp.eq.s32.totalorder %v2872_v49, 1  ;;  %v231_v24 = vsel %vm223_vm12, %v2839_v18, 8 }
  0xa8   :  { %vm252_vm8 = vcmp.lt.s32.totalorder %v250_v56, %v251_v59  ;;  %v264_v22 = vsel %vm161_vm7, %v229_v15, 2147483647  ;;  %v232_v16 = vsel %vm224_vm13, %v2839_v18, 8  ;;  %vm320_vm3 = vcmask 1044484   ;;  %v3029_v15 = vpop.permute.xlu0 %380 }
  0xa9   :  { %v253_v10 = vsel %vm252_vm8, %v250_v56, %v251_v59  ;;  %v265_v23 = vrot.slane %v264_v22, 4  ;;  %v294_v5 = vsel %vm161_vm7, %v232_v16, 2147483647  ;;  %v217_v26 = vmax.f32 %v215_v12, %v216_v1 }
  0xaa   :  { %v315_v62 = vsel %vm314_vm15, %v253_v10, %v243_v13  ;;  %v295_v25 = vrot.slane %v294_v5, 4  ;;  %v284_v17 = vsel %vm161_vm7, %v231_v24, 2147483647  ;;  %vm322_vm5 = vcmask 1045509  }
  0xab   :  { %vm266_vm8 = vcmp.lt.s32.totalorder %v264_v22, %v265_v23  ;;  %v285_v27 = vrot.slane %v284_v17, 4  ;;  %vm324_vm11 = vcmask 1046534   ;;  %vm225_vm2 = vcmp.eq.f32.partialorder %v2941_v20, %v217_v26  ;;  %497 = vperm.xlu1 %2639, %v217_v26  }
  0xac   :  { %v267_v28 = vsel %vm266_vm8, %v264_v22, %v265_v23  ;;  %vm296_vm13 = vcmp.lt.s32.totalorder %v294_v5, %v295_v25  ;;  %v342_v57 = vsel %vm320_vm3, %v2921_v60, %v341_v3  ;;  %v233_v31 = vsel %vm225_vm2, %v2839_v18, 8  ;;  %v2681_v22 = vld [vmem:[#allocation3 + $0x2] ss:$0 sm:$0xff] }
  0xad   :  { %v268_v29 = vrot.slane %v267_v28, 2  ;;  %v297_v30 = vsel %vm296_vm13, %v294_v5, %v295_v25  ;;  %vm286_vm12 = vcmp.lt.s32.totalorder %v284_v17, %v285_v27  ;;  %v304_v34 = vsel %vm161_vm7, %v233_v31, 2147483647 }
  0xae   :  { %v298_v32 = vrot.slane %v297_v30, 2  ;;  %v287_v35 = vsel %vm286_vm12, %v284_v17, %v285_v27  ;;  %485 = vperm.xlu2 %2637, %v203_v63   ;;  %v343_v36 = vsel %vm322_vm5, %v203_v63, %v342_v57  ;;  %v305_v37 = vrot.slane %v304_v34, 4 }
  0xaf   :  { %vm269_vm8 = vcmp.lt.s32.totalorder %v267_v28, %v268_v29  ;;  %v288_v38 = vrot.slane %v287_v35, 2  ;;  %v344_v20 = vsel %vm324_vm11, %v210_v11, %v343_v36  ;;  %2641 = vset.pattern.permute.xlu0 %v2787_v0  ;;  %vm2989_vm0 = vcmp.lt.s32.totalorder %v2958_v8, %v281_v14 }
  0xb0   :  { %v270_v33 = vsel %vm269_vm8, %v267_v28, %v268_v29  ;;  %vm299_vm2 = vcmp.lt.s32.totalorder %v297_v30, %v298_v32  ;;  %v345_v39 = vsel %vm326_vm9, %v217_v26, %v344_v20  ;;  %vm306_vm13 = vcmp.lt.s32.totalorder %v304_v34, %v305_v37  ;;  %v385_v26 = vpop.permute.xlu1 %384  ;;  %v2682_v20 = vld [vmem:[#allocation3 + $0x1a] ss:$0 sm:$0xff] }
  0xb1   :  { %v271_v40 = vrot.slane %v270_v33, 1  ;;  %v300_v41 = vsel %vm299_vm2, %v297_v30, %v298_v32  ;;  %vm289_vm12 = vcmp.lt.s32.totalorder %v287_v35, %v288_v38  ;;  %v307_v45 = vsel %vm306_vm13, %v304_v34, %v305_v37  ;;  %v393_v32 = vpop.permute.xlu0 %392 }
  0xb2   :  { %v301_v44 = vrot.slane %v300_v41, 1  ;;  %v290_v46 = vsel %vm289_vm12, %v287_v35, %v288_v38  ;;  %v2996_v47 = vsel %vm330_vm1, %v345_v39, 0.0  ;;  %v263_v48 = vsel %vm2969_vm14, %v2955_v55, %v261_v7 }
  0xb3   :  { %vm272_vm8 = vcmp.lt.s32.totalorder %v270_v33, %v271_v40  ;;  %v308_v50 = vrot.slane %v307_v45, 2  ;;  %v291_v51 = vrot.slane %v290_v46, 1  ;;  %v317_v53 = vsel %vm316_vm10, %v263_v48, %v315_v62  ;;  %2642 = vset.pattern.permute.xlu1 %v2787_v0 }
  0xb4   :  { %v273_v52 = vsel %vm272_vm8, %v270_v33, %v271_v40  ;;  %vm302_vm2 = vcmp.lt.s32.totalorder %v300_v41, %v301_v44  ;;  %v283_v49 = vsel %vm2989_vm0, %v2958_v8, %v281_v14  ;;  %vm4128_vm14 = vcmp.eq.s32.totalorder %v2824_v2, 3  ;;  %v389_v14 = vpop.permute.xlu2 %388 }
  0xb5   :  { %v319_v54 = vsel %vm318_vm6, %v273_v52, %v317_v53  ;;  %vm309_vm1 = vcmp.lt.s32.totalorder %v307_v45, %v308_v50  ;;  %vm292_vm13 = vcmp.lt.s32.totalorder %v290_v46, %v291_v51  ;;  %v303_v59 = vsel %vm302_vm2, %v300_v41, %v301_v44  ;;  %v2683_v41 = vld [vmem:[#allocation3 + $0x2a] ss:$0 sm:$0xff] }
  0xb6   :  { %v310_v56 = vsel %vm309_vm1, %v307_v45, %v308_v50  ;;  %v293_v58 = vsel %vm292_vm13, %v290_v46, %v291_v51  ;;  %v321_v55 = vsel %vm320_vm3, %v283_v49, %v319_v54  ;;  %2640 = vset.pattern.permute.xlu2 %v2787_v0  ;;  %v3016_v4 = vsel %vm4128_vm14, 1, %v2787_v0  ;;  %v2685_v53 = vld [vmem:[#allocation3 + $0xa] ss:$0 sm:$0xff] }
  0xb7   :  { %v311_v61 = vrot.slane %v310_v56, 1  ;;  %v323_v63 = vsel %vm322_vm5, %v293_v58, %v321_v55  ;;  %718 = vperm.xlu2 %2640, %v3016_v4   ;;  %v698_v6 = vrot.slane %v3016_v4, 3  ;;  %v697_v7 = vrot.slane %v3016_v4, 2  ;;  %v2687_v58 = vld [vmem:[#allocation3 + $0x32] ss:$0 sm:$0xff] }
  0xb8   :  { %v325_v9 = vsel %vm324_vm11, %v303_v59, %v323_v63  ;;  %v700_v3 = vrot.slane %v3016_v4, 5  ;;  %v382_v21 = vperm.slane %v3029_v15, 0  ;;  %v435_v16 = vadd.f32 %v2681_v22, %v2864_v42  ;;  %v397_v35 = vpop.permute.xlu1 %396 }
  0xb9   :  { %vm312_vm0 = vcmp.lt.s32.totalorder %v310_v56, %v311_v61  ;;  %vm705_vm12 = vcmp.ne.s32.totalorder %v698_v6, 0  ;;  %vm704_vm8 = vcmp.ne.s32.totalorder %v697_v7, 0  ;;  %v699_v23 = vrot.slane %v3016_v4, 4  ;;  %v405_v49 = vpop.permute.xlu0 %404 }
  0xba   :  { %v313_v8 = vsel %vm312_vm0, %v310_v56, %v311_v61  ;;  %v711_v11 = vsel %vm704_vm8, 1, %v2787_v0  ;;  %v712_v12 = vsel %vm705_vm12, 1, %v2787_v0  ;;  %vm707_vm2 = vcmp.ne.s32.totalorder %v700_v3, 0  ;;  %v2686_v3 = vld [vmem:[#allocation3 + $0x22] ss:$0 sm:$0xff] }
  0xbb   :  { %v327_v10 = vsel %vm326_vm9, %v313_v8, %v325_v9  ;;  %726 = vperm.xlu1 %2642, %v711_v11   ;;  %v714_v13 = vsel %vm707_vm2, 1, %v2787_v0  ;;  %vm411_vm1 = vcmp.eq.s32.totalorder %v382_v21, 1  ;;  %vm706_vm13 = vcmp.ne.s32.totalorder %v699_v23, 0  ;;  %v2684_v8 = vld [vmem:[#allocation3 + $0x12] ss:$0 sm:$0xff] }
  0xbc   :  { %329 = vst.msk [vmem:[#allocation2 + $0x8] sm:$0xff] %vm161_vm7, %v327_v10  ;;  %v401_v62 = vpop.permute.xlu2 %400  ;;  %v419_v1 = vsel %vm411_vm1, %v2868_v43, 0.0  ;;  %v702_v25 = vrot.slane %v3016_v4, 7  ;;  %v713_v27 = vsel %vm706_vm13, 1, %v2787_v0  ;;  %v394_v36 = vperm.slane %v393_v32, 0 }
  0xbd   :  { %v443_v5 = vadd.f32 %v435_v16, %v419_v1  ;;  %v402_v60 = vperm.slane %v401_v62, 0  ;;  %v438_v33 = vadd.f32 %v2682_v20, %v2864_v42  ;;  %v696_v40 = vrot.slane %v3016_v4, 1 }
  0xbe   :  { %vm709_vm0 = vcmp.ne.s32.totalorder %v702_v25, 0  ;;  %vm414_vm12 = vcmp.eq.s32.totalorder %v394_v36, 1  ;;  %v386_v44 = vperm.slane %v385_v26, 0  ;;  %v390_v46 = vperm.slane %v389_v14, 0 }
  0xbf   :  { %730 = vperm.xlu2 %2640, %v712_v12   ;;  %v716_v30 = vsel %vm709_vm0, 1, %v2787_v0  ;;  %v422_v39 = vsel %vm414_vm12, %v2868_v43, 0.0  ;;  %vm703_vm8 = vcmp.ne.s32.totalorder %v696_v40, 0  ;;  %vm3051_vm2 = vcmp.eq.s32.totalorder %v402_v60, 1 }
  0xc0   :  { %v3049_v45 = vpop.permute.xlu1 %408  ;;  %v446_v50 = vadd.f32 %v438_v33, %v422_v39  ;;  %v710_v51 = vsel %vm703_vm8, 1, %v2787_v0  ;;  %v440_v56 = vadd.f32 %v2683_v41, %v2864_v42  ;;  %vm3059_vm1 = vcmp.eq.s32.totalorder %v386_v44, 1 }
  0xc1   :  { %722 = vperm.xlu0 %2641, %v710_v51   ;;  %vm3063_vm13 = vcmp.eq.s32.totalorder %v390_v46, 1  ;;  %v424_v59 = vsel %vm3051_vm2, %v2868_v43, 0.0  ;;  %v398_v61 = vperm.slane %v397_v35, 0  ;;  %v701_v7 = vrot.slane %v3016_v4, 6 }
  0xc2   :  { %v436_v9 = vadd.f32 %v2685_v53, %v2864_v42  ;;  %v420_v10 = vsel %vm3059_vm1, %v2868_v43, 0.0  ;;  %v421_v11 = vsel %vm3063_vm13, %v2868_v43, 0.0  ;;  %v448_v12 = vadd.f32 %v440_v56, %v424_v59 }
  0xc3   :  { %734 = vperm.xlu1 %2642, %v713_v27   ;;  %vm708_vm0 = vcmp.ne.s32.totalorder %v701_v7, 0  ;;  %v437_v14 = vadd.f32 %v2684_v8, %v2864_v42  ;;  %vm3081_vm12 = vcmp.eq.s32.totalorder %v398_v61, 1  ;;  %v439_v25 = vadd.f32 %v2686_v3, %v2864_v42 }
  0xc4   :  { %v715_v62 = vsel %vm708_vm0, 1, %v2787_v0  ;;  %v444_v23 = vadd.f32 %v436_v9, %v420_v10  ;;  %v423_v26 = vsel %vm3081_vm12, %v2868_v43, 0.0  ;;  %v406_v40 = vperm.slane %v405_v49, 0 }
  0xc5   :  { %v445_v1 = vadd.f32 %v437_v14, %v421_v11  ;;  %v441_v11 = vadd.f32 %v2687_v58, %v2864_v42 }
  0xc6   :  { %vm3108_vm2 = vcmp.eq.s32.totalorder %v406_v40, 1 }
  0xc7   :  { %738 = vperm.xlu2 %2640, %v714_v13  }
  0xc9   :  { %742 = vperm.xlu0 %2641, %v715_v62  }
  0xcb   :  { %746 = vperm.xlu1 %2642, %v716_v30  }
  0xcf   :  { %2643 = vset.pattern.permute.xlu2 %v2839_v18 }
  0xd1   :  { %2644 = vset.pattern.permute.xlu0 %v2839_v18 }
  0xd3   :  { %2645 = vset.pattern.permute.xlu1 %v2839_v18 }
  0xed   :  { %v456_v24 = vpop.permute.xlu2 %455 }
  0xee   :  { %v3036_v17 = vadd.f32 %v456_v24, %v443_v5 }
  0xf0   :  { %v507_v28 = vsel %vm161_vm7, %v3036_v17, -inf }
  0xf1   :  { %v508_v57 = vrot.slane %v507_v28, 4 }
  0xf3   :  { %v509_v29 = vmax.f32 %v507_v28, %v508_v57 }
  0xf5   :  { %v510_v31 = vrot.slane %v509_v29, 2 }
  0xf7   :  { %v511_v34 = vmax.f32 %v509_v29, %v510_v31 }
  0xf9   :  { %v512_v37 = vrot.slane %v511_v34, 1 }
  0xfb   :  { %v3042_v38 = vmax.f32 %v511_v34, %v512_v37  ;;  %v447_v37 = vadd.f32 %v439_v25, %v423_v26 }
  0xfd   :  { %793 = vperm.xlu2 %2643, %v3042_v38   ;;  %vm563_vm8 = vcmp.eq.f32.partialorder %v3036_v17, %v3042_v38 }
  0xfe   :  { %v571_v20 = vsel %vm563_vm8, %v2839_v18, 8 }
  0xff   :  { %v579_v48 = vsel %vm161_vm7, %v571_v20, 2147483647 }
 0x100   :  { %v474_v52 = vpop.permute.xlu2 %473  ;;  %v580_v61 = vrot.slane %v579_v48, 4 }
 0x101   :  { %v3056_v54 = vadd.f32 %v474_v52, %v446_v50 }
 0x102   :  { %vm581_vm13 = vcmp.lt.s32.totalorder %v579_v48, %v580_v61 }
 0x103   :  { %v528_v63 = vsel %vm161_vm7, %v3056_v54, -inf }
 0x104   :  { %v529_v6 = vrot.slane %v528_v63, 4 }
 0x106   :  { %v530_v13 = vmax.f32 %v528_v63, %v529_v6 }
 0x108   :  { %v531_v22 = vrot.slane %v530_v13, 2  ;;  %v486_v16 = vpop.permute.xlu2 %485 }
 0x109   :  { %v468_v21 = vpop.permute.xlu1 %467  ;;  %v3086_v5 = vadd.f32 %v486_v16, %v448_v12  ;;  %v425_v12 = vsel %vm3108_vm2, %v2868_v43, 0.0 }
 0x10a   :  { %v532_v27 = vmax.f32 %v530_v13, %v531_v22  ;;  %v501_v28 = vadd.f32 %v468_v21, %v445_v1  ;;  %v449_v16 = vadd.f32 %v441_v11, %v425_v12 }
 0x10b   :  { %v542_v29 = vsel %vm161_vm7, %v3086_v5, -inf }
 0x10c   :  { %v533_v30 = vrot.slane %v532_v27, 1  ;;  %v543_v31 = vrot.slane %v542_v29, 4  ;;  %v521_v32 = vsel %vm161_vm7, %v501_v28, -inf }
 0x10d   :  { %v462_v24 = vpop.permute.xlu0 %461  ;;  %v522_v35 = vrot.slane %v521_v32, 4 }
 0x10e   :  { %v500_v57 = vadd.f32 %v462_v24, %v444_v23  ;;  %v3099_v60 = vmax.f32 %v532_v27, %v533_v30  ;;  %v544_v33 = vmax.f32 %v542_v29, %v543_v31  ;;  %v2688_v23 = vld [vmem:[#allocation3 + $0x3a] ss:$0 sm:$0xff]  ;;  %v582_v24 = vsel %vm581_vm13, %v579_v48, %v580_v61 }
 0x10f   :  { %v523_v17 = vmax.f32 %v521_v32, %v522_v35 }
 0x110   :  { %v514_v34 = vsel %vm161_vm7, %v500_v57, -inf  ;;  %v545_v46 = vrot.slane %v544_v33, 2  ;;  %811 = vperm.xlu2 %2643, %v3099_v60   ;;  %vm566_vm1 = vcmp.eq.f32.partialorder %v3056_v54, %v3099_v60  ;;  %v410_v54 = vperm.slane %v3049_v45, 0 }
 0x111   :  { %v515_v36 = vrot.slane %v514_v34, 4  ;;  %v480_v39 = vpop.permute.xlu1 %479  ;;  %v524_v50 = vrot.slane %v523_v17, 2  ;;  %v574_v3 = vsel %vm566_vm1, %v2839_v18, 8 }
 0x112   :  { %v3101_v44 = vadd.f32 %v480_v39, %v447_v37  ;;  %v546_v53 = vmax.f32 %v544_v33, %v545_v46  ;;  %v609_v4 = vsel %vm161_vm7, %v574_v3, 2147483647  ;;  %vm3128_vm2 = vcmp.eq.s32.totalorder %v410_v54, 1 }
 0x113   :  { %v516_v41 = vmax.f32 %v514_v34, %v515_v36  ;;  %v525_v55 = vmax.f32 %v523_v17, %v524_v50  ;;  %v610_v30 = vrot.slane %v609_v4, 4  ;;  %v583_v34 = vrot.slane %v582_v24, 2 }
 0x114   :  { %v535_v52 = vsel %vm161_vm7, %v3101_v44, -inf  ;;  %v547_v63 = vrot.slane %v546_v53, 1 }
 0x115   :  { %v517_v51 = vrot.slane %v516_v41, 2  ;;  %v536_v56 = vrot.slane %v535_v52, 4  ;;  %v526_v7 = vrot.slane %v525_v55, 1 }
 0x116   :  { %v548_v9 = vmax.f32 %v546_v53, %v547_v63 }
 0x117   :  { %v518_v59 = vmax.f32 %v516_v41, %v517_v51  ;;  %v537_v6 = vmax.f32 %v535_v52, %v536_v56  ;;  %v527_v13 = vmax.f32 %v525_v55, %v526_v7 }
 0x118   :  { %823 = vperm.xlu2 %2643, %v548_v9   ;;  %vm568_vm8 = vcmp.eq.f32.partialorder %v3086_v5, %v548_v9  ;;  %v442_v5 = vadd.f32 %v2688_v23, %v2864_v42 }
 0x119   :  { %v519_v8 = vrot.slane %v518_v59, 1  ;;  %v538_v10 = vrot.slane %v537_v6, 2  ;;  %vm565_vm0 = vcmp.eq.f32.partialorder %v501_v28, %v527_v13  ;;  %805 = vperm.xlu1 %2645, %v527_v13   ;;  %v492_v1 = vpop.permute.xlu0 %491  ;;  %v576_v35 = vsel %vm568_vm8, %v2839_v18, 8 }
 0x11a   :  { %v573_v62 = vsel %vm565_vm0, %v2839_v18, 8  ;;  %v3133_v32 = vadd.f32 %v492_v1, %v449_v16  ;;  %vm611_vm0 = vcmp.lt.s32.totalorder %v609_v4, %v610_v30  ;;  %v629_v40 = vsel %vm161_vm7, %v576_v35, 2147483647 }
 0x11b   :  { %v520_v14 = vmax.f32 %v518_v59, %v519_v8  ;;  %v539_v21 = vmax.f32 %v537_v6, %v538_v10  ;;  %v599_v25 = vsel %vm161_vm7, %v573_v62, 2147483647  ;;  %vm584_vm8 = vcmp.lt.s32.totalorder %v582_v24, %v583_v34 }
 0x11c   :  { %v600_v26 = vrot.slane %v599_v25, 4  ;;  %v549_v33 = vsel %vm161_vm7, %v3133_v32, -inf  ;;  %v612_v51 = vsel %vm611_vm0, %v609_v4, %v610_v30  ;;  %v630_v56 = vrot.slane %v629_v40, 4 }
 0x11d   :  { %vm564_vm12 = vcmp.eq.f32.partialorder %v500_v57, %v520_v14  ;;  %799 = vperm.xlu0 %2644, %v520_v14   ;;  %v677_v28 = vsel %vm314_vm15, %v520_v14, %v3042_v38  ;;  %v540_v57 = vrot.slane %v539_v21, 1  ;;  %v426_v38 = vsel %vm3128_vm2, %v2868_v43, 0.0  ;;  %v498_v46 = vpop.permute.xlu1 %497 }
 0x11e   :  { %v572_v22 = vsel %vm564_vm12, %v2839_v18, 8  ;;  %v678_v31 = vsel %vm316_vm10, %v527_v13, %v677_v28  ;;  %vm601_vm13 = vcmp.lt.s32.totalorder %v599_v25, %v600_v26  ;;  %v550_v39 = vrot.slane %v549_v33, 4 }
 0x11f   :  { %v589_v45 = vsel %vm161_vm7, %v572_v22, 2147483647  ;;  %v541_v37 = vmax.f32 %v539_v21, %v540_v57  ;;  %v679_v20 = vsel %vm318_vm6, %v3099_v60, %v678_v31  ;;  %v602_v60 = vsel %vm601_vm13, %v599_v25, %v600_v26 }
 0x120   :  { %v590_v27 = vrot.slane %v589_v45, 4  ;;  %2646 = vset.pattern.permute.xlu2 %v2787_v0  ;;  %v450_v50 = vadd.f32 %v442_v5, %v426_v38  ;;  %v551_v53 = vmax.f32 %v549_v33, %v550_v39  ;;  %v585_v49 = vsel %vm584_vm8, %v582_v24, %v583_v34  ;;  %v3182_v33 = vpop.permute.xlu2 %718 }
 0x121   :  { %vm567_vm12 = vcmp.eq.f32.partialorder %v3101_v44, %v541_v37  ;;  %v680_v42 = vsel %vm320_vm3, %v541_v37, %v679_v20  ;;  %817 = vperm.xlu1 %2645, %v541_v37   ;;  %v603_v55 = vrot.slane %v602_v60, 2  ;;  %v613_v59 = vrot.slane %v612_v51, 2 }
 0x122   :  { %vm591_vm1 = vcmp.lt.s32.totalorder %v589_v45, %v590_v27  ;;  %v575_v41 = vsel %vm567_vm12, %v2839_v18, 8  ;;  %v681_v44 = vsel %vm322_vm5, %v548_v9, %v680_v42  ;;  %v3151_v58 = vadd.f32 %v498_v46, %v450_v50 }
 0x123   :  { %v592_v36 = vsel %vm591_vm1, %v589_v45, %v590_v27  ;;  %v619_v48 = vsel %vm161_vm7, %v575_v41, 2147483647  ;;  %v552_v63 = vrot.slane %v551_v53, 2  ;;  %vm4129_vm13 = vcmp.eq.s32.totalorder %v2824_v2, 4 }
 0x124   :  { %v593_v17 = vrot.slane %v592_v36, 2  ;;  %v620_v52 = vrot.slane %v619_v48, 4  ;;  %v556_v6 = vsel %vm161_vm7, %v3151_v58, -inf  ;;  %vm631_vm0 = vcmp.lt.s32.totalorder %v629_v40, %v630_v56 }
 0x125   :  { %v553_v8 = vmax.f32 %v551_v53, %v552_v63  ;;  %v557_v10 = vrot.slane %v556_v6, 4  ;;  %v586_v11 = vrot.slane %v585_v49, 1  ;;  %vm604_vm12 = vcmp.lt.s32.totalorder %v602_v60, %v603_v55 }
 0x126   :  { %vm594_vm2 = vcmp.lt.s32.totalorder %v592_v36, %v593_v17  ;;  %vm621_vm1 = vcmp.lt.s32.totalorder %v619_v48, %v620_v52  ;;  %v3159_v12 = vsel %vm4129_vm13, 1, %v2787_v0  ;;  %vm614_vm8 = vcmp.lt.s32.totalorder %v612_v51, %v613_v59 }
 0x127   :  { %v622_v61 = vsel %vm621_vm1, %v619_v48, %v620_v52  ;;  %v595_v7 = vsel %vm594_vm2, %v592_v36, %v593_v17  ;;  %v554_v3 = vrot.slane %v553_v8, 1  ;;  %v558_v13 = vmax.f32 %v556_v6, %v557_v10  ;;  %1056 = vperm.xlu2 %2646, %v3159_v12  }
 0x128   :  { %v623_v9 = vrot.slane %v622_v61, 2  ;;  %v632_v14 = vsel %vm631_vm0, %v629_v40, %v630_v56  ;;  %v596_v21 = vrot.slane %v595_v7, 1  ;;  %v1036_v54 = vrot.slane %v3159_v12, 3 }
 0x129   :  { %v605_v4 = vsel %vm604_vm12, %v602_v60, %v603_v55  ;;  %v555_v62 = vmax.f32 %v553_v8, %v554_v3  ;;  %v559_v22 = vrot.slane %v558_v13, 2  ;;  %vm3163_vm2 = vcmp.lt.s32.totalorder %v585_v49, %v586_v11 }
 0x12a   :  { %v615_v1 = vsel %vm614_vm8, %v612_v51, %v613_v59  ;;  %vm624_vm1 = vcmp.lt.s32.totalorder %v622_v61, %v623_v9  ;;  %vm1043_vm4 = vcmp.ne.s32.totalorder %v1036_v54, 0  ;;  %v633_v23 = vrot.slane %v632_v14, 2 }
 0x12b   :  { %vm569_vm14 = vcmp.eq.f32.partialorder %v3133_v32, %v555_v62  ;;  %v682_v24 = vsel %vm324_vm11, %v555_v62, %v681_v44  ;;  %v560_v25 = vmax.f32 %v558_v13, %v559_v22  ;;  %829 = vperm.xlu0 %2644, %v555_v62   ;;  %v606_v45 = vrot.slane %v605_v4, 1  ;;  %v2689_v13 = vld [vmem:[#allocation3 + $0x3] ss:$0 sm:$0xff] }
 0x12c   :  { %vm597_vm0 = vcmp.lt.s32.totalorder %v595_v7, %v596_v21  ;;  %v577_v26 = vsel %vm569_vm14, %v2839_v18, 8  ;;  %v1050_v27 = vsel %vm1043_vm4, 1, %v2787_v0  ;;  %v625_v28 = vsel %vm624_vm1, %v622_v61, %v623_v9  ;;  %v731_v61 = vpop.permute.xlu2 %730 }
 0x12d   :  { %v639_v57 = vsel %vm161_vm7, %v577_v26, 2147483647  ;;  %v561_v29 = vrot.slane %v560_v25, 1  ;;  %v1038_v30 = vrot.slane %v3159_v12, 5  ;;  %vm668_vm12 = vcmp.eq.s32.totalorder %v3029_v15, 1 }
 0x12e   :  { %v640_v31 = vrot.slane %v639_v57, 4  ;;  %v588_v32 = vsel %vm3163_vm2, %v585_v49, %v586_v11  ;;  %v616_v5 = vrot.slane %v615_v1, 1  ;;  %v598_v34 = vsel %vm597_vm0, %v595_v7, %v596_v21  ;;  %v3209_v21 = vld [vmem:[%s4120_s1] sm:$0xff] }
 0x12f   :  { %v562_v35 = vmax.f32 %v560_v25, %v561_v29  ;;  %1068 = vperm.xlu2 %2646, %v1050_v27   ;;  %vm634_vm8 = vcmp.lt.s32.totalorder %v632_v14, %v633_v23  ;;  %vm3176_vm14 = vcmp.lt.s32.totalorder %v605_v4, %v606_v45  ;;  %v626_v37 = vrot.slane %v625_v28, 1 }
 0x130   :  { %vm641_vm4 = vcmp.lt.s32.totalorder %v639_v57, %v640_v31  ;;  %vm1045_vm2 = vcmp.ne.s32.totalorder %v1038_v30, 0  ;;  %v659_v42 = vsel %vm314_vm15, %v598_v34, %v588_v32  ;;  %vm617_vm0 = vcmp.lt.s32.totalorder %v615_v1, %v616_v5 }
 0x131   :  { %v642_v38 = vsel %vm641_vm4, %v639_v57, %v640_v31  ;;  %vm570_vm1 = vcmp.eq.f32.partialorder %v3151_v58, %v562_v35  ;;  %v683_v20 = vsel %vm326_vm9, %v562_v35, %v682_v24  ;;  %835 = vperm.xlu1 %2645, %v562_v35   ;;  %v635_v41 = vsel %vm634_vm8, %v632_v14, %v633_v23 }
 0x132   :  { %v643_v39 = vrot.slane %v642_v38, 2  ;;  %v578_v40 = vsel %vm570_vm1, %v2839_v18, 8  ;;  %v3189_v17 = vsel %vm668_vm12, %v683_v20, %v2996_v47  ;;  %v608_v60 = vsel %vm3176_vm14, %v605_v4, %v606_v45 }
 0x133   :  { %v649_v46 = vsel %vm161_vm7, %v578_v40, 2147483647  ;;  %2647 = vset.pattern.permute.xlu0 %v2787_v0  ;;  %v1052_v50 = vsel %vm1045_vm2, 1, %v2787_v0  ;;  %v660_v51 = vsel %vm316_vm10, %v608_v60, %v659_v42  ;;  %vm627_vm1 = vcmp.lt.s32.totalorder %v625_v28, %v626_v37  ;;  %v727_v40 = vpop.permute.xlu1 %726 }
 0x134   :  { %vm644_vm4 = vcmp.lt.s32.totalorder %v642_v38, %v643_v39  ;;  %v650_v48 = vrot.slane %v649_v46, 4  ;;  %v636_v15 = vrot.slane %v635_v41, 1  ;;  %v618_v53 = vsel %vm617_vm0, %v615_v1, %v616_v5  ;;  %v739_v14 = vpop.permute.xlu2 %738  ;;  %v2691_v5 = vld [vmem:[#allocation3 + $0x2b] ss:$0 sm:$0xff] }
 0x135   :  { %v645_v52 = vsel %vm644_vm4, %v642_v38, %v643_v39  ;;  %v628_v44 = vsel %vm627_vm1, %v625_v28, %v626_v37  ;;  %v661_v58 = vsel %vm318_vm6, %v618_v53, %v660_v51  ;;  %v720_v3 = vperm.slane %v3182_v33, 0  ;;  %v2690_v28 = vld [vmem:[#allocation3 + $0x1b] ss:$0 sm:$0xff] }
 0x136   :  { %v646_v47 = vrot.slane %v645_v52, 1  ;;  %vm651_vm12 = vcmp.lt.s32.totalorder %v649_v46, %v650_v48  ;;  %vm637_vm14 = vcmp.lt.s32.totalorder %v635_v41, %v636_v15  ;;  %v662_v55 = vsel %vm320_vm3, %v628_v44, %v661_v58 }
 0x137   :  { %v652_v56 = vsel %vm651_vm12, %v649_v46, %v650_v48  ;;  %1076 = vperm.xlu2 %2646, %v1052_v50   ;;  %v638_v7 = vsel %vm637_vm14, %v635_v41, %v636_v15  ;;  %v773_v54 = vadd.f32 %v3209_v21, %v2689_v13  ;;  %v732_v45 = vperm.slane %v731_v61, 0 }
 0x138   :  { %v653_v49 = vrot.slane %v652_v56, 2  ;;  %vm647_vm8 = vcmp.lt.s32.totalorder %v645_v52, %v646_v47  ;;  %v663_v8 = vsel %vm322_vm5, %v638_v7, %v662_v55  ;;  %v776_v29 = vadd.f32 %v3209_v21, %v2690_v28 }
 0x139   :  { %2648 = vset.pattern.permute.xlu1 %v2787_v0  ;;  %v648_v63 = vsel %vm647_vm8, %v645_v52, %v646_v47  ;;  %vm752_vm0 = vcmp.eq.s32.totalorder %v732_v45, 1  ;;  %v740_v31 = vperm.slane %v739_v14, 0  ;;  %v1035_v34 = vrot.slane %v3159_v12, 2 }
 0x13a   :  { %vm654_vm13 = vcmp.lt.s32.totalorder %v652_v56, %v653_v49  ;;  %v664_v10 = vsel %vm324_vm11, %v648_v63, %v663_v8  ;;  %v760_v30 = vsel %vm752_vm0, %v2868_v43, 0.0  ;;  %v778_v38 = vadd.f32 %v3209_v21, %v2691_v5 }
 0x13b   :  { %v655_v59 = vsel %vm654_vm13, %v652_v56, %v653_v49  ;;  %vm749_vm13 = vcmp.eq.s32.totalorder %v720_v3, 1  ;;  %v784_v32 = vadd.f32 %v776_v29, %v760_v30  ;;  %vm754_vm1 = vcmp.eq.s32.totalorder %v740_v31, 1  ;;  %v735_v63 = vpop.permute.xlu1 %734  ;;  %v2694_v31 = vld [vmem:[#allocation3 + $0x23] ss:$0 sm:$0xff] }
 0x13c   :  { %v656_v6 = vrot.slane %v655_v59, 1  ;;  %v757_v4 = vsel %vm749_vm13, %v2868_v43, 0.0  ;;  %vm1042_vm12 = vcmp.ne.s32.totalorder %v1035_v34, 0  ;;  %v762_v20 = vsel %vm754_vm1, %v2868_v43, 0.0 }
 0x13d   :  { %v781_v62 = vadd.f32 %v773_v54, %v757_v4  ;;  %v1049_v37 = vsel %vm1042_vm12, 1, %v2787_v0  ;;  %v786_v41 = vadd.f32 %v778_v38, %v762_v20  ;;  %v1037_v60 = vrot.slane %v3159_v12, 4  ;;  %v2692_v4 = vld [vmem:[#allocation3 + $0x13] ss:$0 sm:$0xff] }
 0x13e   :  { %vm657_vm2 = vcmp.lt.s32.totalorder %v655_v59, %v656_v6  ;;  %1064 = vperm.xlu1 %2648, %v1049_v37   ;;  %v1034_v48 = vrot.slane %v3159_v12, 1  ;;  %v1040_v52 = vrot.slane %v3159_v12, 7  ;;  %v1039_v56 = vrot.slane %v3159_v12, 6 }
 0x13f   :  { %v658_v11 = vsel %vm657_vm2, %v655_v59, %v656_v6  ;;  %2649 = vset.pattern.permute.xlu2 %v2839_v18  ;;  %vm1044_vm8 = vcmp.ne.s32.totalorder %v1037_v60, 0  ;;  %v723_v6 = vpop.permute.xlu0 %722  ;;  %v728_v3 = vperm.slane %v727_v40, 0 }
 0x140   :  { %v665_v9 = vsel %vm326_vm9, %v658_v11, %v664_v10  ;;  %v1051_v47 = vsel %vm1044_vm8, 1, %v2787_v0  ;;  %vm1041_vm14 = vcmp.ne.s32.totalorder %v1034_v48, 0  ;;  %vm1047_vm2 = vcmp.ne.s32.totalorder %v1040_v52, 0 }
 0x141   :  { %667 = vst.msk [vmem:[#allocation2 + $0x10] sm:$0xff] %vm161_vm7, %v665_v9  ;;  %v1048_v58 = vsel %vm1041_vm14, 1, %v2787_v0  ;;  %vm1046_vm13 = vcmp.ne.s32.totalorder %v1039_v56, 0  ;;  %v1054_v7 = vsel %vm1047_vm2, 1, %v2787_v0  ;;  %v724_v14 = vperm.slane %v723_v6, 0 }
 0x142   :  { %1060 = vperm.xlu0 %2647, %v1048_v58   ;;  %v1053_v12 = vsel %vm1046_vm13, 1, %v2787_v0  ;;  %vm751_vm1 = vcmp.eq.s32.totalorder %v728_v3, 1 }
 0x143   :  { %vm750_vm12 = vcmp.eq.s32.totalorder %v724_v14, 1  ;;  %v759_v45 = vsel %vm751_vm1, %v2868_v43, 0.0 }
 0x146   :  { %1072 = vperm.xlu1 %2648, %v1051_v47  }
 0x14a   :  { %1080 = vperm.xlu0 %2647, %v1053_v12  }
 0x14e   :  { %1084 = vperm.xlu1 %2648, %v1054_v7  }
 0x152   :  { %2650 = vset.pattern.permute.xlu0 %v2839_v18 }
 0x156   :  { %2651 = vset.pattern.permute.xlu1 %v2839_v18 }
 0x157   :  { %v794_v22 = vpop.permute.xlu2 %793 }
 0x158   :  { %v837_v16 = vadd.f32 %v794_v22, %v781_v62  ;;  %v2693_v62 = vld [vmem:[#allocation3 + $0xb] ss:$0 sm:$0xff]  ;;  %v747_v22 = vpop.permute.xlu1 %746 }
 0x15a   :  { %v845_v1 = vsel %vm161_vm7, %v837_v16, -inf }
 0x15b   :  { %v846_v23 = vrot.slane %v845_v1, 4 }
 0x15d   :  { %v847_v24 = vmax.f32 %v845_v1, %v846_v23  ;;  %v743_v1 = vpop.permute.xlu0 %742 }
 0x15e   :  { %v744_v56 = vperm.slane %v743_v1, 0 }
 0x15f   :  { %v848_v25 = vrot.slane %v847_v24, 2 }
 0x160   :  { %vm3273_vm1 = vcmp.eq.s32.totalorder %v744_v56, 1 }
 0x161   :  { %v849_v26 = vmax.f32 %v847_v24, %v848_v25  ;;  %v775_v24 = vadd.f32 %v3209_v21, %v2692_v4  ;;  %v774_v25 = vadd.f32 %v3209_v21, %v2693_v62 }
 0x163   :  { %v850_v27 = vrot.slane %v849_v26, 1  ;;  %v783_v29 = vadd.f32 %v775_v24, %v759_v45  ;;  %v763_v24 = vsel %vm3273_vm1, %v2868_v43, 0.0  ;;  %v2696_v45 = vld [vmem:[#allocation3 + $0x3b] ss:$0 sm:$0xff] }
 0x165   :  { %v3214_v57 = vmax.f32 %v849_v26, %v850_v27  ;;  %v736_v26 = vperm.slane %v735_v63, 0  ;;  %v758_v27 = vsel %vm750_vm12, %v2868_v43, 0.0 }
 0x166   :  { %v782_v30 = vadd.f32 %v774_v25, %v758_v27 }
 0x167   :  { %vm901_vm4 = vcmp.eq.f32.partialorder %v837_v16, %v3214_v57  ;;  %1131 = vperm.xlu2 %2649, %v3214_v57   ;;  %vm3255_vm14 = vcmp.eq.s32.totalorder %v736_v26, 1 }
 0x168   :  { %v909_v11 = vsel %vm901_vm4, %v2839_v18, 8 }
 0x169   :  { %v917_v54 = vsel %vm161_vm7, %v909_v11, 2147483647 }
 0x16a   :  { %v812_v35 = vpop.permute.xlu2 %811  ;;  %v918_v23 = vrot.slane %v917_v54, 4 }
 0x16b   :  { %v840_v36 = vadd.f32 %v812_v35, %v784_v32 }
 0x16c   :  { %vm919_vm4 = vcmp.lt.s32.totalorder %v917_v54, %v918_v23 }
 0x16d   :  { %v866_v42 = vsel %vm161_vm7, %v840_v36, -inf  ;;  %v920_v32 = vsel %vm919_vm4, %v917_v54, %v918_v23 }
 0x16e   :  { %v867_v39 = vrot.slane %v866_v42, 4 }
 0x170   :  { %v868_v46 = vmax.f32 %v866_v42, %v867_v39  ;;  %v921_v42 = vrot.slane %v920_v32, 2 }
 0x172   :  { %v869_v50 = vrot.slane %v868_v46, 2  ;;  %v824_v51 = vpop.permute.xlu2 %823  ;;  %vm922_vm13 = vcmp.lt.s32.totalorder %v920_v32, %v921_v42 }
 0x173   :  { %v842_v15 = vadd.f32 %v824_v51, %v786_v41  ;;  %v777_v41 = vadd.f32 %v3209_v21, %v2694_v31  ;;  %v3269_v7 = vsel %vm922_vm13, %v920_v32, %v921_v42 }
 0x174   :  { %v870_v53 = vmax.f32 %v868_v46, %v869_v50  ;;  %v761_v46 = vsel %vm3255_vm14, %v2868_v43, 0.0  ;;  %v924_v23 = vrot.slane %v3269_v7, 1 }
 0x175   :  { %v880_v44 = vsel %vm161_vm7, %v842_v15, -inf  ;;  %v785_v47 = vadd.f32 %v777_v41, %v761_v46 }
 0x176   :  { %v871_v49 = vrot.slane %v870_v53, 1  ;;  %v881_v55 = vrot.slane %v880_v44, 4  ;;  %vm3306_vm1 = vcmp.lt.s32.totalorder %v3269_v7, %v924_v23 }
 0x178   :  { %v3232_v59 = vmax.f32 %v870_v53, %v871_v49  ;;  %v882_v61 = vmax.f32 %v880_v44, %v881_v55  ;;  %v748_v55 = vperm.slane %v747_v22, 0 }
 0x17a   :  { %v883_v8 = vrot.slane %v882_v61, 2  ;;  %1149 = vperm.xlu2 %2649, %v3232_v59   ;;  %vm904_vm0 = vcmp.eq.f32.partialorder %v840_v36, %v3232_v59  ;;  %vm3277_vm12 = vcmp.eq.s32.totalorder %v748_v55, 1 }
 0x17b   :  { %v912_v16 = vsel %vm904_vm0, %v2839_v18, 8 }
 0x17c   :  { %v884_v10 = vmax.f32 %v882_v61, %v883_v8  ;;  %v947_v28 = vsel %vm161_vm7, %v912_v16, 2147483647 }
 0x17d   :  { %v948_v36 = vrot.slane %v947_v28, 4 }
 0x17e   :  { %v885_v9 = vrot.slane %v884_v10, 1 }
 0x17f   :  { %vm949_vm2 = vcmp.lt.s32.totalorder %v947_v28, %v948_v36 }
 0x180   :  { %v3240_v13 = vmax.f32 %v884_v10, %v885_v9  ;;  %v950_v53 = vsel %vm949_vm2, %v947_v28, %v948_v36  ;;  %v2695_v10 = vld [vmem:[#allocation3 + $0x33] ss:$0 sm:$0xff] }
 0x181   :  { %v951_v8 = vrot.slane %v950_v53, 2  ;;  %v779_v25 = vadd.f32 %v3209_v21, %v2695_v10  ;;  %v926_v10 = vsel %vm3306_vm1, %v3269_v7, %v924_v23  ;;  %v3327_v54 = vpop.permute.xlu2 %1056 }
 0x182   :  { %1161 = vperm.xlu2 %2649, %v3240_v13   ;;  %vm906_vm8 = vcmp.eq.f32.partialorder %v842_v15, %v3240_v13 }
 0x183   :  { %v914_v37 = vsel %vm906_vm8, %v2839_v18, 8  ;;  %vm3282_vm4 = vcmp.lt.s32.totalorder %v950_v53, %v951_v8  ;;  %v787_v42 = vadd.f32 %v779_v25, %v763_v24 }
 0x184   :  { %v967_v60 = vsel %vm161_vm7, %v914_v37, 2147483647  ;;  %v780_v37 = vadd.f32 %v3209_v21, %v2696_v45 }
 0x185   :  { %v968_v15 = vrot.slane %v967_v60, 4 }
 0x187   :  { %vm969_vm0 = vcmp.lt.s32.totalorder %v967_v60, %v968_v15 }
 0x188   :  { %v970_v4 = vsel %vm969_vm0, %v967_v60, %v968_v15 }
 0x189   :  { %v971_v28 = vrot.slane %v970_v4, 2 }
 0x18a   :  { %2652 = vset.pattern.permute.xlu2 %v2787_v0 }
 0x18b   :  { %v806_v34 = vpop.permute.xlu1 %805  ;;  %vm972_vm2 = vcmp.lt.s32.totalorder %v970_v4, %v971_v28 }
 0x18c   :  { %v839_v38 = vadd.f32 %v806_v34, %v783_v29 }
 0x18e   :  { %v859_v39 = vsel %vm161_vm7, %v839_v38, -inf }
 0x18f   :  { %v800_v35 = vpop.permute.xlu0 %799  ;;  %v860_v48 = vrot.slane %v859_v39, 4 }
 0x190   :  { %v838_v20 = vadd.f32 %v800_v35, %v782_v30 }
 0x191   :  { %v861_v51 = vmax.f32 %v859_v39, %v860_v48  ;;  %v953_v39 = vsel %vm3282_vm4, %v950_v53, %v951_v8 }
 0x192   :  { %v852_v40 = vsel %vm161_vm7, %v838_v20, -inf  ;;  %v954_v15 = vrot.slane %v953_v39, 1 }
 0x193   :  { %v853_v50 = vrot.slane %v852_v40, 4  ;;  %v862_v44 = vrot.slane %v861_v51, 2  ;;  %v818_v49 = vpop.permute.xlu1 %817 }
 0x194   :  { %v3267_v61 = vadd.f32 %v818_v49, %v785_v47  ;;  %v973_v47 = vsel %vm972_vm2, %v970_v4, %v971_v28 }
 0x195   :  { %v854_v52 = vmax.f32 %v852_v40, %v853_v50  ;;  %v863_v63 = vmax.f32 %v861_v51, %v862_v44  ;;  %v1058_v40 = vperm.slane %v3327_v54, 0 }
 0x196   :  { %v873_v12 = vsel %vm161_vm7, %v3267_v61, -inf }
 0x197   :  { %v855_v58 = vrot.slane %v854_v52, 2  ;;  %v864_v9 = vrot.slane %v863_v63, 1  ;;  %v874_v14 = vrot.slane %v873_v12, 4 }
 0x199   :  { %v856_v6 = vmax.f32 %v854_v52, %v855_v58  ;;  %v865_v62 = vmax.f32 %v863_v63, %v864_v9  ;;  %v875_v1 = vmax.f32 %v873_v12, %v874_v14  ;;  %v974_v9 = vrot.slane %v973_v47, 1 }
 0x19b   :  { %v857_v3 = vrot.slane %v856_v6, 1  ;;  %vm903_vm8 = vcmp.eq.f32.partialorder %v839_v38, %v865_v62  ;;  %v876_v27 = vrot.slane %v875_v1, 2  ;;  %1143 = vperm.xlu1 %2651, %v865_v62   ;;  %v764_v38 = vsel %vm3277_vm12, %v2868_v43, 0.0 }
 0x19c   :  { %v911_v29 = vsel %vm903_vm8, %v2839_v18, 8  ;;  %v788_v52 = vadd.f32 %v780_v37, %v764_v38 }
 0x19d   :  { %v858_v22 = vmax.f32 %v856_v6, %v857_v3  ;;  %v937_v32 = vsel %vm161_vm7, %v911_v29, 2147483647  ;;  %v877_v34 = vmax.f32 %v875_v1, %v876_v27  ;;  %v830_v60 = vpop.permute.xlu0 %829 }
 0x19e   :  { %v938_v36 = vrot.slane %v937_v32, 4  ;;  %v3310_v51 = vadd.f32 %v830_v60, %v787_v42 }
 0x19f   :  { %vm902_vm14 = vcmp.eq.f32.partialorder %v838_v20, %v858_v22  ;;  %v1015_v26 = vsel %vm314_vm15, %v858_v22, %v3214_v57  ;;  %1137 = vperm.xlu0 %2650, %v858_v22   ;;  %v878_v20 = vrot.slane %v877_v34, 1 }
 0x1a0   :  { %v910_v30 = vsel %vm902_vm14, %v2839_v18, 8  ;;  %v1016_v31 = vsel %vm316_vm10, %v865_v62, %v1015_v26  ;;  %vm939_vm13 = vcmp.lt.s32.totalorder %v937_v32, %v938_v36  ;;  %v887_v44 = vsel %vm161_vm7, %v3310_v51, -inf }
 0x1a1   :  { %v927_v5 = vsel %vm161_vm7, %v910_v30, 2147483647  ;;  %v1017_v35 = vsel %vm318_vm6, %v3232_v59, %v1016_v31  ;;  %v940_v59 = vsel %vm939_vm13, %v937_v32, %v938_v36  ;;  %v879_v46 = vmax.f32 %v877_v34, %v878_v20  ;;  %v3343_v36 = vpop.permute.xlu2 %1068 }
 0x1a2   :  { %v928_v57 = vrot.slane %v927_v5, 4  ;;  %v941_v48 = vrot.slane %v940_v59, 2  ;;  %v888_v63 = vrot.slane %v887_v44, 4  ;;  %vm3323_vm14 = vcmp.lt.s32.totalorder %v953_v39, %v954_v15 }
 0x1a3   :  { %vm905_vm12 = vcmp.eq.f32.partialorder %v3267_v61, %v879_v46  ;;  %v1018_v53 = vsel %vm320_vm3, %v879_v46, %v1017_v35  ;;  %1155 = vperm.xlu1 %2651, %v879_v46   ;;  %v836_v14 = vpop.permute.xlu1 %835  ;;  %v956_v24 = vsel %vm3323_vm14, %v953_v39, %v954_v15 }
 0x1a4   :  { %vm929_vm0 = vcmp.lt.s32.totalorder %v927_v5, %v928_v57  ;;  %vm942_vm4 = vcmp.lt.s32.totalorder %v940_v59, %v941_v48  ;;  %v913_v56 = vsel %vm905_vm12, %v2839_v18, 8  ;;  %v1019_v61 = vsel %vm322_vm5, %v3240_v13, %v1018_v53 }
 0x1a5   :  { %v930_v41 = vsel %vm929_vm0, %v927_v5, %v928_v57  ;;  %v943_v58 = vsel %vm942_vm4, %v940_v59, %v941_v48  ;;  %v957_v55 = vsel %vm161_vm7, %v913_v56, 2147483647  ;;  %v889_v3 = vmax.f32 %v887_v44, %v888_v63 }
 0x1a6   :  { %v931_v50 = vrot.slane %v930_v41, 2  ;;  %v944_v6 = vrot.slane %v943_v58, 1  ;;  %v958_v12 = vrot.slane %v957_v55, 4  ;;  %v844_v4 = vadd.f32 %v836_v14, %v788_v52 }
 0x1a7   :  { %v890_v13 = vrot.slane %v889_v3, 2  ;;  %vm4130_vm12 = vcmp.eq.s32.totalorder %v2824_v2, 5  ;;  %vm975_vm4 = vcmp.lt.s32.totalorder %v973_v47, %v974_v9 }
 0x1a8   :  { %vm932_vm8 = vcmp.lt.s32.totalorder %v930_v41, %v931_v50  ;;  %vm945_vm2 = vcmp.lt.s32.totalorder %v943_v58, %v944_v6  ;;  %vm959_vm0 = vcmp.lt.s32.totalorder %v957_v55, %v958_v12  ;;  %v894_v16 = vsel %vm161_vm7, %v844_v4, -inf }
 0x1a9   :  { %v933_v49 = vsel %vm932_vm8, %v930_v41, %v931_v50  ;;  %v960_v22 = vsel %vm959_vm0, %v957_v55, %v958_v12  ;;  %v946_v1 = vsel %vm945_vm2, %v943_v58, %v944_v6  ;;  %v891_v45 = vmax.f32 %v889_v3, %v890_v13  ;;  %v1077_v56 = vpop.permute.xlu2 %1076 }
 0x1aa   :  { %v934_v8 = vrot.slane %v933_v49, 1  ;;  %v961_v23 = vrot.slane %v960_v22, 2  ;;  %v895_v26 = vrot.slane %v894_v16, 4  ;;  %v3339_v28 = vsel %vm4130_vm12, 1, %v2787_v0 }
 0x1ab   :  { %v892_v30 = vrot.slane %v891_v45, 1  ;;  %1394 = vperm.xlu2 %2652, %v3339_v28   ;;  %v1374_v5 = vrot.slane %v3339_v28, 3  ;;  %v976_v57 = vsel %vm975_vm4, %v973_v47, %v974_v9  ;;  %v1376_v48 = vrot.slane %v3339_v28, 5 }
 0x1ac   :  { %vm935_vm13 = vcmp.lt.s32.totalorder %v933_v49, %v934_v8  ;;  %vm962_vm1 = vcmp.lt.s32.totalorder %v960_v22, %v961_v23  ;;  %v896_v31 = vmax.f32 %v894_v16, %v895_v26  ;;  %v2698_v26 = vld [vmem:[#allocation3 + $0x1c] ss:$0 sm:$0xff] }
 0x1ad   :  { %v936_v62 = vsel %vm935_vm13, %v933_v49, %v934_v8  ;;  %v963_v29 = vsel %vm962_vm1, %v960_v22, %v961_v23  ;;  %v893_v34 = vmax.f32 %v891_v45, %v892_v30  ;;  %vm1381_vm14 = vcmp.ne.s32.totalorder %v1374_v5, 0 }
 0x1ae   :  { %v997_v7 = vsel %vm314_vm15, %v936_v62, %v926_v10  ;;  %v964_v32 = vrot.slane %v963_v29, 1  ;;  %v897_v35 = vrot.slane %v896_v31, 2  ;;  %v1388_v59 = vsel %vm1381_vm14, 1, %v2787_v0 }
 0x1af   :  { %v998_v25 = vsel %vm316_vm10, %v946_v1, %v997_v7  ;;  %vm907_vm2 = vcmp.eq.f32.partialorder %v3310_v51, %v893_v34  ;;  %v1020_v38 = vsel %vm324_vm11, %v893_v34, %v1019_v61  ;;  %1167 = vperm.xlu0 %2650, %v893_v34   ;;  %v2697_v51 = vld [vmem:[#allocation3 + $0x4] ss:$0 sm:$0xff]  ;;  %vm1006_vm13 = vcmp.eq.s32.totalorder %v3182_v33, 1  ;;  %v2699_v34 = vld [vmem:[#allocation3 + $0x2c] ss:$0 sm:$0xff] }
 0x1b0   :  { %v999_v27 = vsel %vm318_vm6, %v956_v24, %v998_v25  ;;  %vm965_vm8 = vcmp.lt.s32.totalorder %v963_v29, %v964_v32  ;;  %v898_v20 = vmax.f32 %v896_v31, %v897_v35  ;;  %v915_v39 = vsel %vm907_vm2, %v2839_v18, 8 }
 0x1b1   :  { %v966_v37 = vsel %vm965_vm8, %v963_v29, %v964_v32  ;;  %v977_v41 = vsel %vm161_vm7, %v915_v39, 2147483647  ;;  %vm3355_vm1 = vcmp.eq.s32.totalorder %v1058_v40, 1  ;;  %vm1383_vm8 = vcmp.ne.s32.totalorder %v1376_v48, 0 }
 0x1b2   :  { %v1000_v42 = vsel %vm320_vm3, %v966_v37, %v999_v27  ;;  %v899_v60 = vrot.slane %v898_v20, 1  ;;  %v978_v50 = vrot.slane %v977_v41, 4  ;;  %v1111_v49 = vadd.f32 %v3209_v21, %v2697_v51 }
 0x1b3   :  { %v1001_v46 = vsel %vm322_vm5, %v976_v57, %v1000_v42  ;;  %1406 = vperm.xlu2 %2652, %v1388_v59   ;;  %v1095_v63 = vsel %vm3355_vm1, %v2868_v43, 0.0  ;;  %v1390_v8 = vsel %vm1383_vm8, 1, %v2787_v0  ;;  %v1070_v24 = vperm.slane %v3343_v36, 0 }
 0x1b4   :  { %v900_v52 = vmax.f32 %v898_v20, %v899_v60  ;;  %vm979_vm0 = vcmp.lt.s32.totalorder %v977_v41, %v978_v50  ;;  %v1119_v10 = vadd.f32 %v1111_v49, %v1095_v63  ;;  %v1114_v30 = vadd.f32 %v3209_v21, %v2698_v26 }
 0x1b5   :  { %v980_v47 = vsel %vm979_vm0, %v977_v41, %v978_v50  ;;  %v1078_v32 = vperm.slane %v1077_v56, 0  ;;  %v1116_v36 = vadd.f32 %v3209_v21, %v2699_v34  ;;  %v1373_v40 = vrot.slane %v3339_v28, 2 }
 0x1b6   :  { %vm908_vm4 = vcmp.eq.f32.partialorder %v844_v4, %v900_v52  ;;  %v1021_v53 = vsel %vm326_vm9, %v900_v52, %v1020_v38  ;;  %1173 = vperm.xlu1 %2651, %v900_v52   ;;  %v981_v44 = vrot.slane %v980_v47, 2  ;;  %v1372_v59 = vrot.slane %v3339_v28, 1 }
 0x1b7   :  { %v916_v58 = vsel %vm908_vm4, %v2839_v18, 8  ;;  %v3363_v33 = vsel %vm1006_vm13, %v1021_v53, %v3189_v17  ;;  %2653 = vset.pattern.permute.xlu0 %v2787_v0  ;;  %vm1090_vm4 = vcmp.eq.s32.totalorder %v1070_v24, 1  ;;  %vm1092_vm8 = vcmp.eq.s32.totalorder %v1078_v32, 1 }
 0x1b8   :  { %v987_v55 = vsel %vm161_vm7, %v916_v58, 2147483647  ;;  %vm982_vm14 = vcmp.lt.s32.totalorder %v980_v47, %v981_v44  ;;  %v1098_v31 = vsel %vm1090_vm4, %v2868_v43, 0.0  ;;  %v1100_v37 = vsel %vm1092_vm8, %v2868_v43, 0.0 }
 0x1b9   :  { %v988_v6 = vrot.slane %v987_v55, 4  ;;  %v983_v12 = vsel %vm982_vm14, %v980_v47, %v981_v44  ;;  %v1122_v5 = vadd.f32 %v1114_v30, %v1098_v31  ;;  %v1124_v42 = vadd.f32 %v1116_v36, %v1100_v37  ;;  %v2702_v36 = vld [vmem:[#allocation3 + $0x24] ss:$0 sm:$0xff] }
 0x1ba   :  { %v984_v61 = vrot.slane %v983_v12, 1  ;;  %vm1380_vm14 = vcmp.ne.s32.totalorder %v1373_v40, 0  ;;  %v1375_v60 = vrot.slane %v3339_v28, 4  ;;  %v1377_v52 = vrot.slane %v3339_v28, 6 }
 0x1bb   :  { %vm989_vm2 = vcmp.lt.s32.totalorder %v987_v55, %v988_v6  ;;  %1414 = vperm.xlu2 %2652, %v1390_v8   ;;  %v1387_v50 = vsel %vm1380_vm14, 1, %v2787_v0  ;;  %v1378_v63 = vrot.slane %v3339_v28, 7  ;;  %v1065_v28 = vpop.permute.xlu1 %1064 }
 0x1bc   :  { %v990_v11 = vsel %vm989_vm2, %v987_v55, %v988_v6  ;;  %vm985_vm13 = vcmp.lt.s32.totalorder %v983_v12, %v984_v61  ;;  %vm1379_vm2 = vcmp.ne.s32.totalorder %v1372_v59, 0 }
 0x1bd   :  { %v991_v17 = vrot.slane %v990_v11, 2  ;;  %v986_v4 = vsel %vm985_vm13, %v983_v12, %v984_v61  ;;  %v1386_v47 = vsel %vm1379_vm2, 1, %v2787_v0  ;;  %vm1382_vm13 = vcmp.ne.s32.totalorder %v1375_v60, 0 }
 0x1be   :  { %2654 = vset.pattern.permute.xlu1 %v2787_v0  ;;  %v1002_v1 = vsel %vm324_vm11, %v986_v4, %v1001_v46  ;;  %1398 = vperm.xlu0 %2653, %v1386_v47   ;;  %v1389_v49 = vsel %vm1382_vm13, 1, %v2787_v0  ;;  %vm1385_vm4 = vcmp.ne.s32.totalorder %v1378_v63, 0  ;;  %v1061_v4 = vpop.permute.xlu0 %1060 }
 0x1bf   :  { %vm992_vm0 = vcmp.lt.s32.totalorder %v990_v11, %v991_v17  ;;  %1402 = vperm.xlu1 %2654, %v1387_v50   ;;  %v1115_v50 = vadd.f32 %v3209_v21, %v2702_v36 }
 0x1c0   :  { %v993_v14 = vsel %vm992_vm0, %v990_v11, %v991_v17  ;;  %vm1384_vm0 = vcmp.ne.s32.totalorder %v1377_v52, 0 }
 0x1c1   :  { %v1132_v9 = vpop.permute.xlu2 %1131  ;;  %v994_v62 = vrot.slane %v993_v14, 1  ;;  %v1391_v6 = vsel %vm1384_vm0, 1, %v2787_v0 }
 0x1c2   :  { %v3372_v3 = vadd.f32 %v1132_v9, %v1119_v10  ;;  %v1392_v10 = vsel %vm1385_vm4, 1, %v2787_v0 }
 0x1c3   :  { %vm995_vm1 = vcmp.lt.s32.totalorder %v993_v14, %v994_v62  ;;  %2655 = vset.pattern.permute.xlu2 %v2839_v18 }
 0x1c4   :  { %v1183_v22 = vsel %vm161_vm7, %v3372_v3, -inf  ;;  %v996_v7 = vsel %vm995_vm1, %v993_v14, %v994_v62  ;;  %v1073_v14 = vpop.permute.xlu1 %1072 }
 0x1c5   :  { %v1184_v13 = vrot.slane %v1183_v22, 4  ;;  %v1003_v16 = vsel %vm326_vm9, %v996_v7, %v1002_v1  ;;  %v1066_v1 = vperm.slane %v1065_v28, 0  ;;  %v1062_v7 = vperm.slane %v1061_v4, 0 }
 0x1c6   :  { %1005 = vst.msk [vmem:[#allocation2 + $0x18] sm:$0xff] %vm161_vm7, %v1003_v16  ;;  %1418 = vperm.xlu0 %2653, %v1391_v6   ;;  %v1074_v32 = vperm.slane %v1073_v14, 0 }
 0x1c7   :  { %v1185_v23 = vmax.f32 %v1183_v22, %v1184_v13  ;;  %1410 = vperm.xlu1 %2654, %v1389_v49   ;;  %vm1089_vm0 = vcmp.eq.s32.totalorder %v1066_v1, 1 }
 0x1c8   :  { %v1097_v31 = vsel %vm1089_vm0, %v2868_v43, 0.0 }
 0x1c9   :  { %v1186_v25 = vrot.slane %v1185_v23, 2 }
 0x1cb   :  { %v1187_v45 = vmax.f32 %v1185_v23, %v1186_v25  ;;  %v2701_v23 = vld [vmem:[#allocation3 + $0xc] ss:$0 sm:$0xff]  ;;  %v1081_v25 = vpop.permute.xlu0 %1080 }
 0x1cc   :  { %v3423_v24 = vpop.permute.xlu1 %1084  ;;  %v1112_v30 = vadd.f32 %v3209_v21, %v2701_v23  ;;  %v1082_v6 = vperm.slane %v1081_v25, 0 }
 0x1cd   :  { %v1188_v27 = vrot.slane %v1187_v45, 1 }
 0x1ce   :  { %2656 = vset.pattern.permute.xlu0 %v2839_v18 }
 0x1cf   :  { %v3381_v29 = vmax.f32 %v1187_v45, %v1188_v27  ;;  %1422 = vperm.xlu1 %2654, %v1392_v10  }
 0x1d1   :  { %1469 = vperm.xlu2 %2655, %v3381_v29   ;;  %vm1239_vm14 = vcmp.eq.f32.partialorder %v3372_v3, %v3381_v29  ;;  %v2700_v3 = vld [vmem:[#allocation3 + $0x14] ss:$0 sm:$0xff] }
 0x1d2   :  { %v1247_v11 = vsel %vm1239_vm14, %v2839_v18, 8  ;;  %v1113_v27 = vadd.f32 %v3209_v21, %v2700_v3  ;;  %vm3429_vm14 = vcmp.eq.s32.totalorder %v1074_v32, 1 }
 0x1d3   :  { %v1255_v9 = vsel %vm161_vm7, %v1247_v11, 2147483647 }
 0x1d4   :  { %v1150_v35 = vpop.permute.xlu2 %1149  ;;  %v1256_v22 = vrot.slane %v1255_v9, 4 }
 0x1d5   :  { %v1178_v57 = vadd.f32 %v1150_v35, %v1122_v5  ;;  %v1121_v35 = vadd.f32 %v1113_v27, %v1097_v31 }
 0x1d6   :  { %vm1257_vm2 = vcmp.lt.s32.totalorder %v1255_v9, %v1256_v22 }
 0x1d7   :  { %v1204_v38 = vsel %vm161_vm7, %v1178_v57, -inf  ;;  %2657 = vset.pattern.permute.xlu1 %v2839_v18  ;;  %v1258_v16 = vsel %vm1257_vm2, %v1255_v9, %v1256_v22  ;;  %v1086_v9 = vperm.slane %v3423_v24, 0 }
 0x1d8   :  { %v1205_v20 = vrot.slane %v1204_v38, 4  ;;  %v1259_v26 = vrot.slane %v1258_v16, 2 }
 0x1da   :  { %v1206_v39 = vmax.f32 %v1204_v38, %v1205_v20  ;;  %vm1260_vm4 = vcmp.lt.s32.totalorder %v1258_v16, %v1259_v26 }
 0x1db   :  { %v1261_v59 = vsel %vm1260_vm4, %v1258_v16, %v1259_v26  ;;  %vm4131_vm4 = vcmp.eq.s32.totalorder %v2824_v2, 6 }
 0x1dc   :  { %v1207_v41 = vrot.slane %v1206_v39, 2  ;;  %v1162_v46 = vpop.permute.xlu2 %1161  ;;  %v3461_v24 = vsel %vm4131_vm4, 1, %v2787_v0 }
 0x1dd   :  { %v3392_v48 = vadd.f32 %v1162_v46, %v1124_v42  ;;  %v1714_v26 = vrot.slane %v3461_v24, 5 }
 0x1de   :  { %v1208_v51 = vmax.f32 %v1206_v39, %v1207_v41  ;;  %v1099_v41 = vsel %vm3429_vm14, %v2868_v43, 0.0  ;;  %vm3465_vm14 = vcmp.eq.s32.totalorder %v1086_v9, 1 }
 0x1df   :  { %v1218_v15 = vsel %vm161_vm7, %v3392_v48, -inf  ;;  %v1123_v63 = vadd.f32 %v1115_v50, %v1099_v41  ;;  %v1102_v41 = vsel %vm3465_vm14, %v2868_v43, 0.0 }
 0x1e0   :  { %v1209_v53 = vrot.slane %v1208_v51, 1  ;;  %v1219_v56 = vrot.slane %v1218_v15, 4 }
 0x1e2   :  { %v3399_v44 = vmax.f32 %v1208_v51, %v1209_v53  ;;  %v1220_v58 = vmax.f32 %v1218_v15, %v1219_v56  ;;  %v1262_v53 = vrot.slane %v1261_v59, 1 }
 0x1e4   :  { %vm1242_vm1 = vcmp.eq.f32.partialorder %v1178_v57, %v3399_v44  ;;  %v1221_v55 = vrot.slane %v1220_v58, 2  ;;  %1487 = vperm.xlu2 %2655, %v3399_v44  }
 0x1e5   :  { %v1250_v17 = vsel %vm1242_vm1, %v2839_v18, 8  ;;  %vm1088_vm1 = vcmp.eq.s32.totalorder %v1062_v7, 1  ;;  %v2703_v7 = vld [vmem:[#allocation3 + $0x34] ss:$0 sm:$0xff] }
 0x1e6   :  { %v1222_v8 = vmax.f32 %v1220_v58, %v1221_v55  ;;  %v1285_v62 = vsel %vm161_vm7, %v1250_v17, 2147483647  ;;  %v1096_v5 = vsel %vm1088_vm1, %v2868_v43, 0.0  ;;  %vm3451_vm1 = vcmp.eq.s32.totalorder %v1082_v6, 1 }
 0x1e7   :  { %v1286_v13 = vrot.slane %v1285_v62, 4  ;;  %v1120_v57 = vadd.f32 %v1112_v30, %v1096_v5  ;;  %v1101_v27 = vsel %vm3451_vm1, %v2868_v43, 0.0  ;;  %v2704_v5 = vld [vmem:[#allocation3 + $0x3c] ss:$0 sm:$0xff]  ;;  %v1117_v36 = vadd.f32 %v3209_v21, %v2703_v7 }
 0x1e8   :  { %v1223_v12 = vrot.slane %v1222_v8, 1  ;;  %v1118_v50 = vadd.f32 %v3209_v21, %v2704_v5 }
 0x1e9   :  { %vm1287_vm13 = vcmp.lt.s32.totalorder %v1285_v62, %v1286_v13 }
 0x1ea   :  { %v3406_v61 = vmax.f32 %v1222_v8, %v1223_v12  ;;  %v1288_v45 = vsel %vm1287_vm13, %v1285_v62, %v1286_v13 }
 0x1eb   :  { %v1289_v34 = vrot.slane %v1288_v45, 2 }
 0x1ec   :  { %vm1244_vm8 = vcmp.eq.f32.partialorder %v3392_v48, %v3406_v61  ;;  %1499 = vperm.xlu2 %2655, %v3406_v61  }
 0x1ed   :  { %vm1290_vm2 = vcmp.lt.s32.totalorder %v1288_v45, %v1289_v34  ;;  %v1252_v42 = vsel %vm1244_vm8, %v2839_v18, 8  ;;  %vm1263_vm8 = vcmp.lt.s32.totalorder %v1261_v59, %v1262_v53 }
 0x1ee   :  { %v1291_v51 = vsel %vm1290_vm2, %v1288_v45, %v1289_v34  ;;  %v1305_v52 = vsel %vm161_vm7, %v1252_v42, 2147483647  ;;  %v3455_v1 = vsel %vm1263_vm8, %v1261_v59, %v1262_v53  ;;  %v1712_v59 = vrot.slane %v3461_v24, 3 }
 0x1ef   :  { %v1292_v49 = vrot.slane %v1291_v51, 1  ;;  %v1306_v55 = vrot.slane %v1305_v52, 4 }
 0x1f0   :  { %vm1719_vm1 = vcmp.ne.s32.totalorder %v1712_v59, 0 }
 0x1f1   :  { %vm1293_vm13 = vcmp.lt.s32.totalorder %v1291_v51, %v1292_v49  ;;  %vm1307_vm0 = vcmp.lt.s32.totalorder %v1305_v52, %v1306_v55  ;;  %v1726_v53 = vsel %vm1719_vm1, 1, %v2787_v0 }
 0x1f2   :  { %v3463_v25 = vsel %vm1293_vm13, %v1291_v51, %v1292_v49  ;;  %v1308_v45 = vsel %vm1307_vm0, %v1305_v52, %v1306_v55  ;;  %v1125_v51 = vadd.f32 %v1117_v36, %v1101_v27 }
 0x1f3   :  { %v1309_v42 = vrot.slane %v1308_v45, 2 }
 0x1f4   :  { %2658 = vset.pattern.permute.xlu2 %v2787_v0 }
 0x1f5   :  { %1732 = vperm.xlu2 %2658, %v3461_v24  }
 0x1fd   :  { %1744 = vperm.xlu2 %2658, %v1726_v53   ;;  %v2706_v53 = vld [vmem:[#allocation3 + $0x1d] ss:$0 sm:$0xff] }
 0x205   :  { %v3444_v48 = vpop.permute.xlu2 %1394 }
 0x20d   :  { %v1144_v38 = vpop.permute.xlu1 %1143  ;;  %v3473_v30 = vpop.permute.xlu2 %1406 }
 0x20e   :  { %v1177_v39 = vadd.f32 %v1144_v38, %v1121_v35 }
 0x210   :  { %v1197_v46 = vsel %vm161_vm7, %v1177_v39, -inf }
 0x211   :  { %v1138_v20 = vpop.permute.xlu0 %1137  ;;  %v1198_v15 = vrot.slane %v1197_v46, 4 }
 0x212   :  { %v1176_v40 = vadd.f32 %v1138_v20, %v1120_v57 }
 0x213   :  { %v1199_v56 = vmax.f32 %v1197_v46, %v1198_v15  ;;  %v1396_v46 = vperm.slane %v3444_v48, 0 }
 0x214   :  { %v1190_v60 = vsel %vm161_vm7, %v1176_v40, -inf }
 0x215   :  { %v1191_v47 = vrot.slane %v1190_v60, 4  ;;  %v1200_v8 = vrot.slane %v1199_v56, 2  ;;  %v1156_v10 = vpop.permute.xlu1 %1155  ;;  %vm3500_vm14 = vcmp.eq.s32.totalorder %v1396_v46, 1 }
 0x216   :  { %v3446_v28 = vadd.f32 %v1156_v10, %v1123_v63  ;;  %v3498_v63 = vpop.permute.xlu2 %1414  ;;  %v1433_v5 = vsel %vm3500_vm14, %v2868_v43, 0.0  ;;  %vm1721_vm14 = vcmp.ne.s32.totalorder %v1714_v26, 0 }
 0x217   :  { %v1192_v58 = vmax.f32 %v1190_v60, %v1191_v47  ;;  %v1201_v11 = vmax.f32 %v1199_v56, %v1200_v8 }
 0x218   :  { %v1211_v14 = vsel %vm161_vm7, %v3446_v28, -inf }
 0x219   :  { %v1193_v12 = vrot.slane %v1192_v58, 2  ;;  %v1202_v62 = vrot.slane %v1201_v11, 1  ;;  %v1212_v13 = vrot.slane %v1211_v14, 4 }
 0x21b   :  { %v1194_v17 = vmax.f32 %v1192_v58, %v1193_v12  ;;  %v1203_v3 = vmax.f32 %v1201_v11, %v1202_v62  ;;  %v1213_v16 = vmax.f32 %v1211_v14, %v1212_v13  ;;  %v1126_v12 = vadd.f32 %v1118_v50, %v1102_v41  ;;  %v2705_v62 = vld [vmem:[#allocation3 + $0x5] ss:$0 sm:$0xff] }
 0x21c   :  { %v1449_v27 = vadd.f32 %v3209_v21, %v2705_v62 }
 0x21d   :  { %v1195_v22 = vrot.slane %v1194_v17, 1  ;;  %vm1241_vm2 = vcmp.eq.f32.partialorder %v1177_v39, %v1203_v3  ;;  %v1214_v32 = vrot.slane %v1213_v16, 2  ;;  %1481 = vperm.xlu1 %2657, %v1203_v3  }
 0x21e   :  { %v1249_v34 = vsel %vm1241_vm2, %v2839_v18, 8  ;;  %vm3492_vm2 = vcmp.lt.s32.totalorder %v1308_v45, %v1309_v42 }
 0x21f   :  { %v1196_v23 = vmax.f32 %v1194_v17, %v1195_v22  ;;  %v1275_v37 = vsel %vm161_vm7, %v1249_v34, 2147483647  ;;  %v1215_v20 = vmax.f32 %v1213_v16, %v1214_v32 }
 0x220   :  { %v1276_v39 = vrot.slane %v1275_v37, 4 }
 0x221   :  { %vm1240_vm8 = vcmp.eq.f32.partialorder %v1176_v40, %v1196_v23  ;;  %v1353_v31 = vsel %vm314_vm15, %v1196_v23, %v3381_v29  ;;  %1475 = vperm.xlu0 %2656, %v1196_v23   ;;  %v1216_v60 = vrot.slane %v1215_v20, 1  ;;  %v1168_v47 = vpop.permute.xlu0 %1167 }
 0x222   :  { %v1248_v35 = vsel %vm1240_vm8, %v2839_v18, 8  ;;  %v1354_v57 = vsel %vm316_vm10, %v1203_v3, %v1353_v31  ;;  %vm1277_vm13 = vcmp.lt.s32.totalorder %v1275_v37, %v1276_v39  ;;  %v3496_v55 = vadd.f32 %v1168_v47, %v1125_v51 }
 0x223   :  { %v1265_v38 = vsel %vm161_vm7, %v1248_v35, 2147483647  ;;  %v1355_v29 = vsel %vm318_vm6, %v3399_v44, %v1354_v57  ;;  %v1278_v52 = vsel %vm1277_vm13, %v1275_v37, %v1276_v39  ;;  %v1217_v15 = vmax.f32 %v1215_v20, %v1216_v60 }
 0x224   :  { %v1266_v40 = vrot.slane %v1265_v38, 4  ;;  %v1279_v58 = vrot.slane %v1278_v52, 2  ;;  %v1225_v11 = vsel %vm161_vm7, %v3496_v55, -inf  ;;  %v1311_v3 = vsel %vm3492_vm2, %v1308_v45, %v1309_v42 }
 0x225   :  { %vm1243_vm8 = vcmp.eq.f32.partialorder %v3446_v28, %v1217_v15  ;;  %v1356_v8 = vsel %vm320_vm3, %v1217_v15, %v1355_v29  ;;  %1493 = vperm.xlu1 %2657, %v1217_v15   ;;  %v1226_v4 = vrot.slane %v1225_v11, 4  ;;  %v1312_v37 = vrot.slane %v1311_v3, 1 }
 0x226   :  { %vm1267_vm0 = vcmp.lt.s32.totalorder %v1265_v38, %v1266_v40  ;;  %vm1280_vm13 = vcmp.lt.s32.totalorder %v1278_v52, %v1279_v58  ;;  %v1251_v10 = vsel %vm1243_vm8, %v2839_v18, 8  ;;  %v1357_v7 = vsel %vm322_vm5, %v3406_v61, %v1356_v8 }
 0x227   :  { %v1268_v44 = vsel %vm1267_vm0, %v1265_v38, %v1266_v40  ;;  %v1281_v17 = vsel %vm1280_vm13, %v1278_v52, %v1279_v58  ;;  %v1295_v14 = vsel %vm161_vm7, %v1251_v10, 2147483647  ;;  %v1227_v23 = vmax.f32 %v1225_v11, %v1226_v4 }
 0x228   :  { %v1269_v49 = vrot.slane %v1268_v44, 2  ;;  %v1282_v22 = vrot.slane %v1281_v17, 1  ;;  %v1296_v28 = vrot.slane %v1295_v14, 4  ;;  %v1174_v16 = vpop.permute.xlu1 %1173  ;;  %v1457_v39 = vadd.f32 %v1449_v27, %v1433_v5 }
 0x229   :  { %v1182_v31 = vadd.f32 %v1174_v16, %v1126_v12  ;;  %v1228_v61 = vrot.slane %v1227_v23, 2  ;;  %v1408_v51 = vperm.slane %v3473_v30, 0 }
 0x22a   :  { %vm1270_vm0 = vcmp.lt.s32.totalorder %v1268_v44, %v1269_v49  ;;  %vm1283_vm1 = vcmp.lt.s32.totalorder %v1281_v17, %v1282_v22  ;;  %vm1297_vm13 = vcmp.lt.s32.totalorder %v1295_v14, %v1296_v28 }
 0x22b   :  { %v1271_v9 = vsel %vm1270_vm0, %v1268_v44, %v1269_v49  ;;  %v1298_v34 = vsel %vm1297_vm13, %v1295_v14, %v1296_v28  ;;  %v1284_v35 = vsel %vm1283_vm1, %v1281_v17, %v1282_v22  ;;  %v1232_v36 = vsel %vm161_vm7, %v1182_v31, -inf  ;;  %v1470_v29 = vpop.permute.xlu2 %1469 }
 0x22c   :  { %v1272_v13 = vrot.slane %v1271_v9, 1  ;;  %v1299_v57 = vrot.slane %v1298_v34, 2  ;;  %v1229_v38 = vmax.f32 %v1227_v23, %v1228_v61  ;;  %v1233_v20 = vrot.slane %v1232_v36, 4 }
 0x22d   :  { %v3526_v60 = vadd.f32 %v1470_v29, %v1457_v39  ;;  %vm1313_vm0 = vcmp.lt.s32.totalorder %v1311_v3, %v1312_v37  ;;  %vm3537_vm13 = vcmp.eq.s32.totalorder %v1408_v51, 1 }
 0x22e   :  { %vm1273_vm8 = vcmp.lt.s32.totalorder %v1271_v9, %v1272_v13  ;;  %vm1300_vm2 = vcmp.lt.s32.totalorder %v1298_v34, %v1299_v57  ;;  %v1230_v59 = vrot.slane %v1229_v38, 1  ;;  %v1234_v41 = vmax.f32 %v1232_v36, %v1233_v20 }
 0x22f   :  { %v1274_v32 = vsel %vm1273_vm8, %v1271_v9, %v1272_v13  ;;  %v1301_v40 = vsel %vm1300_vm2, %v1298_v34, %v1299_v57  ;;  %v1314_v56 = vsel %vm1313_vm0, %v1311_v3, %v1312_v37  ;;  %vm1344_vm2 = vcmp.eq.s32.totalorder %v3327_v54, 1  ;;  %v3545_v9 = vld [vmem:[%s4120_s1] sm:$0xff] }
 0x230   :  { %v1335_v45 = vsel %vm314_vm15, %v1274_v32, %v3455_v1  ;;  %v1728_v1 = vsel %vm1721_vm14, 1, %v2787_v0  ;;  %v1302_v46 = vrot.slane %v1301_v40, 1  ;;  %v1231_v50 = vmax.f32 %v1229_v38, %v1230_v59  ;;  %v2707_v32 = vld [vmem:[#allocation3 + $0x2d] ss:$0 sm:$0xff] }
 0x231   :  { %v1336_v21 = vsel %vm316_vm10, %v1284_v35, %v1335_v45  ;;  %1752 = vperm.xlu2 %2658, %v1728_v1   ;;  %v1235_v52 = vrot.slane %v1234_v41, 2  ;;  %v1452_v14 = vadd.f32 %v3545_v9, %v2706_v53  ;;  %v1436_v4 = vsel %vm3537_vm13, %v2868_v43, 0.0 }
 0x232   :  { %v1337_v42 = vsel %vm318_vm6, %v3463_v25, %v1336_v21  ;;  %vm1303_vm1 = vcmp.lt.s32.totalorder %v1301_v40, %v1302_v46  ;;  %v1521_v25 = vsel %vm161_vm7, %v3526_v60, -inf  ;;  %vm1245_vm8 = vcmp.eq.f32.partialorder %v3496_v55, %v1231_v50  ;;  %1505 = vperm.xlu0 %2656, %v1231_v50  }
 0x233   :  { %v1304_v44 = vsel %vm1303_vm1, %v1301_v40, %v1302_v46  ;;  %v1358_v15 = vsel %vm324_vm11, %v1231_v50, %v1357_v7  ;;  %v1236_v47 = vmax.f32 %v1234_v41, %v1235_v52  ;;  %v1253_v49 = vsel %vm1245_vm8, %v2839_v18, 8 }
 0x234   :  { %v1338_v58 = vsel %vm320_vm3, %v1304_v44, %v1337_v42  ;;  %v1522_v6 = vrot.slane %v1521_v25, 4  ;;  %v1315_v30 = vsel %vm161_vm7, %v1253_v49, 2147483647  ;;  %v1416_v13 = vperm.slane %v3498_v63, 0 }
 0x235   :  { %v1339_v8 = vsel %vm322_vm5, %v1314_v56, %v1338_v58  ;;  %v1237_v55 = vrot.slane %v1236_v47, 1  ;;  %v1316_v10 = vrot.slane %v1315_v30, 4  ;;  %v1460_v27 = vadd.f32 %v1452_v14, %v1436_v4 }
 0x236   :  { %v1523_v11 = vmax.f32 %v1521_v25, %v1522_v6  ;;  %vm3562_vm8 = vcmp.eq.s32.totalorder %v1416_v13, 1  ;;  %v1454_v57 = vadd.f32 %v3545_v9, %v2707_v32  ;;  %v1711_v59 = vrot.slane %v3461_v24, 2 }
 0x237   :  { %v1238_v17 = vmax.f32 %v1236_v47, %v1237_v55  ;;  %vm1317_vm14 = vcmp.lt.s32.totalorder %v1315_v30, %v1316_v10  ;;  %v1438_v37 = vsel %vm3562_vm8, %v2868_v43, 0.0  ;;  %v1713_v46 = vrot.slane %v3461_v24, 4 }
 0x238   :  { %v1524_v62 = vrot.slane %v1523_v11, 2  ;;  %v1318_v22 = vsel %vm1317_vm14, %v1315_v30, %v1316_v10  ;;  %v1462_v29 = vadd.f32 %v1454_v57, %v1438_v37  ;;  %v1716_v10 = vrot.slane %v3461_v24, 7 }
 0x239   :  { %2661 = vset.pattern.permute.xlu2 %v2839_v18  ;;  %vm1246_vm0 = vcmp.eq.f32.partialorder %v1182_v31, %v1238_v17  ;;  %1511 = vperm.xlu1 %2657, %v1238_v17   ;;  %v1359_v28 = vsel %vm326_vm9, %v1238_v17, %v1358_v15  ;;  %v1319_v7 = vrot.slane %v1318_v22, 2  ;;  %vm1720_vm8 = vcmp.ne.s32.totalorder %v1713_v46, 0 }
 0x23a   :  { %v1254_v3 = vsel %vm1246_vm0, %v2839_v18, 8  ;;  %v1525_v23 = vmax.f32 %v1523_v11, %v1524_v62  ;;  %v3558_v16 = vsel %vm1344_vm2, %v1359_v28, %v3363_v33  ;;  %2659 = vset.pattern.permute.xlu0 %v2787_v0  ;;  %v1727_v6 = vsel %vm1720_vm8, 1, %v2787_v0 }
 0x23b   :  { %v1325_v26 = vsel %vm161_vm7, %v1254_v3, 2147483647  ;;  %vm1320_vm1 = vcmp.lt.s32.totalorder %v1318_v22, %v1319_v7  ;;  %v1710_v14 = vrot.slane %v3461_v24, 1  ;;  %v1715_v13 = vrot.slane %v3461_v24, 6 }
 0x23c   :  { %v1326_v63 = vrot.slane %v1325_v26, 4  ;;  %v1526_v31 = vrot.slane %v1525_v23, 1  ;;  %v1321_v5 = vsel %vm1320_vm1, %v1318_v22, %v1319_v7  ;;  %vm1718_vm1 = vcmp.ne.s32.totalorder %v1711_v59, 0  ;;  %v1403_v7 = vpop.permute.xlu1 %1402 }
 0x23d   :  { %v1322_v61 = vrot.slane %v1321_v5, 1  ;;  %v1725_v25 = vsel %vm1718_vm1, 1, %v2787_v0  ;;  %vm1722_vm1 = vcmp.ne.s32.totalorder %v1715_v13, 0 }
 0x23e   :  { %vm1327_vm13 = vcmp.lt.s32.totalorder %v1325_v26, %v1326_v63  ;;  %v3566_v35 = vmax.f32 %v1525_v23, %v1526_v31  ;;  %v1488_v54 = vpop.permute.xlu2 %1487  ;;  %v1729_v28 = vsel %vm1722_vm1, 1, %v2787_v0 }
 0x23f   :  { %v1328_v33 = vsel %vm1327_vm13, %v1325_v26, %v1326_v63  ;;  %v3568_v45 = vadd.f32 %v1488_v54, %v1460_v27  ;;  %vm1323_vm2 = vcmp.lt.s32.totalorder %v1321_v5, %v1322_v61  ;;  %vm4132_vm13 = vcmp.eq.s32.totalorder %v2824_v2, 7  ;;  %v1399_v63 = vpop.permute.xlu0 %1398 }
 0x240   :  { %v1329_v36 = vrot.slane %v1328_v33, 2  ;;  %v1324_v42 = vsel %vm1323_vm2, %v1321_v5, %v1322_v61  ;;  %vm1723_vm2 = vcmp.ne.s32.totalorder %v1716_v10, 0  ;;  %v3601_v17 = vsel %vm4132_vm13, 1, %v2787_v0 }
 0x241   :  { %1807 = vperm.xlu2 %2661, %v3566_v35   ;;  %v1542_v21 = vsel %vm161_vm7, %v3568_v45, -inf  ;;  %2660 = vset.pattern.permute.xlu1 %v2787_v0  ;;  %v1340_v50 = vsel %vm324_vm11, %v1324_v42, %v1339_v8  ;;  %v1730_v11 = vsel %vm1723_vm2, 1, %v2787_v0  ;;  %v2050_v4 = vrot.slane %v3601_v17, 3 }
 0x242   :  { %vm1330_vm14 = vcmp.lt.s32.totalorder %v1328_v33, %v1329_v36  ;;  %v1543_v38 = vrot.slane %v1542_v21, 4  ;;  %1740 = vperm.xlu1 %2660, %v1725_v25   ;;  %vm1577_vm8 = vcmp.eq.f32.partialorder %v3526_v60, %v3566_v35  ;;  %v1404_v60 = vperm.slane %v1403_v7, 0 }
 0x243   :  { %v1331_v20 = vsel %vm1330_vm14, %v1328_v33, %v1329_v36  ;;  %vm1717_vm14 = vcmp.ne.s32.totalorder %v1710_v14, 0  ;;  %v1585_v3 = vsel %vm1577_vm8, %v2839_v18, 8  ;;  %v1400_v34 = vperm.slane %v1399_v63, 0  ;;  %v2708_v33 = vld [vmem:[#allocation3 + $0x15] ss:$0 sm:$0xff] }
 0x244   :  { %v1332_v39 = vrot.slane %v1331_v20, 1  ;;  %v1544_v40 = vmax.f32 %v1542_v21, %v1543_v38  ;;  %v1724_v62 = vsel %vm1717_vm14, 1, %v2787_v0  ;;  %v1593_v26 = vsel %vm161_vm7, %v1585_v3, 2147483647  ;;  %v1411_v32 = vpop.permute.xlu1 %1410 }
 0x245   :  { %1736 = vperm.xlu0 %2659, %v1724_v62   ;;  %v1594_v31 = vrot.slane %v1593_v26, 4  ;;  %vm1427_vm8 = vcmp.eq.s32.totalorder %v1404_v60, 1  ;;  %v1412_v59 = vperm.slane %v1411_v32, 0  ;;  %v2052_v25 = vrot.slane %v3601_v17, 5 }
 0x246   :  { %vm1333_vm0 = vcmp.lt.s32.totalorder %v1331_v20, %v1332_v39  ;;  %v1545_v41 = vrot.slane %v1544_v40, 2  ;;  %v1500_v1 = vpop.permute.xlu2 %1499 }
 0x247   :  { %v1334_v51 = vsel %vm1333_vm0, %v1331_v20, %v1332_v39  ;;  %v3581_v52 = vadd.f32 %v1500_v1, %v1462_v29  ;;  %vm2057_vm0 = vcmp.ne.s32.totalorder %v2050_v4, 0  ;;  %vm1595_vm14 = vcmp.lt.s32.totalorder %v1593_v26, %v1594_v31  ;;  %v3627_v37 = vpop.permute.xlu0 %1418 }
 0x248   :  { %v1341_v44 = vsel %vm326_vm9, %v1334_v51, %v1340_v50  ;;  %v1546_v15 = vmax.f32 %v1544_v40, %v1545_v41  ;;  %v2064_v22 = vsel %vm2057_vm0, 1, %v2787_v0  ;;  %v1596_v61 = vsel %vm1595_vm14, %v1593_v26, %v1594_v31 }
 0x249   :  { %1343 = vst.msk [vmem:[#allocation2 + $0x20] sm:$0xff] %vm161_vm7, %v1341_v44  ;;  %v1556_v47 = vsel %vm161_vm7, %v3581_v52, -inf  ;;  %v1597_v21 = vrot.slane %v1596_v61, 2  ;;  %v1451_v20 = vadd.f32 %v3545_v9, %v2708_v33  ;;  %v1435_v39 = vsel %vm1427_vm8, %v2868_v43, 0.0  ;;  %v2710_v44 = vld [vmem:[#allocation3 + $0x6] ss:$0 sm:$0xff] }
 0x24a   :  { %v1547_v53 = vrot.slane %v1546_v15, 1  ;;  %v1557_v56 = vrot.slane %v1556_v47, 4  ;;  %1748 = vperm.xlu1 %2660, %v1727_v6  }
 0x24b   :  { %vm1598_vm14 = vcmp.lt.s32.totalorder %v1596_v61, %v1597_v21  ;;  %v1459_v46 = vadd.f32 %v1451_v20, %v1435_v39 }
 0x24c   :  { %v3588_v58 = vmax.f32 %v1546_v15, %v1547_v53  ;;  %v1558_v49 = vmax.f32 %v1556_v47, %v1557_v56  ;;  %v3625_v36 = vpop.permute.xlu1 %1422  ;;  %v2711_v15 = vld [vmem:[#allocation3 + $0x25] ss:$0 sm:$0xff]  ;;  %v1599_v47 = vsel %vm1598_vm14, %v1596_v61, %v1597_v21  ;;  %v1420_v61 = vperm.slane %v3627_v37, 0  ;;  %v2712_v37 = vld [vmem:[#allocation3 + $0x35] ss:$0 sm:$0xff] }
 0x24d   :  { %1756 = vperm.xlu0 %2659, %v1729_v28   ;;  %v1453_v13 = vadd.f32 %v3545_v9, %v2711_v15  ;;  %v1600_v28 = vrot.slane %v1599_v47, 1  ;;  %v1424_v20 = vperm.slane %v3625_v36, 0 }
 0x24e   :  { %v1559_v30 = vrot.slane %v1558_v49, 2  ;;  %1825 = vperm.xlu2 %2661, %v3588_v58   ;;  %vm1580_vm2 = vcmp.eq.f32.partialorder %v3568_v45, %v3588_v58  ;;  %v2709_v45 = vld [vmem:[#allocation3 + $0xd] ss:$0 sm:$0xff] }
 0x24f   :  { %v1588_v23 = vsel %vm1580_vm2, %v2839_v18, 8  ;;  %v3620_v24 = vpop.permute.xlu2 %1732  ;;  %vm1426_vm2 = vcmp.eq.s32.totalorder %v1400_v34, 1  ;;  %v1450_v29 = vadd.f32 %v3545_v9, %v2709_v45 }
 0x250   :  { %v1560_v8 = vmax.f32 %v1558_v49, %v1559_v30  ;;  %v1623_v27 = vsel %vm161_vm7, %v1588_v23, 2147483647  ;;  %v1434_v40 = vsel %vm1426_vm2, %v2868_v43, 0.0  ;;  %v1734_v41 = vperm.slane %v3620_v24, 0 }
 0x251   :  { %v1624_v5 = vrot.slane %v1623_v27, 4  ;;  %v1458_v50 = vadd.f32 %v1450_v29, %v1434_v40  ;;  %vm2059_vm2 = vcmp.ne.s32.totalorder %v2052_v25, 0 }
 0x252   :  { %v1561_v12 = vrot.slane %v1560_v8, 1  ;;  %1760 = vperm.xlu1 %2660, %v1730_v11   ;;  %vm3645_vm8 = vcmp.eq.s32.totalorder %v1734_v41, 1  ;;  %v2066_v14 = vsel %vm2059_vm2, 1, %v2787_v0 }
 0x253   :  { %vm1625_vm0 = vcmp.lt.s32.totalorder %v1623_v27, %v1624_v5  ;;  %v1771_v23 = vsel %vm3645_vm8, %v2868_v43, 0.0  ;;  %vm3695_vm8 = vcmp.eq.s32.totalorder %v1424_v20, 1 }
 0x254   :  { %v3592_v55 = vmax.f32 %v1560_v8, %v1561_v12  ;;  %v1626_v57 = vsel %vm1625_vm0, %v1623_v27, %v1624_v5  ;;  %v1455_v8 = vadd.f32 %v3545_v9, %v2712_v37 }
 0x255   :  { %2662 = vset.pattern.permute.xlu0 %v2839_v18  ;;  %v1627_v38 = vrot.slane %v1626_v57, 2 }
 0x256   :  { %1837 = vperm.xlu2 %2661, %v3592_v55   ;;  %vm1582_vm1 = vcmp.eq.f32.partialorder %v3581_v52, %v3592_v55 }
 0x257   :  { %v3623_v54 = vpop.permute.xlu2 %1744  ;;  %v1590_v42 = vsel %vm1582_vm1, %v2839_v18, 8  ;;  %vm1628_vm0 = vcmp.lt.s32.totalorder %v1626_v57, %v1627_v38  ;;  %vm3641_vm1 = vcmp.eq.s32.totalorder %v1412_v59, 1 }
 0x258   :  { %v1643_v1 = vsel %vm161_vm7, %v1590_v42, 2147483647  ;;  %v1629_v6 = vsel %vm1628_vm0, %v1626_v57, %v1627_v38  ;;  %v1437_v3 = vsel %vm3641_vm1, %v2868_v43, 0.0  ;;  %vm3660_vm0 = vcmp.lt.s32.totalorder %v1599_v47, %v1600_v28 }
 0x259   :  { %v1644_v12 = vrot.slane %v1643_v1, 4  ;;  %v1630_v7 = vrot.slane %v1629_v6, 1  ;;  %v1461_v5 = vadd.f32 %v1453_v13, %v1437_v3  ;;  %v1746_v29 = vperm.slane %v3623_v54, 0 }
 0x25a   :  { %2663 = vset.pattern.permute.xlu1 %v2839_v18  ;;  %vm3689_vm1 = vcmp.eq.s32.totalorder %v1420_v61, 1  ;;  %v1440_v3 = vsel %vm3695_vm8, %v2868_v43, 0.0 }
 0x25b   :  { %vm1645_vm14 = vcmp.lt.s32.totalorder %v1643_v1, %v1644_v12  ;;  %vm3664_vm2 = vcmp.lt.s32.totalorder %v1629_v6, %v1630_v7 }
 0x25c   :  { %v3669_v45 = vsel %vm1645_vm14, %v1643_v1, %v1644_v12  ;;  %v3682_v1 = vsel %vm3660_vm0, %v1599_v47, %v1600_v28  ;;  %v3686_v36 = vsel %vm3664_vm2, %v1629_v6, %v1630_v7  ;;  %vm3699_vm14 = vcmp.eq.s32.totalorder %v1746_v29, 1  ;;  %v2714_v12 = vld [vmem:[#allocation3 + $0x1e] ss:$0 sm:$0xff] }
 0x25d   :  { %v1647_v54 = vrot.slane %v3669_v45, 2 }
 0x25e   :  { %2664 = vset.pattern.permute.xlu2 %v2787_v0 }
 0x25f   :  { %2070 = vperm.xlu2 %2664, %v3601_v17   ;;  %vm3717_vm12 = vcmp.lt.s32.totalorder %v3669_v45, %v1647_v54 }
 0x267   :  { %2082 = vperm.xlu2 %2664, %v2064_v22   ;;  %v1787_v22 = vadd.f32 %v3545_v9, %v2710_v44 }
 0x269   :  { %v1795_v31 = vadd.f32 %v1787_v22, %v1771_v23  ;;  %v1774_v23 = vsel %vm3699_vm14, %v2868_v43, 0.0 }
 0x26f   :  { %2090 = vperm.xlu2 %2664, %v2066_v14  }
 0x277   :  { %2667 = vset.pattern.permute.xlu2 %v2839_v18 }
 0x28b   :  { %v3639_v53 = vpop.permute.xlu2 %1752 }
 0x28f   :  { %v1482_v51 = vpop.permute.xlu1 %1481 }
 0x290   :  { %v1515_v56 = vadd.f32 %v1482_v51, %v1459_v46 }
 0x292   :  { %v1535_v10 = vsel %vm161_vm7, %v1515_v56, -inf }
 0x293   :  { %v1476_v52 = vpop.permute.xlu0 %1475  ;;  %v1536_v4 = vrot.slane %v1535_v10, 4 }
 0x294   :  { %v1514_v49 = vadd.f32 %v1476_v52, %v1458_v50 }
 0x295   :  { %v1537_v26 = vmax.f32 %v1535_v10, %v1536_v4 }
 0x296   :  { %v1528_v11 = vsel %vm161_vm7, %v1514_v49, -inf }
 0x297   :  { %v1529_v62 = vrot.slane %v1528_v11, 4  ;;  %v1538_v32 = vrot.slane %v1537_v26, 2  ;;  %v1494_v33 = vpop.permute.xlu1 %1493 }
 0x298   :  { %v3671_v38 = vadd.f32 %v1494_v33, %v1461_v5 }
 0x299   :  { %v1530_v27 = vmax.f32 %v1528_v11, %v1529_v62  ;;  %v1539_v57 = vmax.f32 %v1537_v26, %v1538_v32  ;;  %v1790_v32 = vadd.f32 %v3545_v9, %v2714_v12 }
 0x29a   :  { %v1549_v41 = vsel %vm161_vm7, %v3671_v38, -inf }
 0x29b   :  { %v1531_v63 = vrot.slane %v1530_v27, 2  ;;  %v1808_v42 = vpop.permute.xlu2 %1807  ;;  %v1540_v39 = vrot.slane %v1539_v57, 1  ;;  %v1550_v46 = vrot.slane %v1549_v41, 4 }
 0x29c   :  { %v3675_v59 = vadd.f32 %v1808_v42, %v1795_v31  ;;  %v1754_v42 = vperm.slane %v3639_v53, 0  ;;  %v2715_v53 = vld [vmem:[#allocation3 + $0x2e] ss:$0 sm:$0xff] }
 0x29d   :  { %v1532_v21 = vmax.f32 %v1530_v27, %v1531_v63  ;;  %v1541_v51 = vmax.f32 %v1539_v57, %v1540_v39  ;;  %v1551_v6 = vmax.f32 %v1549_v41, %v1550_v46  ;;  %v2713_v27 = vld [vmem:[#allocation3 + $0x3d] ss:$0 sm:$0xff]  ;;  %v1798_v41 = vadd.f32 %v1790_v32, %v1774_v23 }
 0x29e   :  { %v1859_v25 = vsel %vm161_vm7, %v3675_v59, -inf }
 0x29f   :  { %v1533_v40 = vrot.slane %v1532_v21, 1  ;;  %v1860_v47 = vrot.slane %v1859_v25, 4  ;;  %vm1579_vm0 = vcmp.eq.f32.partialorder %v1515_v56, %v1541_v51  ;;  %1819 = vperm.xlu1 %2663, %v1541_v51   ;;  %v1439_v56 = vsel %vm3689_vm1, %v2868_v43, 0.0 }
 0x2a0   :  { %v1587_v10 = vsel %vm1579_vm0, %v2839_v18, 8  ;;  %v1552_v62 = vrot.slane %v1551_v6, 2  ;;  %v1463_v31 = vadd.f32 %v1455_v8, %v1439_v56 }
 0x2a1   :  { %v1534_v52 = vmax.f32 %v1532_v21, %v1533_v40  ;;  %v1861_v4 = vmax.f32 %v1859_v25, %v1860_v47  ;;  %v1456_v40 = vadd.f32 %v3545_v9, %v2713_v27  ;;  %v1649_v25 = vsel %vm3717_vm12, %v3669_v45, %v1647_v54 }
 0x2a2   :  { %v1553_v26 = vmax.f32 %v1551_v6, %v1552_v62 }
 0x2a3   :  { %vm1578_vm2 = vcmp.eq.f32.partialorder %v1514_v49, %v1534_v52  ;;  %v1691_v30 = vsel %vm314_vm15, %v1534_v52, %v3566_v35  ;;  %1813 = vperm.xlu0 %2662, %v1534_v52   ;;  %v1613_v49 = vsel %vm161_vm7, %v1587_v10, 2147483647  ;;  %v1862_v7 = vrot.slane %v1861_v4, 2 }
 0x2a4   :  { %v1586_v11 = vsel %vm1578_vm2, %v2839_v18, 8  ;;  %v1692_v14 = vsel %vm316_vm10, %v1541_v51, %v1691_v30  ;;  %v1614_v13 = vrot.slane %v1613_v49, 4  ;;  %v1554_v34 = vrot.slane %v1553_v26, 1  ;;  %v1506_v33 = vpop.permute.xlu0 %1505 }
 0x2a5   :  { %v1603_v35 = vsel %vm161_vm7, %v1586_v11, 2147483647  ;;  %v1863_v63 = vmax.f32 %v1861_v4, %v1862_v7  ;;  %v1693_v61 = vsel %vm318_vm6, %v3588_v58, %v1692_v14  ;;  %v3730_v29 = vadd.f32 %v1506_v33, %v1463_v31 }
 0x2a6   :  { %v1604_v28 = vrot.slane %v1603_v35, 4  ;;  %vm1615_vm1 = vcmp.lt.s32.totalorder %v1613_v49, %v1614_v13  ;;  %v1555_v39 = vmax.f32 %v1553_v26, %v1554_v34  ;;  %v1464_v30 = vadd.f32 %v1456_v40, %v1440_v3 }
 0x2a7   :  { %v1616_v5 = vsel %vm1615_vm1, %v1613_v49, %v1614_v13  ;;  %v1864_v20 = vrot.slane %v1863_v63, 1  ;;  %v1563_v46 = vsel %vm161_vm7, %v3730_v29, -inf  ;;  %vm3752_vm1 = vcmp.eq.s32.totalorder %v1754_v42, 1 }
 0x2a8   :  { %vm1605_vm0 = vcmp.lt.s32.totalorder %v1603_v35, %v1604_v28  ;;  %v1617_v57 = vrot.slane %v1616_v5, 2  ;;  %v1826_v58 = vpop.permute.xlu2 %1825  ;;  %vm1581_vm2 = vcmp.eq.f32.partialorder %v3671_v38, %v1555_v39  ;;  %v3740_v52 = vsel %vm320_vm3, %v1555_v39, %v1693_v61  ;;  %1831 = vperm.xlu1 %2663, %v1555_v39  }
 0x2a9   :  { %v1606_v60 = vsel %vm1605_vm0, %v1603_v35, %v1604_v28  ;;  %v3734_v37 = vmax.f32 %v1863_v63, %v1864_v20  ;;  %v1589_v47 = vsel %vm1581_vm2, %v2839_v18, 8  ;;  %v1564_v38 = vrot.slane %v1563_v46, 4 }
 0x2aa   :  { %v1607_v21 = vrot.slane %v1606_v60, 2  ;;  %vm1618_vm8 = vcmp.lt.s32.totalorder %v1616_v5, %v1617_v57  ;;  %v1633_v6 = vsel %vm161_vm7, %v1589_v47, 2147483647  ;;  %v3750_v12 = vadd.f32 %v1826_v58, %v1798_v41 }
 0x2ab   :  { %v1619_v50 = vsel %vm1618_vm8, %v1616_v5, %v1617_v57  ;;  %2145 = vperm.xlu2 %2667, %v3734_v37   ;;  %v1512_v8 = vpop.permute.xlu1 %1511  ;;  %v1634_v45 = vrot.slane %v1633_v6, 4  ;;  %v1565_v14 = vmax.f32 %v1563_v46, %v1564_v38  ;;  %v1792_v4 = vadd.f32 %v3545_v9, %v2715_v53 }
 0x2ac   :  { %vm1608_vm14 = vcmp.lt.s32.totalorder %v1606_v60, %v1607_v21  ;;  %v1620_v44 = vrot.slane %v1619_v50, 1  ;;  %v1520_v49 = vadd.f32 %v1512_v8, %v1464_v30  ;;  %v1880_v35 = vsel %vm161_vm7, %v3750_v12, -inf }
 0x2ad   :  { %v1609_v51 = vsel %vm1608_vm14, %v1606_v60, %v1607_v21  ;;  %vm1635_vm12 = vcmp.lt.s32.totalorder %v1633_v6, %v1634_v45  ;;  %v1776_v62 = vsel %vm3752_vm1, %v2868_v43, 0.0  ;;  %v1566_v28 = vrot.slane %v1565_v14, 2 }
 0x2ae   :  { %v1610_v15 = vrot.slane %v1609_v51, 1  ;;  %vm1621_vm0 = vcmp.lt.s32.totalorder %v1619_v50, %v1620_v44  ;;  %v1636_v13 = vsel %vm1635_vm12, %v1633_v6, %v1634_v45  ;;  %v1570_v23 = vsel %vm161_vm7, %v1520_v49, -inf }
 0x2af   :  { %v1622_v54 = vsel %vm1621_vm0, %v1619_v50, %v1620_v44  ;;  %v1637_v7 = vrot.slane %v1636_v13, 2  ;;  %v1567_v26 = vmax.f32 %v1565_v14, %v1566_v28  ;;  %v1571_v27 = vrot.slane %v1570_v23, 4 }
 0x2b0   :  { %vm1611_vm8 = vcmp.lt.s32.totalorder %v1609_v51, %v1610_v15  ;;  %v1881_v32 = vrot.slane %v1880_v35, 4  ;;  %v1838_v63 = vpop.permute.xlu2 %1837  ;;  %v1800_v31 = vadd.f32 %v1792_v4, %v1776_v62  ;;  %v1695_v4 = vsel %vm322_vm5, %v3592_v55, %v3740_v52 }
 0x2b1   :  { %v1612_v11 = vsel %vm1611_vm8, %v1609_v51, %v1610_v15  ;;  %vm1638_vm14 = vcmp.lt.s32.totalorder %v1636_v13, %v1637_v7  ;;  %v1568_v60 = vrot.slane %v1567_v26, 1  ;;  %v1572_v34 = vmax.f32 %v1570_v23, %v1571_v27 }
 0x2b2   :  { %v1673_v56 = vsel %vm314_vm15, %v1612_v11, %v3682_v1  ;;  %v1650_v1 = vrot.slane %v1649_v25, 1  ;;  %v1639_v5 = vsel %vm1638_vm14, %v1636_v13, %v1637_v7  ;;  %v1882_v33 = vmax.f32 %v1880_v35, %v1881_v32 }
 0x2b3   :  { %v1674_v22 = vsel %vm316_vm10, %v1622_v54, %v1673_v56  ;;  %v1640_v61 = vrot.slane %v1639_v5, 1  ;;  %v3768_v57 = vadd.f32 %v1838_v63, %v1800_v31  ;;  %v1569_v21 = vmax.f32 %v1567_v26, %v1568_v60 }
 0x2b4   :  { %v1675_v3 = vsel %vm318_vm6, %v3686_v36, %v1674_v22  ;;  %vm1651_vm2 = vcmp.lt.s32.totalorder %v1649_v25, %v1650_v1  ;;  %v1573_v20 = vrot.slane %v1572_v34, 2  ;;  %v1883_v36 = vrot.slane %v1882_v33, 2  ;;  %v1741_v31 = vpop.permute.xlu1 %1740 }
 0x2b5   :  { %vm1641_vm1 = vcmp.lt.s32.totalorder %v1639_v5, %v1640_v61  ;;  %v1894_v42 = vsel %vm161_vm7, %v3768_v57, -inf  ;;  %vm1583_vm0 = vcmp.eq.f32.partialorder %v3730_v29, %v1569_v21  ;;  %1843 = vperm.xlu0 %2662, %v1569_v21   ;;  %v1652_v41 = vsel %vm1651_vm2, %v1649_v25, %v1650_v1 }
 0x2b6   :  { %v1642_v39 = vsel %vm1641_vm1, %v1639_v5, %v1640_v61  ;;  %v1574_v40 = vmax.f32 %v1572_v34, %v1573_v20  ;;  %v1591_v58 = vsel %vm1583_vm0, %v2839_v18, 8  ;;  %v1884_v50 = vmax.f32 %v1882_v33, %v1883_v36  ;;  %v2718_v36 = vld [vmem:[#allocation3 + $0x16] ss:$0 sm:$0xff] }
 0x2b7   :  { %v1676_v46 = vsel %vm320_vm3, %v1642_v39, %v1675_v3  ;;  %v1653_v51 = vsel %vm161_vm7, %v1591_v58, 2147483647  ;;  %v1895_v15 = vrot.slane %v1894_v42, 4  ;;  %v2049_v25 = vrot.slane %v3601_v17, 2  ;;  %v1737_v33 = vpop.permute.xlu0 %1736  ;;  %v2720_v58 = vld [vmem:[#allocation3 + $0xe] ss:$0 sm:$0xff] }
 0x2b8   :  { %v1677_v53 = vsel %vm322_vm5, %v1652_v41, %v1676_v46  ;;  %v1575_v44 = vrot.slane %v1574_v40, 1  ;;  %v1654_v47 = vrot.slane %v1653_v51, 4  ;;  %v1885_v6 = vrot.slane %v1884_v50, 1 }
 0x2b9   :  { %v1896_v30 = vmax.f32 %v1894_v42, %v1895_v15  ;;  %vm2056_vm2 = vcmp.ne.s32.totalorder %v2049_v25, 0  ;;  %vm1682_vm1 = vcmp.eq.s32.totalorder %v3444_v48, 1  ;;  %v2051_v32 = vrot.slane %v3601_v17, 4 }
 0x2ba   :  { %v1576_v38 = vmax.f32 %v1574_v40, %v1575_v44  ;;  %vm1655_vm8 = vcmp.lt.s32.totalorder %v1653_v51, %v1654_v47  ;;  %v3777_v29 = vmax.f32 %v1884_v50, %v1885_v6  ;;  %v2063_v55 = vsel %vm2056_vm2, 1, %v2787_v0 }
 0x2bb   :  { %v1656_v8 = vsel %vm1655_vm8, %v1653_v51, %v1654_v47  ;;  %v1897_v10 = vrot.slane %v1896_v30, 2  ;;  %vm2058_vm2 = vcmp.ne.s32.totalorder %v2051_v32, 0  ;;  %v2054_v5 = vrot.slane %v3601_v17, 7 }
 0x2bc   :  { %vm1584_vm12 = vcmp.eq.f32.partialorder %v1520_v49, %v1576_v38  ;;  %1849 = vperm.xlu1 %2663, %v1576_v38   ;;  %v1657_v45 = vrot.slane %v1656_v8, 2  ;;  %2163 = vperm.xlu2 %2667, %v3777_v29   ;;  %v1696_v49 = vsel %vm324_vm11, %v1569_v21, %v1695_v4  ;;  %v2065_v63 = vsel %vm2058_vm2, 1, %v2787_v0  ;;  %v1749_v60 = vpop.permute.xlu1 %1748 }
 0x2bd   :  { %v1592_v54 = vsel %vm1584_vm12, %v2839_v18, 8  ;;  %v1898_v14 = vmax.f32 %v1896_v30, %v1897_v10  ;;  %2665 = vset.pattern.permute.xlu0 %v2787_v0  ;;  %v1697_v22 = vsel %vm326_vm9, %v1576_v38, %v1696_v49  ;;  %v2048_v61 = vrot.slane %v3601_v17, 1  ;;  %v2721_v30 = vld [vmem:[#allocation3 + $0x26] ss:$0 sm:$0xff] }
 0x2be   :  { %v1663_v11 = vsel %vm161_vm7, %v1592_v54, 2147483647  ;;  %vm1658_vm14 = vcmp.lt.s32.totalorder %v1656_v8, %v1657_v45  ;;  %v3791_v28 = vsel %vm1682_vm1, %v1697_v22, %v3558_v16  ;;  %vm2061_vm1 = vcmp.ne.s32.totalorder %v2054_v5, 0 }
 0x2bf   :  { %v1664_v56 = vrot.slane %v1663_v11, 4  ;;  %v1659_v35 = vsel %vm1658_vm14, %v1656_v8, %v1657_v45  ;;  %v1899_v62 = vrot.slane %v1898_v14, 1  ;;  %v2068_v34 = vsel %vm2061_vm1, 1, %v2787_v0  ;;  %v1757_v51 = vpop.permute.xlu0 %1756 }
 0x2c0   :  { %v1660_v13 = vrot.slane %v1659_v35, 1  ;;  %v1742_v20 = vperm.slane %v1741_v31, 0  ;;  %v1738_v39 = vperm.slane %v1737_v33, 0  ;;  %v2053_v41 = vrot.slane %v3601_v17, 6 }
 0x2c1   :  { %vm1665_vm0 = vcmp.lt.s32.totalorder %v1663_v11, %v1664_v56  ;;  %v3793_v3 = vmax.f32 %v1898_v14, %v1899_v62  ;;  %v1789_v46 = vadd.f32 %v3545_v9, %v2718_v36  ;;  %v1750_v44 = vperm.slane %v1749_v60, 0 }
 0x2c2   :  { %v1666_v7 = vsel %vm1665_vm0, %v1663_v11, %v1664_v56  ;;  %vm1661_vm8 = vcmp.lt.s32.totalorder %v1659_v35, %v1660_v13  ;;  %vm2055_vm0 = vcmp.ne.s32.totalorder %v2048_v61, 0  ;;  %vm2060_vm2 = vcmp.ne.s32.totalorder %v2053_v41, 0 }
 0x2c3   :  { %v1667_v52 = vrot.slane %v1666_v7, 2  ;;  %v1662_v23 = vsel %vm1661_vm8, %v1659_v35, %v1660_v13  ;;  %v2062_v21 = vsel %vm2055_vm0, 1, %v2787_v0  ;;  %vm1915_vm8 = vcmp.eq.f32.partialorder %v3675_v59, %v3734_v37 }
 0x2c4   :  { %2666 = vset.pattern.permute.xlu1 %v2787_v0  ;;  %2175 = vperm.xlu2 %2667, %v3793_v3   ;;  %v1678_v16 = vsel %vm324_vm11, %v1662_v23, %v1677_v53  ;;  %v3810_v42 = vpop.permute.xlu1 %1760  ;;  %v1923_v40 = vsel %vm1915_vm8, %v2839_v18, 8  ;;  %v2067_v15 = vsel %vm2060_vm2, 1, %v2787_v0  ;;  %v1788_v17 = vadd.f32 %v3545_v9, %v2720_v58 }
 0x2c5   :  { %vm1668_vm12 = vcmp.lt.s32.totalorder %v1666_v7, %v1667_v52  ;;  %2078 = vperm.xlu1 %2666, %v2063_v55   ;;  %2074 = vperm.xlu0 %2665, %v2062_v21   ;;  %v1931_v59 = vsel %vm161_vm7, %v1923_v40, 2147483647  ;;  %vm1918_vm1 = vcmp.eq.f32.partialorder %v3750_v12, %v3777_v29  ;;  %vm3829_vm0 = vcmp.eq.s32.totalorder %v1750_v44, 1 }
 0x2c6   :  { %v1669_v48 = vsel %vm1668_vm12, %v1666_v7, %v1667_v52  ;;  %vm1765_vm12 = vcmp.eq.s32.totalorder %v1742_v20, 1  ;;  %v1932_v25 = vrot.slane %v1931_v59, 4  ;;  %v1926_v45 = vsel %vm1918_vm1, %v2839_v18, 8  ;;  %v2722_v20 = vld [vmem:[#allocation3 + $0x36] ss:$0 sm:$0xff] }
 0x2c7   :  { %v1670_v1 = vrot.slane %v1669_v48, 1  ;;  %v1773_v50 = vsel %vm1765_vm12, %v2868_v43, 0.0  ;;  %vm1920_vm8 = vcmp.eq.f32.partialorder %v3768_v57, %v3793_v3  ;;  %v1791_v4 = vadd.f32 %v3545_v9, %v2721_v30 }
 0x2c8   :  { %v1797_v47 = vadd.f32 %v1789_v46, %v1773_v50  ;;  %vm1933_vm12 = vcmp.lt.s32.totalorder %v1931_v59, %v1932_v25  ;;  %v1775_v56 = vsel %vm3829_vm0, %v2868_v43, 0.0  ;;  %v1961_v35 = vsel %vm161_vm7, %v1926_v45, 2147483647 }
 0x2c9   :  { %vm1671_vm14 = vcmp.lt.s32.totalorder %v1669_v48, %v1670_v1  ;;  %v1928_v22 = vsel %vm1920_vm8, %v2839_v18, 8  ;;  %v1934_v57 = vsel %vm1933_vm12, %v1931_v59, %v1932_v25  ;;  %v1799_v52 = vadd.f32 %v1791_v4, %v1775_v56 }
 0x2ca   :  { %v1672_v26 = vsel %vm1671_vm14, %v1669_v48, %v1670_v1  ;;  %vm3817_vm14 = vcmp.eq.s32.totalorder %v1738_v39, 1  ;;  %v1962_v48 = vrot.slane %v1961_v35, 4  ;;  %v1981_v1 = vsel %vm161_vm7, %v1928_v22, 2147483647 }
 0x2cb   :  { %v1679_v27 = vsel %vm326_vm9, %v1672_v26, %v1678_v16  ;;  %v1772_v6 = vsel %vm3817_vm14, %v2868_v43, 0.0  ;;  %v1935_v32 = vrot.slane %v1934_v57, 2  ;;  %v1982_v60 = vrot.slane %v1981_v1, 4 }
 0x2cc   :  { %1681 = vst.msk [vmem:[#allocation2 + $0x28] sm:$0xff] %vm161_vm7, %v1679_v27  ;;  %2672 = vset.pattern.permute.xlu2 %v2787_v0  ;;  %v1796_v11 = vadd.f32 %v1788_v17, %v1772_v6  ;;  %vm1963_vm14 = vcmp.lt.s32.totalorder %v1961_v35, %v1962_v48  ;;  %v1793_v53 = vadd.f32 %v3545_v9, %v2722_v20  ;;  %v1762_v6 = vperm.slane %v3810_v42, 0 }
 0x2cd   :  { %2086 = vperm.xlu1 %2666, %v2065_v63   ;;  %2094 = vperm.xlu0 %2665, %v2067_v15   ;;  %v1758_v63 = vperm.slane %v1757_v51, 0  ;;  %vm1936_vm2 = vcmp.lt.s32.totalorder %v1934_v57, %v1935_v32  ;;  %v1964_v36 = vsel %vm1963_vm14, %v1961_v35, %v1962_v48  ;;  %vm1983_vm8 = vcmp.lt.s32.totalorder %v1981_v1, %v1982_v60 }
 0x2ce   :  { %v1937_v58 = vsel %vm1936_vm2, %v1934_v57, %v1935_v32  ;;  %v1965_v59 = vrot.slane %v1964_v36, 2  ;;  %v1984_v17 = vsel %vm1983_vm8, %v1981_v1, %v1982_v60 }
 0x2cf   :  { %vm3850_vm1 = vcmp.eq.s32.totalorder %v1758_v63, 1  ;;  %v1938_v56 = vrot.slane %v1937_v58, 1 }
 0x2d0   :  { %v1777_v44 = vsel %vm3850_vm1, %v2868_v43, 0.0  ;;  %vm1966_vm2 = vcmp.lt.s32.totalorder %v1964_v36, %v1965_v59  ;;  %vm3866_vm1 = vcmp.eq.s32.totalorder %v1762_v6, 1 }
 0x2d5   :  { %2098 = vperm.xlu1 %2666, %v2068_v34   ;;  %2668 = vset.pattern.permute.xlu0 %v2839_v18 }
 0x2dd   :  { %2669 = vset.pattern.permute.xlu1 %v2839_v18 }
 0x311   :  { %v1820_v38 = vpop.permute.xlu1 %1819 }
 0x312   :  { %v1853_v8 = vadd.f32 %v1820_v38, %v1797_v47 }
 0x314   :  { %v1873_v54 = vsel %vm161_vm7, %v1853_v8, -inf }
 0x315   :  { %v1874_v12 = vrot.slane %v1873_v54, 4  ;;  %v1814_v14 = vpop.permute.xlu0 %1813 }
 0x316   :  { %v1852_v49 = vadd.f32 %v1814_v14, %v1796_v11  ;;  %v2723_v11 = vld [vmem:[#allocation3 + $0x3e] ss:$0 sm:$0xff] }
 0x317   :  { %v1875_v62 = vmax.f32 %v1873_v54, %v1874_v12  ;;  %v1801_v54 = vadd.f32 %v1793_v53, %v1777_v44 }
 0x318   :  { %v1866_v13 = vsel %vm161_vm7, %v1852_v49, -inf }
 0x319   :  { %v1876_v7 = vrot.slane %v1875_v62, 2  ;;  %v1867_v55 = vrot.slane %v1866_v13, 4 }
 0x31a   :  { %v1832_v23 = vpop.permute.xlu1 %1831 }
 0x31b   :  { %v1877_v16 = vmax.f32 %v1875_v62, %v1876_v7  ;;  %v1868_v26 = vmax.f32 %v1866_v13, %v1867_v55  ;;  %v3846_v27 = vadd.f32 %v1832_v23, %v1799_v52  ;;  %v1967_v13 = vsel %vm1966_vm2, %v1964_v36, %v1965_v59 }
 0x31c   :  { %v1794_v55 = vadd.f32 %v3545_v9, %v2723_v11  ;;  %v1778_v52 = vsel %vm3866_vm1, %v2868_v43, 0.0 }
 0x31d   :  { %v1878_v31 = vrot.slane %v1877_v16, 1  ;;  %v1869_v5 = vrot.slane %v1868_v26, 2  ;;  %v1887_v34 = vsel %vm161_vm7, %v3846_v27, -inf }
 0x31e   :  { %v1888_v21 = vrot.slane %v1887_v34, 4 }
 0x31f   :  { %v1879_v61 = vmax.f32 %v1877_v16, %v1878_v31  ;;  %v1870_v33 = vmax.f32 %v1868_v26, %v1869_v5  ;;  %v1968_v26 = vrot.slane %v1967_v13, 1  ;;  %v1802_v5 = vadd.f32 %v1794_v55, %v1778_v52 }
 0x320   :  { %v1889_v46 = vmax.f32 %v1887_v34, %v1888_v21 }
 0x321   :  { %vm1917_vm0 = vcmp.eq.f32.partialorder %v1853_v8, %v1879_v61  ;;  %v1871_v40 = vrot.slane %v1870_v33, 1  ;;  %2157 = vperm.xlu1 %2669, %v1879_v61  }
 0x322   :  { %v1925_v41 = vsel %vm1917_vm0, %v2839_v18, 8  ;;  %v1890_v47 = vrot.slane %v1889_v46, 2 }
 0x323   :  { %v1951_v50 = vsel %vm161_vm7, %v1925_v41, 2147483647  ;;  %v1872_v51 = vmax.f32 %v1870_v33, %v1871_v40 }
 0x324   :  { %v1952_v15 = vrot.slane %v1951_v50, 4  ;;  %v1891_v8 = vmax.f32 %v1889_v46, %v1890_v47 }
 0x325   :  { %vm1916_vm12 = vcmp.eq.f32.partialorder %v1852_v49, %v1872_v51  ;;  %v2029_v38 = vsel %vm314_vm15, %v1872_v51, %v3734_v37  ;;  %2151 = vperm.xlu0 %2668, %v1872_v51   ;;  %v1985_v49 = vrot.slane %v1984_v17, 2 }
 0x326   :  { %vm1953_vm14 = vcmp.lt.s32.totalorder %v1951_v50, %v1952_v15  ;;  %v1924_v30 = vsel %vm1916_vm12, %v2839_v18, 8  ;;  %v2030_v25 = vsel %vm316_vm10, %v1879_v61, %v2029_v38  ;;  %v1892_v42 = vrot.slane %v1891_v8, 1 }
 0x327   :  { %v1954_v10 = vsel %vm1953_vm14, %v1951_v50, %v1952_v15  ;;  %v1941_v45 = vsel %vm161_vm7, %v1924_v30, 2147483647  ;;  %v1844_v4 = vpop.permute.xlu0 %1843  ;;  %v2031_v22 = vsel %vm318_vm6, %v3777_v29, %v2030_v25  ;;  %vm1986_vm14 = vcmp.lt.s32.totalorder %v1984_v17, %v1985_v49 }
 0x328   :  { %v1955_v12 = vrot.slane %v1954_v10, 2  ;;  %v1942_v14 = vrot.slane %v1941_v45, 4  ;;  %v3870_v35 = vadd.f32 %v1844_v4, %v1801_v54  ;;  %v1893_v62 = vmax.f32 %v1891_v8, %v1892_v42 }
 0x329   :  { %v1987_v34 = vsel %vm1986_vm14, %v1984_v17, %v1985_v49 }
 0x32a   :  { %vm1956_vm0 = vcmp.lt.s32.totalorder %v1954_v10, %v1955_v12  ;;  %vm1943_vm8 = vcmp.lt.s32.totalorder %v1941_v45, %v1942_v14  ;;  %vm1919_vm12 = vcmp.eq.f32.partialorder %v3846_v27, %v1893_v62  ;;  %2169 = vperm.xlu1 %2669, %v1893_v62   ;;  %v2032_v16 = vsel %vm320_vm3, %v1893_v62, %v2031_v22 }
 0x32b   :  { %v1957_v57 = vsel %vm1956_vm0, %v1954_v10, %v1955_v12  ;;  %v1944_v7 = vsel %vm1943_vm8, %v1941_v45, %v1942_v14  ;;  %v1927_v1 = vsel %vm1919_vm12, %v2839_v18, 8  ;;  %v1901_v29 = vsel %vm161_vm7, %v3870_v35, -inf }
 0x32c   :  { %v1945_v48 = vrot.slane %v1944_v7, 2  ;;  %v1958_v23 = vrot.slane %v1957_v57, 1  ;;  %v1971_v9 = vsel %vm161_vm7, %v1927_v1, 2147483647  ;;  %vm1939_vm0 = vcmp.lt.s32.totalorder %v1937_v58, %v1938_v56 }
 0x32d   :  { %v1972_v31 = vrot.slane %v1971_v9, 4  ;;  %v1902_v60 = vrot.slane %v1901_v29, 4  ;;  %v1940_v33 = vsel %vm1939_vm0, %v1937_v58, %v1938_v56  ;;  %vm1969_vm12 = vcmp.lt.s32.totalorder %v1967_v13, %v1968_v26 }
 0x32e   :  { %vm1946_vm2 = vcmp.lt.s32.totalorder %v1944_v7, %v1945_v48  ;;  %v1850_v32 = vpop.permute.xlu1 %1849  ;;  %vm1959_vm1 = vcmp.lt.s32.totalorder %v1957_v57, %v1958_v23  ;;  %v1988_v41 = vrot.slane %v1987_v34, 1  ;;  %v1970_v53 = vsel %vm1969_vm12, %v1967_v13, %v1968_v26 }
 0x32f   :  { %v1947_v63 = vsel %vm1946_vm2, %v1944_v7, %v1945_v48  ;;  %vm1973_vm8 = vcmp.lt.s32.totalorder %v1971_v9, %v1972_v31  ;;  %v1858_v61 = vadd.f32 %v1850_v32, %v1802_v5  ;;  %v1903_v39 = vmax.f32 %v1901_v29, %v1902_v60  ;;  %v3914_v5 = vld [vmem:[%s4120_s1] sm:$0xff] }
 0x330   :  { %v1948_v27 = vrot.slane %v1947_v63, 1  ;;  %v1974_v21 = vsel %vm1973_vm8, %v1971_v9, %v1972_v31  ;;  %v1960_v46 = vsel %vm1959_vm1, %v1957_v57, %v1958_v23  ;;  %v2033_v14 = vsel %vm322_vm5, %v3793_v3, %v2032_v16  ;;  %v3908_v9 = vpop.permute.xlu2 %2070 }
 0x331   :  { %v1975_v36 = vrot.slane %v1974_v21, 2  ;;  %v1908_v40 = vsel %vm161_vm7, %v1858_v61, -inf  ;;  %v1904_v15 = vrot.slane %v1903_v39, 2  ;;  %vm2020_vm1 = vcmp.eq.s32.totalorder %v3620_v24, 1 }
 0x332   :  { %vm1949_vm4 = vcmp.lt.s32.totalorder %v1947_v63, %v1948_v27  ;;  %v1909_v51 = vrot.slane %v1908_v40, 4 }
 0x333   :  { %v1950_v20 = vsel %vm1949_vm4, %v1947_v63, %v1948_v27  ;;  %vm1976_vm14 = vcmp.lt.s32.totalorder %v1974_v21, %v1975_v36  ;;  %vm1989_vm4 = vcmp.lt.s32.totalorder %v1987_v34, %v1988_v41  ;;  %v1905_v6 = vmax.f32 %v1903_v39, %v1904_v15 }
 0x334   :  { %v2011_v50 = vsel %vm314_vm15, %v1950_v20, %v1940_v33  ;;  %v1977_v44 = vsel %vm1976_vm14, %v1974_v21, %v1975_v36  ;;  %v1910_v17 = vmax.f32 %v1908_v40, %v1909_v51  ;;  %v1990_v8 = vsel %vm1989_vm4, %v1987_v34, %v1988_v41  ;;  %v2717_v21 = vld [vmem:[#allocation3 + $0x1f] ss:$0 sm:$0xff] }
 0x335   :  { %v2012_v59 = vsel %vm316_vm10, %v1960_v46, %v2011_v50  ;;  %v1978_v47 = vrot.slane %v1977_v44, 1  ;;  %v1906_v25 = vrot.slane %v1905_v6, 1  ;;  %v2072_v63 = vperm.slane %v3908_v9, 0 }
 0x336   :  { %v2013_v58 = vsel %vm318_vm6, %v1970_v53, %v2012_v59  ;;  %v1911_v38 = vrot.slane %v1910_v17, 2  ;;  %v2128_v39 = vadd.f32 %v3914_v5, %v2717_v21  ;;  %v2719_v53 = vld [vmem:[#allocation3 + $0x2f] ss:$0 sm:$0xff] }
 0x337   :  { %vm1979_vm2 = vcmp.lt.s32.totalorder %v1977_v44, %v1978_v47  ;;  %v1907_v54 = vmax.f32 %v1905_v6, %v1906_v25  ;;  %v2079_v20 = vpop.permute.xlu1 %2078  ;;  %v2130_v15 = vadd.f32 %v3914_v5, %v2719_v53  ;;  %v2075_v6 = vpop.permute.xlu0 %2074 }
 0x338   :  { %v1980_v30 = vsel %vm1979_vm2, %v1977_v44, %v1978_v47  ;;  %v1912_v45 = vmax.f32 %v1910_v17, %v1911_v38  ;;  %v2083_v32 = vpop.permute.xlu2 %2082 }
 0x339   :  { %v2014_v10 = vsel %vm320_vm3, %v1980_v30, %v2013_v58  ;;  %vm1921_vm0 = vcmp.eq.f32.partialorder %v3870_v35, %v1907_v54  ;;  %2181 = vperm.xlu0 %2668, %v1907_v54   ;;  %v2034_v42 = vsel %vm324_vm11, %v1907_v54, %v2033_v14  ;;  %v2084_v34 = vperm.slane %v2083_v32, 0  ;;  %v2724_v54 = vld [vmem:[#allocation3 + $0x17] ss:$0 sm:$0xff] }
 0x33a   :  { %v2015_v11 = vsel %vm322_vm5, %v1990_v8, %v2014_v10  ;;  %v1913_v12 = vrot.slane %v1912_v45, 1  ;;  %v1929_v4 = vsel %vm1921_vm0, %v2839_v18, 8  ;;  %v2080_v8 = vperm.slane %v2079_v20, 0 }
 0x33b   :  { %v1991_v49 = vsel %vm161_vm7, %v1929_v4, 2147483647  ;;  %v2076_v14 = vperm.slane %v2075_v6, 0 }
 0x33c   :  { %v1914_v56 = vmax.f32 %v1912_v45, %v1913_v12  ;;  %v1992_v37 = vrot.slane %v1991_v49, 4 }
 0x33e   :  { %vm1922_vm8 = vcmp.eq.f32.partialorder %v1858_v61, %v1914_v56  ;;  %2187 = vperm.xlu1 %2669, %v1914_v56   ;;  %v2035_v62 = vsel %vm326_vm9, %v1914_v56, %v2034_v42  ;;  %vm1993_vm12 = vcmp.lt.s32.totalorder %v1991_v49, %v1992_v37  ;;  %v2127_v56 = vadd.f32 %v3914_v5, %v2724_v54 }
 0x33f   :  { %v1930_v22 = vsel %vm1922_vm8, %v2839_v18, 8  ;;  %v3900_v3 = vsel %vm2020_vm1, %v2035_v62, %v3791_v28  ;;  %v1994_v13 = vsel %vm1993_vm12, %v1991_v49, %v1992_v37  ;;  %vm2101_vm8 = vcmp.eq.s32.totalorder %v2072_v63, 1  ;;  %v2087_v44 = vpop.permute.xlu1 %2086  ;;  %v2725_v49 = vld [vmem:[#allocation3 + $0xf] ss:$0 sm:$0xff] }
 0x340   :  { %v2001_v35 = vsel %vm161_vm7, %v1930_v22, 2147483647  ;;  %v1995_v7 = vrot.slane %v1994_v13, 2  ;;  %v2091_v31 = vpop.permute.xlu2 %2090  ;;  %v2109_v60 = vsel %vm2101_vm8, %v2868_v43, 0.0  ;;  %vm2104_vm12 = vcmp.eq.s32.totalorder %v2084_v34, 1  ;;  %v3938_v22 = vpop.permute.xlu0 %2094 }
 0x341   :  { %v2002_v57 = vrot.slane %v2001_v35, 4  ;;  %2670 = vset.pattern.permute.xlu0 %v2787_v0  ;;  %v2112_v40 = vsel %vm2104_vm12, %v2868_v43, 0.0  ;;  %v2092_v41 = vperm.slane %v2091_v31, 0 }
 0x342   :  { %vm1996_vm4 = vcmp.lt.s32.totalorder %v1994_v13, %v1995_v7  ;;  %v2136_v51 = vadd.f32 %v2128_v39, %v2112_v40 }
 0x343   :  { %vm2003_vm14 = vcmp.lt.s32.totalorder %v2001_v35, %v2002_v57  ;;  %v1997_v55 = vsel %vm1996_vm4, %v1994_v13, %v1995_v7  ;;  %vm2103_vm4 = vcmp.eq.s32.totalorder %v2080_v8, 1 }
 0x344   :  { %v2004_v24 = vsel %vm2003_vm14, %v2001_v35, %v2002_v57  ;;  %v1998_v48 = vrot.slane %v1997_v55, 1  ;;  %vm2106_vm14 = vcmp.eq.s32.totalorder %v2092_v41, 1  ;;  %v2111_v62 = vsel %vm2103_vm4, %v2868_v43, 0.0 }
 0x345   :  { %v2005_v52 = vrot.slane %v2004_v24, 2  ;;  %v2114_v47 = vsel %vm2106_vm14, %v2868_v43, 0.0  ;;  %v2135_v7 = vadd.f32 %v2127_v56, %v2111_v62  ;;  %v2727_v62 = vld [vmem:[#allocation3 + $0x37] ss:$0 sm:$0xff] }
 0x346   :  { %2671 = vset.pattern.permute.xlu1 %v2787_v0  ;;  %vm1999_vm0 = vcmp.lt.s32.totalorder %v1997_v55, %v1998_v48  ;;  %v2716_v0 = vld [vmem:[#allocation3 + $0x7] ss:$0 sm:$0xff]  ;;  %v2138_v30 = vadd.f32 %v2130_v15, %v2114_v47 }
 0x347   :  { %vm2006_vm2 = vcmp.lt.s32.totalorder %v2004_v24, %v2005_v52  ;;  %v2000_v23 = vsel %vm1999_vm0, %v1997_v55, %v1998_v48  ;;  %v2125_v27 = vadd.f32 %v3914_v5, %v2716_v0  ;;  %v3932_v12 = vpop.permute.xlu1 %2098  ;;  %v2088_v55 = vperm.slane %v2087_v44, 0 }
 0x348   :  { %v2007_v28 = vsel %vm2006_vm2, %v2004_v24, %v2005_v52  ;;  %v2016_v16 = vsel %vm324_vm11, %v2000_v23, %v2015_v11  ;;  %v2146_v33 = vpop.permute.xlu2 %2145  ;;  %vm2102_vm2 = vcmp.eq.s32.totalorder %v2076_v14, 1  ;;  %v2126_v24 = vadd.f32 %v3914_v5, %v2725_v49 }
 0x349   :  { %v2008_v1 = vrot.slane %v2007_v28, 1  ;;  %v2133_v61 = vadd.f32 %v2125_v27, %v2109_v60  ;;  %v2110_v52 = vsel %vm2102_vm2, %v2868_v43, 0.0  ;;  %vm3945_vm0 = vcmp.eq.s32.totalorder %v2088_v55, 1 }
 0x34a   :  { %v2134_v32 = vadd.f32 %v2126_v24, %v2110_v52  ;;  %v2113_v21 = vsel %vm3945_vm0, %v2868_v43, 0.0 }
 0x34b   :  { %vm2009_vm1 = vcmp.lt.s32.totalorder %v2007_v28, %v2008_v1  ;;  %v3918_v36 = vadd.f32 %v2146_v33, %v2133_v61 }
 0x34c   :  { %v2010_v29 = vsel %vm2009_vm1, %v2007_v28, %v2008_v1  ;;  %v2726_v1 = vld [vmem:[#allocation3 + $0x27] ss:$0 sm:$0xff] }
 0x34d   :  { %v2017_v26 = vsel %vm326_vm9, %v2010_v29, %v2016_v16  ;;  %v2197_v46 = vsel %vm161_vm7, %v3918_v36, -inf  ;;  %v2129_v34 = vadd.f32 %v3914_v5, %v2726_v1 }
 0x34e   :  { %2019 = vst.msk [vmem:[#allocation2 + $0x30] sm:$0xff] %vm161_vm7, %v2017_v26  ;;  %v2198_v59 = vrot.slane %v2197_v46, 4 }
 0x350   :  { %v2164_v50 = vpop.permute.xlu2 %2163  ;;  %v2199_v17 = vmax.f32 %v2197_v46, %v2198_v59 }
 0x351   :  { %v3924_v58 = vadd.f32 %v2164_v50, %v2136_v51  ;;  %v2137_v51 = vadd.f32 %v2129_v34, %v2113_v21 }
 0x352   :  { %v2200_v10 = vrot.slane %v2199_v17, 2 }
 0x353   :  { %v2218_v38 = vsel %vm161_vm7, %v3924_v58, -inf }
 0x354   :  { %v2219_v45 = vrot.slane %v2218_v38, 4  ;;  %v2201_v42 = vmax.f32 %v2199_v17, %v2200_v10 }
 0x356   :  { %v2220_v4 = vmax.f32 %v2218_v38, %v2219_v45  ;;  %v2202_v35 = vrot.slane %v2201_v42, 1 }
 0x358   :  { %v2176_v25 = vpop.permute.xlu2 %2175  ;;  %v2221_v13 = vrot.slane %v2220_v4, 2  ;;  %v3942_v23 = vmax.f32 %v2201_v42, %v2202_v35 }
 0x359   :  { %v3930_v11 = vadd.f32 %v2176_v25, %v2138_v30 }
 0x35a   :  { %v2222_v16 = vmax.f32 %v2220_v4, %v2221_v13  ;;  %vm2253_vm1 = vcmp.eq.f32.partialorder %v3918_v36, %v3942_v23  ;;  %v2096_v4 = vperm.slane %v3938_v22, 0  ;;  %v2100_v13 = vperm.slane %v3932_v12, 0 }
 0x35b   :  { %v2232_v37 = vsel %vm161_vm7, %v3930_v11, -inf  ;;  %v2261_v41 = vsel %vm2253_vm1, %v2839_v18, 8  ;;  %v2131_v12 = vadd.f32 %v3914_v5, %v2727_v62 }
 0x35c   :  { %v2233_v57 = vrot.slane %v2232_v37, 4  ;;  %v2223_v61 = vrot.slane %v2222_v16, 1  ;;  %v2269_v17 = vsel %vm161_vm7, %v2261_v41, 2147483647  ;;  %vm3975_vm2 = vcmp.eq.s32.totalorder %v2096_v4, 1 }
 0x35d   :  { %v2270_v10 = vrot.slane %v2269_v17, 4  ;;  %vm3983_vm1 = vcmp.eq.s32.totalorder %v2100_v13, 1 }
 0x35e   :  { %v2234_v29 = vmax.f32 %v2232_v37, %v2233_v57  ;;  %v3957_v53 = vmax.f32 %v2222_v16, %v2223_v61 }
 0x35f   :  { %vm2271_vm14 = vcmp.lt.s32.totalorder %v2269_v17, %v2270_v10 }
 0x360   :  { %v2235_v33 = vrot.slane %v2234_v29, 2  ;;  %vm2256_vm8 = vcmp.eq.f32.partialorder %v3924_v58, %v3957_v53  ;;  %v2272_v1 = vsel %vm2271_vm14, %v2269_v17, %v2270_v10 }
 0x361   :  { %v2264_v42 = vsel %vm2256_vm8, %v2839_v18, 8 }
 0x362   :  { %v2236_v36 = vmax.f32 %v2234_v29, %v2235_v33  ;;  %v2299_v35 = vsel %vm161_vm7, %v2264_v42, 2147483647 }
 0x363   :  { %v2300_v16 = vrot.slane %v2299_v35, 4 }
 0x364   :  { %v2237_v25 = vrot.slane %v2236_v36, 1 }
 0x365   :  { %vm2301_vm14 = vcmp.lt.s32.totalorder %v2299_v35, %v2300_v16 }
 0x366   :  { %v3969_v49 = vmax.f32 %v2236_v36, %v2237_v25 }
 0x368   :  { %vm2258_vm0 = vcmp.eq.f32.partialorder %v3930_v11, %v3969_v49 }
 0x369   :  { %v2266_v11 = vsel %vm2258_vm0, %v2839_v18, 8 }
 0x36a   :  { %v2319_v61 = vsel %vm161_vm7, %v2266_v11, 2147483647 }
 0x393   :  { %v2158_v48 = vpop.permute.xlu1 %2157 }
 0x394   :  { %v2191_v28 = vadd.f32 %v2158_v48, %v2135_v7 }
 0x396   :  { %v2211_v26 = vsel %vm161_vm7, %v2191_v28, -inf }
 0x397   :  { %v2212_v31 = vrot.slane %v2211_v26, 4  ;;  %v2152_v0 = vpop.permute.xlu0 %2151 }
 0x398   :  { %v2190_v27 = vadd.f32 %v2152_v0, %v2134_v32 }
 0x399   :  { %v2213_v60 = vmax.f32 %v2211_v26, %v2212_v31  ;;  %v2115_v26 = vsel %vm3975_vm2, %v2868_v43, 0.0  ;;  %v2273_v31 = vrot.slane %v2272_v1, 2 }
 0x39a   :  { %v2204_v20 = vsel %vm161_vm7, %v2190_v27, -inf  ;;  %v2139_v34 = vadd.f32 %v2131_v12, %v2115_v26 }
 0x39b   :  { %v2214_v39 = vrot.slane %v2213_v60, 2  ;;  %v2205_v40 = vrot.slane %v2204_v20, 4  ;;  %vm2274_vm2 = vcmp.lt.s32.totalorder %v2272_v1, %v2273_v31 }
 0x39c   :  { %v2170_v59 = vpop.permute.xlu1 %2169 }
 0x39d   :  { %v2215_v46 = vmax.f32 %v2213_v60, %v2214_v39  ;;  %v2206_v50 = vmax.f32 %v2204_v20, %v2205_v40  ;;  %v2193_v47 = vadd.f32 %v2170_v59, %v2137_v51 }
 0x39f   :  { %v2216_v44 = vrot.slane %v2215_v46, 1  ;;  %v2207_v15 = vrot.slane %v2206_v50, 2  ;;  %v2225_v30 = vsel %vm161_vm7, %v2193_v47, -inf }
 0x3a0   :  { %v2226_v8 = vrot.slane %v2225_v30, 4 }
 0x3a1   :  { %v3960_v6 = vmax.f32 %v2215_v46, %v2216_v44  ;;  %v2208_v38 = vmax.f32 %v2206_v50, %v2207_v15  ;;  %v2320_v50 = vrot.slane %v2319_v61, 4  ;;  %v2275_v15 = vsel %vm2274_vm2, %v2272_v1, %v2273_v31 }
 0x3a2   :  { %v2227_v14 = vmax.f32 %v2225_v30, %v2226_v8 }
 0x3a3   :  { %vm2255_vm12 = vcmp.eq.f32.partialorder %v2191_v28, %v3960_v6  ;;  %v2209_v45 = vrot.slane %v2208_v38, 1  ;;  %v2728_v28 = vld [vmem:[#allocation3 + $0x3f] ss:$0 sm:$0xff] }
 0x3a4   :  { %v2263_v54 = vsel %vm2255_vm12, %v2839_v18, 8  ;;  %v2228_v37 = vrot.slane %v2227_v14, 2  ;;  %v2132_v0 = vadd.f32 %v3914_v5, %v2728_v28  ;;  %v2302_v5 = vsel %vm2301_vm14, %v2299_v35, %v2300_v16 }
 0x3a5   :  { %v2210_v56 = vmax.f32 %v2208_v38, %v2209_v45  ;;  %v2289_v58 = vsel %vm161_vm7, %v2263_v54, 2147483647  ;;  %v2303_v17 = vrot.slane %v2302_v5, 2  ;;  %v2276_v45 = vrot.slane %v2275_v15, 1 }
 0x3a6   :  { %v2229_v7 = vmax.f32 %v2227_v14, %v2228_v37  ;;  %v2290_v55 = vrot.slane %v2289_v58, 4 }
 0x3a7   :  { %vm2254_vm4 = vcmp.eq.f32.partialorder %v2190_v27, %v2210_v56  ;;  %v2116_v27 = vsel %vm3983_vm1, %v2868_v43, 0.0  ;;  %vm2277_vm14 = vcmp.lt.s32.totalorder %v2275_v15, %v2276_v45 }
 0x3a8   :  { %v2262_v57 = vsel %vm2254_vm4, %v2839_v18, 8  ;;  %v2230_v48 = vrot.slane %v2229_v7, 1  ;;  %vm2291_vm12 = vcmp.lt.s32.totalorder %v2289_v58, %v2290_v55  ;;  %v2140_v46 = vadd.f32 %v2132_v0, %v2116_v27 }
 0x3a9   :  { %v2279_v22 = vsel %vm161_vm7, %v2262_v57, 2147483647  ;;  %v2292_v39 = vsel %vm2291_vm12, %v2289_v58, %v2290_v55 }
 0x3aa   :  { %v2280_v52 = vrot.slane %v2279_v22, 4  ;;  %v2231_v32 = vmax.f32 %v2229_v7, %v2230_v48  ;;  %v2293_v36 = vrot.slane %v2292_v39, 2  ;;  %v2278_v48 = vsel %vm2277_vm14, %v2275_v15, %v2276_v45 }
 0x3ab   :  { %v2182_v20 = vpop.permute.xlu0 %2181 }
 0x3ac   :  { %vm2281_vm8 = vcmp.lt.s32.totalorder %v2279_v22, %v2280_v52  ;;  %vm2257_vm4 = vcmp.eq.f32.partialorder %v2193_v47, %v2231_v32  ;;  %v2195_v41 = vadd.f32 %v2182_v20, %v2139_v34  ;;  %v2367_v47 = vsel %vm314_vm15, %v2210_v56, %v3942_v23 }
 0x3ad   :  { %v2282_v63 = vsel %vm2281_vm8, %v2279_v22, %v2280_v52  ;;  %v2265_v60 = vsel %vm2257_vm4, %v2839_v18, 8  ;;  %vm2321_vm8 = vcmp.lt.s32.totalorder %v2319_v61, %v2320_v50  ;;  %vm2294_vm12 = vcmp.lt.s32.totalorder %v2292_v39, %v2293_v36 }
 0x3ae   :  { %v2283_v33 = vrot.slane %v2282_v63, 2  ;;  %v2309_v21 = vsel %vm161_vm7, %v2265_v60, 2147483647  ;;  %v2239_v43 = vsel %vm161_vm7, %v2195_v41, -inf  ;;  %v2368_v54 = vsel %vm316_vm10, %v3960_v6, %v2367_v47 }
 0x3af   :  { %v2310_v40 = vrot.slane %v2309_v21, 4  ;;  %v2240_v59 = vrot.slane %v2239_v43, 4  ;;  %vm2304_vm4 = vcmp.lt.s32.totalorder %v2302_v5, %v2303_v17  ;;  %v2322_v37 = vsel %vm2321_vm8, %v2319_v61, %v2320_v50 }
 0x3b0   :  { %v2188_v51 = vpop.permute.xlu1 %2187  ;;  %vm2284_vm1 = vcmp.lt.s32.totalorder %v2282_v63, %v2283_v33  ;;  %v2295_v56 = vsel %vm2294_vm12, %v2292_v39, %v2293_v36  ;;  %v2369_v62 = vsel %vm318_vm6, %v3957_v53, %v2368_v54  ;;  %v2305_v57 = vsel %vm2304_vm4, %v2302_v5, %v2303_v17 }
 0x3b1   :  { %vm2311_vm0 = vcmp.lt.s32.totalorder %v2309_v21, %v2310_v40  ;;  %v2196_v44 = vadd.f32 %v2188_v51, %v2140_v46  ;;  %v2241_v30 = vmax.f32 %v2239_v43, %v2240_v59  ;;  %v2285_v8 = vsel %vm2284_vm1, %v2282_v63, %v2283_v33 }
 0x3b2   :  { %v2312_v38 = vsel %vm2311_vm0, %v2309_v21, %v2310_v40  ;;  %v2286_v58 = vrot.slane %v2285_v8, 1  ;;  %v2323_v7 = vrot.slane %v2322_v37, 2  ;;  %v2296_v22 = vrot.slane %v2295_v56, 1 }
 0x3b3   :  { %v2246_v25 = vsel %vm161_vm7, %v2196_v44, -inf  ;;  %v2242_v14 = vrot.slane %v2241_v30, 2  ;;  %v2313_v42 = vrot.slane %v2312_v38, 2  ;;  %v2370_v6 = vsel %vm320_vm3, %v2231_v32, %v2369_v62 }
 0x3b4   :  { %v2247_v10 = vrot.slane %v2246_v25, 4  ;;  %vm2287_vm0 = vcmp.lt.s32.totalorder %v2285_v8, %v2286_v58  ;;  %vm2358_vm1 = vcmp.eq.s32.totalorder %v3908_v9, 1  ;;  %v2306_v28 = vrot.slane %v2305_v57, 1 }
 0x3b5   :  { %v2243_v23 = vmax.f32 %v2241_v30, %v2242_v14  ;;  %vm2314_vm2 = vcmp.lt.s32.totalorder %v2312_v38, %v2313_v42  ;;  %v2288_v53 = vsel %vm2287_vm0, %v2285_v8, %v2286_v58  ;;  %v2371_v29 = vsel %vm322_vm5, %v3969_v49, %v2370_v6 }
 0x3b6   :  { %v2248_v4 = vmax.f32 %v2246_v25, %v2247_v10  ;;  %v2315_v1 = vsel %vm2314_vm2, %v2312_v38, %v2313_v42  ;;  %vm2324_vm12 = vcmp.lt.s32.totalorder %v2322_v37, %v2323_v7  ;;  %vm2297_vm4 = vcmp.lt.s32.totalorder %v2295_v56, %v2296_v22 }
 0x3b7   :  { %v2244_v13 = vrot.slane %v2243_v23, 1  ;;  %v2316_v11 = vrot.slane %v2315_v1, 1  ;;  %v2349_v0 = vsel %vm314_vm15, %v2288_v53, %v2278_v48  ;;  %v2325_v49 = vsel %vm2324_vm12, %v2322_v37, %v2323_v7 }
 0x3b8   :  { %v2249_v35 = vrot.slane %v2248_v4, 2  ;;  %vm2307_vm2 = vcmp.lt.s32.totalorder %v2305_v57, %v2306_v28  ;;  %v2298_v33 = vsel %vm2297_vm4, %v2295_v56, %v2296_v22  ;;  %vm4215_vm4 = vcmp.eq.s32.totalorder %v2824_v2, 7 }
 0x3b9   :  { %v2245_v55 = vmax.f32 %v2243_v23, %v2244_v13  ;;  %v2350_v39 = vsel %vm316_vm10, %v2298_v33, %v2349_v0  ;;  %vm2317_vm15 = vcmp.lt.s32.totalorder %v2315_v1, %v2316_v11 }
 0x3ba   :  { %v2250_v24 = vmax.f32 %v2248_v4, %v2249_v35  ;;  %v2318_v9 = vsel %vm2317_vm15, %v2315_v1, %v2316_v11  ;;  %vm4216_vm15 = vcmp.eq.s32.totalorder %v2824_v2, 6 }
 0x3bb   :  { %vm2259_vm8 = vcmp.eq.f32.partialorder %v2195_v41, %v2245_v55  ;;  %v2372_v32 = vsel %vm324_vm11, %v2245_v55, %v2371_v29  ;;  %v2308_v41 = vsel %vm2307_vm2, %v2305_v57, %v2306_v28  ;;  %vm2437_vm2 = vcmp.gt.s32.totalorder %v2824_v2, 6 }
 0x3bc   :  { %v2251_v52 = vrot.slane %v2250_v24, 1  ;;  %v2267_v16 = vsel %vm2259_vm8, %v2839_v18, 8  ;;  %v2351_v46 = vsel %vm318_vm6, %v2308_v41, %v2350_v39  ;;  %vm2397_vm6 = vcmp.eq.s32.totalorder %v2841_v19, 0 }
 0x3bd   :  { %v2329_v26 = vsel %vm161_vm7, %v2267_v16, 2147483647  ;;  %v2352_v51 = vsel %vm320_vm3, %v2318_v9, %v2351_v46  ;;  %vm2602_vm3 = vcmask 7168  }
 0x3be   :  { %v2252_v12 = vmax.f32 %v2250_v24, %v2251_v52  ;;  %v2330_v63 = vrot.slane %v2329_v26, 4 }
 0x3c0   :  { %vm2260_vm13 = vcmp.eq.f32.partialorder %v2196_v44, %v2252_v12  ;;  %v2373_v31 = vsel %vm326_vm9, %v2252_v12, %v2372_v32  ;;  %vm2331_vm14 = vcmp.lt.s32.totalorder %v2329_v26, %v2330_v63 }
 0x3c1   :  { %v2268_v27 = vsel %vm2260_vm13, %v2839_v18, 8  ;;  %v2375_v60 = vsel %vm2358_vm1, %v2373_v31, %v3900_v3  ;;  %v2332_v21 = vsel %vm2331_vm14, %v2329_v26, %v2330_v63  ;;  %v2326_v18 = vrot.slane %v2325_v49, 1 }
 0x3c2   :  { %v2339_v34 = vsel %vm161_vm7, %v2268_v27, 2147483647  ;;  %v2376_v61 = vsel %vm161_vm7, %v2375_v60, -inf  ;;  %v2333_v40 = vrot.slane %v2332_v21, 2 }
 0x3c3   :  { %v2340_v20 = vrot.slane %v2339_v34, 4  ;;  %2377 = vmax.xlane.f32.xlu2 %v2376_v61  ;;  %vm2327_vm1 = vcmp.lt.s32.totalorder %v2325_v49, %v2326_v18 }
 0x3c4   :  { %vm2334_vm0 = vcmp.lt.s32.totalorder %v2332_v21, %v2333_v40  ;;  %v2328_v15 = vsel %vm2327_vm1, %v2325_v49, %v2326_v18  ;;  %v2447_v18 = vld [vmem:[#allocation2 + $0x30] sm:$0xff]  ;;  %vm4217_vm1 = vcmp.eq.s32.totalorder %v2824_v2, 5 }
 0x3c5   :  { %vm2341_vm13 = vcmp.lt.s32.totalorder %v2339_v34, %v2340_v20  ;;  %v2335_v5 = vsel %vm2334_vm0, %v2332_v21, %v2333_v40  ;;  %v2353_v47 = vsel %vm322_vm5, %v2328_v15, %v2352_v51  ;;  %vm2463_vm0 = vcmp.gt.s32.totalorder %v2824_v2, 5 }
 0x3c6   :  { %v2342_v3 = vsel %vm2341_vm13, %v2339_v34, %v2340_v20  ;;  %v2336_v43 = vrot.slane %v2335_v5, 1 }
 0x3c7   :  { %v2343_v50 = vrot.slane %v2342_v3, 2 }
 0x3c8   :  { %vm2337_vm12 = vcmp.lt.s32.totalorder %v2335_v5, %v2336_v43 }
 0x3c9   :  { %vm2344_vm8 = vcmp.lt.s32.totalorder %v2342_v3, %v2343_v50  ;;  %v2338_v59 = vsel %vm2337_vm12, %v2335_v5, %v2336_v43  ;;  %vm2489_vm12 = vcmp.gt.s32.totalorder %v2824_v2, 4 }
 0x3ca   :  { %v2345_v36 = vsel %vm2344_vm8, %v2342_v3, %v2343_v50  ;;  %v2354_v17 = vsel %vm324_vm11, %v2338_v59, %v2353_v47  ;;  %vm2412_vm11 = vcmp.gt.s32.totalorder %v2824_v2, 7 }
 0x3cb   :  { %v2346_v44 = vrot.slane %v2345_v36, 1 }
 0x3cd   :  { %vm2347_vm10 = vcmp.lt.s32.totalorder %v2345_v36, %v2346_v44 }
 0x3ce   :  { %v2348_v38 = vsel %vm2347_vm10, %v2345_v36, %v2346_v44  ;;  %vm4218_vm10 = vcmp.eq.s32.totalorder %v2824_v2, 4 }
 0x3cf   :  { %v2355_v30 = vsel %vm326_vm9, %v2348_v38, %v2354_v17 }
 0x3d0   :  { %2357 = vst.msk [vmem:[#allocation2 + $0x38] sm:$0xff] %vm161_vm7, %v2355_v30  ;;  %v2473_v30 = vld [vmem:[#allocation2 + $0x28] sm:$0xff] }
 0x3d7   :  { %v2396_v25 = vld [vmem:[#allocation2 + $0x38] sm:$0xff] }
 0x3d8   :  { %v2398_v8 = vsel %vm2397_vm6, %v2396_v25, 0 }
 0x3d9   :  { %v2399_v10 = vsel %vm161_vm7, %v2398_v8, 0 }
 0x3da   :  { %v2401_v45 = vshrl.u32 %v2399_v10, 16  ;;  %v2400_v54 = vand.u32 65535, %v2399_v10 }
 0x3dc   :  { %v2403_v14 = vcvt.s32.f32 %v2401_v45  ;;  %v2402_v42 = vcvt.s32.f32 %v2400_v54 }
 0x3de   :  { %2406 = vadd.xlane.f32.xlu1 %v2403_v14  ;;  %2404 = vadd.xlane.f32.xlu2 %v2402_v42 }
 0x436   :  { %v2378_v4 = vpop.xlane.xlu2 %2377 }
 0x437   :  { %vm2379_vm5 = vcmp.eq.f32.partialorder %v2375_v60, %v2378_v4  ;;  %2603 = vst.msk [vmem:[%s4123_s4] sm:$0xff] %vm2602_vm3, %v2378_v4  ;;  %s2789_s4 = smov [#allocation6]  }
 0x438   :  { %v2380_v37 = vsel %vm2379_vm5, %v2841_v19, 8  ;;  %vm2515_vm5 = vcmp.gt.s32.totalorder %v2824_v2, 3  ;;  %s2609_s5 = sshll.u32 %s2789_s4, 4  ;;  %s2610_s5 = int_to_ptr.vmem [resolvable:$true] %s2609_s5 }
 0x439   :  { %v2381_v58 = vsel %vm161_vm7, %v2380_v37, 2147483647 }
 0x43a   :  { %v2383_v23 = vshra.s32 %v2381_v58, 16  ;;  %v2382_v62 = vand.u32 65535, %v2381_v58 }
 0x43c   :  { %v2385_v56 = vcvt.s32.f32 %v2383_v23  ;;  %v2384_v13 = vcvt.s32.f32 %v2382_v62 }
 0x43e   :  { %2386 = vmin.xlane.f32.xlu0 %v2385_v56 }
 0x451   :  { %v2407_v7 = vpop.xlane.xlu1 %2406  ;;  %v2405_v22 = vpop.xlane.xlu2 %2404 }
 0x452   :  { %v2409_v24 = vcvt.f32.s32 %v2407_v7  ;;  %v2408_v52 = vcvt.f32.s32 %v2405_v22 }
 0x454   :  { %v2410_v6 = vshll.u32 %v2409_v24, 16 }
 0x456   :  { %v2411_v48 = vadd.s32 %v2410_v6, %v2408_v52 }
 0x458   :  { %v2413_v12 = vsel %vm2412_vm11, %v2411_v48, 0 }
 0x4b1   :  { %v2387_v35 = vpop.xlane.xlu0 %2386 }
 0x4b2   :  { %vm2388_vm9 = vcmp.eq.f32.partialorder %v2385_v56, %v2387_v35  ;;  %v2393_v55 = vcvt.f32.s32 %v2387_v35 }
 0x4b3   :  { %v2389_v57 = vsel %vm2388_vm9, %v2384_v13, inf  ;;  %vm4219_vm9 = vcmp.eq.s32.totalorder %v2824_v2, 3 }
 0x4b4   :  { %2390 = vmin.xlane.f32.xlu2 %v2389_v57  ;;  %v2394_v1 = vshll.u32 %v2393_v55, 16  ;;  %v2499_v57 = vld [vmem:[#allocation2 + $0x20] sm:$0xff] }
 0x527   :  { %v2391_v28 = vpop.xlane.xlu2 %2390 }
 0x528   :  { %v2392_v53 = vcvt.f32.s32 %v2391_v28 }
 0x52a   :  { %v4038_v16 = vadd.s32 %v2394_v1, %v2392_v53 }
 0x52c   :  { %v2414_v29 = vsel %vm4215_vm4, %v4038_v16, %v2413_v12  ;;  %vm2541_vm4 = vcmp.gt.s32.totalorder %v2824_v2, 2 }
 0x52d   :  { %2419 = vperm.xlu0 %2670, %v2414_v29  }
 0x59f   :  { %v4043_v26 = vpop.permute.xlu0 %2419 }
 0x5a0   :  { %vm2422_vm14 = vcmp.eq.s32.totalorder %v2841_v19, %v4043_v26 }
 0x5a1   :  { %v2423_v32 = vsel %vm2422_vm14, %v2396_v25, 0  ;;  %vm4220_vm14 = vcmp.eq.s32.totalorder %v2824_v2, 2 }
 0x5a2   :  { %v2424_v11 = vsel %vm161_vm7, %v2423_v32, 0 }
 0x5a3   :  { %v2426_v63 = vshrl.u32 %v2424_v11, 16  ;;  %v2425_v31 = vand.u32 65535, %v2424_v11 }
 0x5a5   :  { %v2428_v0 = vcvt.s32.f32 %v2426_v63  ;;  %v2427_v27 = vcvt.s32.f32 %v2425_v31  ;;  %v2525_v31 = vld [vmem:[#allocation2 + $0x18] sm:$0xff] }
 0x5a7   :  { %2431 = vadd.xlane.f32.xlu1 %v2428_v0  ;;  %2429 = vadd.xlane.f32.xlu2 %v2427_v27 }
 0x61a   :  { %v2432_v60 = vpop.xlane.xlu1 %2431  ;;  %v2430_v49 = vpop.xlane.xlu2 %2429 }
 0x61b   :  { %v2434_v34 = vcvt.f32.s32 %v2432_v60  ;;  %v2433_v33 = vcvt.f32.s32 %v2430_v49 }
 0x61d   :  { %v2435_v61 = vshll.u32 %v2434_v34, 16 }
 0x61f   :  { %v2436_v21 = vadd.s32 %v2435_v61, %v2433_v33 }
 0x621   :  { %v2438_v20 = vsel %vm2437_vm2, %v2436_v21, 0 }
 0x622   :  { %v2439_v39 = vsel %vm4216_vm15, %v4038_v16, %v2438_v20  ;;  %vm2566_vm15 = vcmp.gt.s32.totalorder %v2824_v2, 1 }
 0x623   :  { %2444 = vperm.xlu1 %2671, %v2439_v39  }
 0x695   :  { %v4052_v40 = vpop.permute.xlu1 %2444 }
 0x696   :  { %vm2448_vm13 = vcmp.eq.s32.totalorder %v2841_v19, %v4052_v40 }
 0x697   :  { %v2449_v41 = vsel %vm2448_vm13, %v2447_v18, 0  ;;  %vm4221_vm13 = vcmp.eq.s32.totalorder %v2824_v2, 1 }
 0x698   :  { %v2450_v3 = vsel %vm161_vm7, %v2449_v41, 0 }
 0x699   :  { %v2452_v9 = vshrl.u32 %v2450_v3, 16  ;;  %v2451_v5 = vand.u32 65535, %v2450_v3 }
 0x69b   :  { %v2454_v46 = vcvt.s32.f32 %v2452_v9  ;;  %v2453_v50 = vcvt.s32.f32 %v2451_v5  ;;  %v2550_v5 = vld [vmem:[#allocation2 + $0x10] sm:$0xff] }
 0x69d   :  { %2457 = vadd.xlane.f32.xlu2 %v2454_v46 }
 0x6a5   :  { %2455 = vadd.xlane.f32.xlu2 %v2453_v50 }
 0x710   :  { %v2458_v43 = vpop.xlane.xlu2 %2457 }
 0x711   :  { %v2460_v51 = vcvt.f32.s32 %v2458_v43 }
 0x713   :  { %v2461_v59 = vshll.u32 %v2460_v51, 16 }
 0x718   :  { %v2456_v36 = vpop.xlane.xlu2 %2455 }
 0x719   :  { %v2459_v44 = vcvt.f32.s32 %v2456_v36 }
 0x71b   :  { %v2462_v15 = vadd.s32 %v2461_v59, %v2459_v44 }
 0x71d   :  { %v2464_v47 = vsel %vm2463_vm0, %v2462_v15, 0 }
 0x71e   :  { %v2465_v17 = vsel %vm4217_vm1, %v4038_v16, %v2464_v47  ;;  %vm2592_vm1 = vcmp.gt.s32.totalorder %v2824_v2, 0 }
 0x71f   :  { %2470 = vperm.xlu2 %2672, %v2465_v17  }
 0x779   :  { %v4061_v38 = vpop.permute.xlu2 %2470 }
 0x77a   :  { %vm2474_vm8 = vcmp.eq.s32.totalorder %v2841_v19, %v4061_v38 }
 0x77b   :  { %v2475_v25 = vsel %vm2474_vm8, %v2473_v30, 0  ;;  %vm2591_vm8 = vcmp.eq.s32.totalorder %v2824_v2, 0 }
 0x77c   :  { %v2476_v8 = vsel %vm161_vm7, %v2475_v25, 0 }
 0x77d   :  { %v2478_v10 = vshrl.u32 %v2476_v8, 16  ;;  %v2477_v45 = vand.u32 65535, %v2476_v8 }
 0x77f   :  { %v2480_v54 = vcvt.s32.f32 %v2478_v10  ;;  %v2479_v14 = vcvt.s32.f32 %v2477_v45 }
 0x781   :  { %2483 = vadd.xlane.f32.xlu1 %v2480_v54  ;;  %2481 = vadd.xlane.f32.xlu0 %v2479_v14  ;;  %v2575_v14 = vld [vmem:[#allocation2 + $0x8] sm:$0xff] }
 0x7f4   :  { %v2484_v42 = vpop.xlane.xlu1 %2483  ;;  %v2482_v4 = vpop.xlane.xlu0 %2481 }
 0x7f5   :  { %v2486_v37 = vcvt.f32.s32 %v2484_v42  ;;  %v2485_v23 = vcvt.f32.s32 %v2482_v4 }
 0x7f7   :  { %v2487_v58 = vshll.u32 %v2486_v37, 16 }
 0x7f9   :  { %v2488_v56 = vadd.s32 %v2487_v58, %v2485_v23 }
 0x7fb   :  { %v2490_v62 = vsel %vm2489_vm12, %v2488_v56, 0  ;;  %vm2415_vm12 = vcmp.eq.s32.totalorder %v2841_v19, 7 }
 0x7fc   :  { %v2491_v35 = vsel %vm4218_vm10, %v4038_v16, %v2490_v62  ;;  %vm2440_vm10 = vcmp.eq.s32.totalorder %v2841_v19, 6 }
 0x7fd   :  { %2496 = vperm.xlu2 %2672, %v2491_v35  }
 0x857   :  { %v4070_v13 = vpop.permute.xlu2 %2496 }
 0x858   :  { %vm2500_vm3 = vcmp.eq.s32.totalorder %v2841_v19, %v4070_v13 }
 0x859   :  { %v2501_v7 = vsel %vm2500_vm3, %v2499_v57, 0  ;;  %vm2466_vm3 = vcmp.eq.s32.totalorder %v2841_v19, 5 }
 0x85a   :  { %v2502_v24 = vsel %vm161_vm7, %v2501_v7, 0 }
 0x85b   :  { %v2504_v22 = vshrl.u32 %v2502_v24, 16  ;;  %v2503_v6 = vand.u32 65535, %v2502_v24 }
 0x85d   :  { %v2506_v55 = vcvt.s32.f32 %v2504_v22  ;;  %v2505_v52 = vcvt.s32.f32 %v2503_v6 }
 0x85f   :  { %2509 = vadd.xlane.f32.xlu2 %v2506_v55  ;;  %2507 = vadd.xlane.f32.xlu1 %v2505_v52  ;;  %v2421_v52 = vsel %vm2415_vm12, %v4043_v26, 0 }
 0x8d2   :  { %v2510_v48 = vpop.xlane.xlu2 %2509  ;;  %v2508_v28 = vpop.xlane.xlu1 %2507 }
 0x8d3   :  { %v2512_v1 = vcvt.f32.s32 %v2510_v48  ;;  %v2511_v12 = vcvt.f32.s32 %v2508_v28  ;;  %v2446_v48 = vsel %vm2440_vm10, %v4052_v40, %v2421_v52 }
 0x8d4   :  { %v2472_v2 = vsel %vm2466_vm3, %v4061_v38, %v2446_v48 }
 0x8d5   :  { %v2513_v53 = vshll.u32 %v2512_v1, 16 }
 0x8d7   :  { %v2514_v29 = vadd.s32 %v2513_v53, %v2511_v12 }
 0x8d9   :  { %v2516_v32 = vsel %vm2515_vm5, %v2514_v29, 0  ;;  %vm2492_vm5 = vcmp.eq.s32.totalorder %v2841_v19, 4 }
 0x8da   :  { %v2517_v11 = vsel %vm4219_vm9, %v4038_v16, %v2516_v32  ;;  %vm2518_vm9 = vcmp.eq.s32.totalorder %v2841_v19, 3  ;;  %v2498_v28 = vsel %vm2492_vm5, %v4070_v13, %v2472_v2 }
 0x8db   :  { %2522 = vperm.xlu0 %2670, %v2517_v11  }
 0x94d   :  { %v4079_v63 = vpop.permute.xlu0 %2522 }
 0x94e   :  { %vm2526_vm11 = vcmp.eq.s32.totalorder %v2841_v19, %v4079_v63 }
 0x94f   :  { %v2527_v0 = vsel %vm2526_vm11, %v2525_v31, 0  ;;  %vm4222_vm11 = vcmp.eq.s32.totalorder %v2841_v19, 2 }
 0x950   :  { %v2528_v27 = vsel %vm161_vm7, %v2527_v0, 0 }
 0x951   :  { %v2530_v60 = vshrl.u32 %v2528_v27, 16  ;;  %v2529_v34 = vand.u32 65535, %v2528_v27 }
 0x953   :  { %v2532_v49 = vcvt.s32.f32 %v2530_v60  ;;  %v2531_v61 = vcvt.s32.f32 %v2529_v34 }
 0x955   :  { %2535 = vadd.xlane.f32.xlu1 %v2532_v49 }
 0x95d   :  { %2533 = vadd.xlane.f32.xlu1 %v2531_v61 }
 0x9c8   :  { %v2536_v33 = vpop.xlane.xlu1 %2535 }
 0x9c9   :  { %v2538_v21 = vcvt.f32.s32 %v2536_v33 }
 0x9cb   :  { %v2539_v39 = vshll.u32 %v2538_v21, 16 }
 0x9d0   :  { %v2534_v20 = vpop.xlane.xlu1 %2533 }
 0x9d1   :  { %v2537_v18 = vcvt.f32.s32 %v2534_v20 }
 0x9d3   :  { %v2540_v41 = vadd.s32 %v2539_v39, %v2537_v18 }
 0x9d5   :  { %v2542_v3 = vsel %vm2541_vm4, %v2540_v41, 0  ;;  %vm4223_vm4 = vcmp.eq.s32.totalorder %v2841_v19, 1 }
 0x9d6   :  { %v2543_v9 = vsel %vm4220_vm14, %v4038_v16, %v2542_v3 }
 0x9d7   :  { %2547 = vperm.xlu1 %2671, %v2543_v9  }
 0xa49   :  { %v2548_v46 = vpop.permute.xlu1 %2547 }
 0xa4a   :  { %vm2551_vm2 = vcmp.eq.s32.totalorder %v2841_v19, %v2548_v46 }
 0xa4b   :  { %v2552_v50 = vsel %vm2551_vm2, %v2550_v5, 0 }
 0xa4c   :  { %v2553_v43 = vsel %vm161_vm7, %v2552_v50, 0 }
 0xa4d   :  { %v2555_v51 = vshrl.u32 %v2553_v43, 16  ;;  %v2554_v36 = vand.u32 65535, %v2553_v43 }
 0xa4f   :  { %v2557_v59 = vcvt.s32.f32 %v2555_v51  ;;  %v2556_v44 = vcvt.s32.f32 %v2554_v36 }
 0xa51   :  { %2560 = vadd.xlane.f32.xlu0 %v2557_v59  ;;  %2558 = vadd.xlane.f32.xlu2 %v2556_v44 }
 0xac4   :  { %v2561_v15 = vpop.xlane.xlu0 %2560  ;;  %v2559_v47 = vpop.xlane.xlu2 %2558 }
 0xac5   :  { %v2563_v17 = vcvt.f32.s32 %v2561_v15  ;;  %v2562_v25 = vcvt.f32.s32 %v2559_v47 }
 0xac7   :  { %v2564_v30 = vshll.u32 %v2563_v17, 16 }
 0xac9   :  { %v2565_v8 = vadd.s32 %v2564_v30, %v2562_v25 }
 0xacb   :  { %v2567_v10 = vsel %vm2566_vm15, %v2565_v8, 0 }
 0xacc   :  { %v2568_v45 = vsel %vm4221_vm13, %v4038_v16, %v2567_v10 }
 0xacd   :  { %2572 = vperm.xlu2 %2672, %v2568_v45  }
 0xb27   :  { %v2573_v54 = vpop.permute.xlu2 %2572 }
 0xb28   :  { %vm2576_vm0 = vcmp.eq.s32.totalorder %v2841_v19, %v2573_v54 }
 0xb29   :  { %v2577_v42 = vsel %vm2576_vm0, %v2575_v14, 0 }
 0xb2a   :  { %v2578_v4 = vsel %vm161_vm7, %v2577_v42, 0 }
 0xb2b   :  { %v2580_v37 = vshrl.u32 %v2578_v4, 16  ;;  %v2579_v58 = vand.u32 65535, %v2578_v4 }
 0xb2d   :  { %v2582_v23 = vcvt.s32.f32 %v2580_v37  ;;  %v2581_v56 = vcvt.s32.f32 %v2579_v58 }
 0xb2f   :  { %2585 = vadd.xlane.f32.xlu1 %v2582_v23  ;;  %2583 = vadd.xlane.f32.xlu2 %v2581_v56 }
 0xba2   :  { %v2586_v62 = vpop.xlane.xlu1 %2585  ;;  %v2584_v35 = vpop.xlane.xlu2 %2583 }
 0xba3   :  { %v2588_v57 = vcvt.f32.s32 %v2586_v62  ;;  %v2587_v24 = vcvt.f32.s32 %v2584_v35 }
 0xba5   :  { %v2589_v7 = vshll.u32 %v2588_v57, 16 }
 0xba7   :  { %v2590_v22 = vadd.s32 %v2589_v7, %v2587_v24 }
 0xba9   :  { %v2593_v6 = vsel %vm2592_vm1, %v2590_v22, 0 }
 0xbaa   :  { %v2594_v55 = vsel %vm2591_vm8, %v4038_v16, %v2593_v6  ;;  %v2524_v16 = vsel %vm2518_vm9, %v4079_v63, %v2498_v28 }
 0xbab   :  { %2598 = vperm.xlu0 %2670, %v2594_v55   ;;  %v2549_v26 = vsel %vm4222_vm11, %v2548_v46, %v2524_v16 }
 0xbac   :  { %v2574_v40 = vsel %vm4223_vm4, %v2573_v54, %v2549_v26 }
 0xc1d   :  { %v2599_v1 = vpop.permute.xlu0 %2598 }
 0xc1e   :  { %v2600_v38 = vsel %vm2397_vm6, %v2599_v1, %v2574_v40 }
 0xc1f   :  { %2601 = vst.msk [vmem:[#allocation6] sm:$0xff] %vm161_vm7, %v2600_v38 }
 0xc20   :  { %2614 = dma.vmem_to_hbm [thread:$0]  %s2610_s5, 128, %s2612_s8, [#allocation5]  }
 0xc21   :  { %2782 = dma.done.wait [#allocation5], 128  }
 0xc22   :  { %2783 = vsyncadd [#allocation5], 4294967168 }
 0xc23   :  { %2623 = vsyncpa [#allocation4], 1 }
 0xc24   :  { %2624 = vsyncpa [#allocation5], 1 }

</bundles_post_ra>
